<compile_context>
chip_gen: v7x
topology: tpu7x:2x2x1
jax: 0.10.0
libtpu: 0.0.40
codegen_flags: <defaults>
</compile_context>

<pallas_src>
import functools

import jax
import jax.numpy as jnp
from jax.experimental import pallas as pl
from jax.experimental.pallas import tpu as pltpu

LANE = 128      # lane width (last dim)
SUBLANE = 8     # f32 sublane count (second-to-last dim)


def _round_up(n, m):
    return ((n + m - 1) // m) * m


def _sigmoid(x):
    # sigmoid(x) = 0.5*tanh(0.5*x) + 0.5 : single EUP op instead of exp+recip.
    return 0.5 * jnp.tanh(0.5 * x) + 0.5


# -----------------------------------------------------------------------------
# Fused kernel: all GRU layers + FC head(s), single grid point, all in VMEM.
# -----------------------------------------------------------------------------
def _fused_gru_kernel(*args, num_layers, seq_len, t_chunk, b_pad, h_pad,
                      has_non_ts, unroll):
    T, B, H = seq_len, b_pad, h_pad

    # ---- unpack refs (static arg layout) ----
    idx = 0
    gi0_ref = args[idx]; idx += 1                     # (T, B, 3H) f32 layer-0 gi
    if has_non_ts:
        nts_ref = args[idx]; idx += 1                 # (B, NTS_pad) f32
    layer_refs = []
    for layer in range(num_layers):
        if layer == 0:
            # layer 0: gi already computed in the XLA prologue.
            layer_refs.append((None, None, args[idx], args[idx + 1])); idx += 2
        else:
            # (w_ih_t bf16, b_ih f32 folded, w_hh_t bf16, b_hh_n f32)
            layer_refs.append(tuple(args[idx:idx + 4])); idx += 4
    if has_non_ts:
        w_nts_ref, b_nts_ref, w_head_ref, b_head_ref = args[idx:idx + 4]; idx += 4
    else:
        w_head_ref, b_head_ref = args[idx:idx + 2]; idx += 2
    out_ref = args[idx]; idx += 1                     # (B, OUT_pad) f32
    gi_scr, seq_scr = args[idx], args[idx + 1]        # (Tc*B, 3H) f32, (T, B, H) f32

    def gru_cell(gi, gh, b_hn, h_prev):
        # Gate columns are [r|z|n] x 128 lanes each, so the r|z block is the
        # first 256-lane MXU pass and its EUP work can start while n drains.
        r = _sigmoid(gi[:, 0:H] + gh[:, 0:H])
        z = _sigmoid(gi[:, H:2 * H] + gh[:, H:2 * H])
        n = jnp.tanh(gi[:, 2 * H:3 * H] + r * (gh[:, 2 * H:3 * H] + b_hn))
        return n + z * (h_prev - n)                   # == (1-z)*n + z*h_prev

    h = jnp.zeros((B, H), jnp.float32)
    for layer in range(num_layers):
        w_ih_ref, b_ih_ref, w_hh_ref, b_hn_ref = layer_refs[layer]
        w_hh = w_hh_ref[...]                          # bf16 (H, 3H), hoisted
        b_hn = b_hn_ref[...]                          # f32 (1, H)
        write_seq = layer < num_layers - 1            # last layer: only final h
        h = jnp.zeros((B, H), jnp.float32)

        if layer == 0:
            def step0(t, h_prev):
                gi = gi0_ref[t]                       # (B, 3H) f32
                gh = jnp.dot(h_prev.astype(jnp.bfloat16), w_hh,
                             preferred_element_type=jnp.float32)
                h_new = gru_cell(gi, gh, b_hn, h_prev)
                if write_seq:
                    seq_scr[t] = h_new                # feeds next layer
                return h_new
            h = jax.lax.fori_loop(0, T, step0, h, unroll=min(unroll, T))
        else:
            w_ih = w_ih_ref[...]                      # bf16 (H, 3H)
            b_ih = b_ih_ref[...]                      # f32 (1, 3H), b_hh[r|z] folded
            # Chunked hoisted input projection: one MXU matmul per chunk keeps
            # the gi scratch at (T_CHUNK*B, 3H) regardless of T.
            t0 = 0
            while t0 < T:
                tc = min(t_chunk, T - t0)
                x_chunk = seq_scr[pl.ds(t0, tc)].reshape(tc * B, H)
                gi_scr[pl.ds(0, tc * B), :] = (
                    jnp.dot(x_chunk.astype(jnp.bfloat16), w_ih,
                            preferred_element_type=jnp.float32) + b_ih)

                def step(t, h_prev, t0=t0):
                    start = pl.multiple_of(t * B, B)
                    gi = gi_scr[pl.ds(start, B), :]   # (B, 3H), lane-aligned gates
                    gh = jnp.dot(h_prev.astype(jnp.bfloat16), w_hh,
                                 preferred_element_type=jnp.float32)
                    h_new = gru_cell(gi, gh, b_hn, h_prev)
                    if write_seq:
                        seq_scr[t0 + t] = h_new
                    return h_new
                h = jax.lax.fori_loop(0, tc, step, h, unroll=min(unroll, tc))
                t0 += tc

    # ---- FC head(s) on the last hidden state, fused in the same kernel ----
    # nn.Dropout on gru_out is identity in eval mode.
    if has_non_ts:
        nts_out = (jnp.dot(nts_ref[...].astype(jnp.bfloat16), w_nts_ref[...],
                           preferred_element_type=jnp.float32) + b_nts_ref[...])
        combined = jnp.maximum(jnp.concatenate([h, nts_out], axis=-1), 0.0)
        out = (jnp.dot(combined.astype(jnp.bfloat16), w_head_ref[...],
                       preferred_element_type=jnp.float32) + b_head_ref[...])
    else:
        out = (jnp.dot(jnp.maximum(h, 0.0).astype(jnp.bfloat16), w_head_ref[...],
                       preferred_element_type=jnp.float32) + b_head_ref[...])
    out_ref[...] = out.astype(out_ref.dtype)


# -----------------------------------------------------------------------------
# Parameter construction: PyTorch-style init, stored pre-transposed, padded to
# lane-friendly shapes (128 lanes per gate), weights in bf16, biases folded.
# -----------------------------------------------------------------------------
def _pad_gru_weight(w, din, din_pad, h, h_pad):
    # w: (3H, din) PyTorch layout -> (din_pad, 3*h_pad), gate g at cols [g*h_pad, +h)
    wt = w.T
    out = jnp.zeros((din_pad, 3 * h_pad), jnp.float32)
    for g in range(3):
        out = out.at[:din, g * h_pad:g * h_pad + h].set(wt[:, g * h:(g + 1) * h])
    return out


def _fold_gru_bias(b_ih, b_hh, h, h_pad):
    # fold b_hh[r], b_hh[z] into b_ih; keep b_hh[n] separate (needed inside r*(...)).
    folded = jnp.zeros((1, 3 * h_pad), jnp.float32)
    folded = folded.at[0, 0:h].set(b_ih[0:h] + b_hh[0:h])
    folded = folded.at[0, h_pad:h_pad + h].set(b_ih[h:2 * h] + b_hh[h:2 * h])
    folded = folded.at[0, 2 * h_pad:2 * h_pad + h].set(b_ih[2 * h:3 * h])
    b_hn = jnp.zeros((1, h_pad), jnp.float32).at[0, :h].set(b_hh[2 * h:3 * h])
    return folded, b_hn


def _pad_linear(w, b, in_pad, out_pad, in_row_map=None):
    # w: (out_f, in_f) PyTorch layout -> (in_pad, out_pad), bias -> (1, out_pad)
    out_f, in_f = w.shape
    wt_pad = jnp.zeros((in_pad, out_pad), jnp.float32)
    wt = w.T
    if in_row_map is None:
        wt_pad = wt_pad.at[:in_f, :out_f].set(wt)
    else:
        for src_lo, src_hi, dst_lo in in_row_map:
            wt_pad = wt_pad.at[dst_lo:dst_lo + (src_hi - src_lo), :out_f].set(
                wt[src_lo:src_hi])
    b_pad = jnp.zeros((1, out_pad), jnp.float32).at[0, :out_f].set(b)
    return wt_pad, b_pad


def init_params(key, input_dim, hidden_dim, num_layers, output_dim,
                non_ts_input_dim=None):
    h_pad = _round_up(hidden_dim, LANE)
    out_pad = _round_up(output_dim, LANE)
    nts_pad = _round_up(non_ts_input_dim, LANE) if non_ts_input_dim is not None else None

    params = {
        "cfg": {
            "input_dim": input_dim, "hidden_dim": hidden_dim,
            "num_layers": num_layers, "output_dim": output_dim,
            "non_ts_input_dim": non_ts_input_dim,
            "h_pad": h_pad, "out_pad": out_pad, "nts_pad": nts_pad,
        },
        "gru_layers": [],
    }

    H = hidden_dim
    k_gru = 1.0 / (hidden_dim ** 0.5)
    for layer in range(num_layers):
        din = input_dim if layer == 0 else hidden_dim
        # layer 0's input projection runs in the XLA prologue: no D padding.
        din_pad = input_dim if layer == 0 else h_pad
        key, k1, k2, k3, k4 = jax.random.split(key, 5)
        w_ih = jax.random.uniform(k1, (3 * H, din), jnp.float32, -k_gru, k_gru)
        w_hh = jax.random.uniform(k2, (3 * H, H), jnp.float32, -k_gru, k_gru)
        b_ih = jax.random.uniform(k3, (3 * H,), jnp.float32, -k_gru, k_gru)
        b_hh = jax.random.uniform(k4, (3 * H,), jnp.float32, -k_gru, k_gru)
        w_ih_t = _pad_gru_weight(w_ih, din, din_pad, H, h_pad)
        if layer > 0:
            w_ih_t = w_ih_t.astype(jnp.bfloat16)      # MXU-native in-kernel matmul
        b_ih_f, b_hn = _fold_gru_bias(b_ih, b_hh, H, h_pad)
        params["gru_layers"].append({
            "w_ih_t": w_ih_t,
            "b_ih": b_ih_f,
            "w_hh_t": _pad_gru_weight(w_hh, H, h_pad, H, h_pad).astype(jnp.bfloat16),
            "b_hh_n": b_hn,
        })

    k_lin = 1.0 / (hidden_dim ** 0.5)
    key, kw, kb = jax.random.split(key, 3)
    w = jax.random.uniform(kw, (output_dim, hidden_dim), jnp.float32, -k_lin, k_lin)
    b = jax.random.uniform(kb, (output_dim,), jnp.float32, -k_lin, k_lin)
    w_t, bb = _pad_linear(w, b, h_pad, out_pad)
    params["fc_gru"] = {"w_t": w_t.astype(jnp.bfloat16), "b": bb}

    if non_ts_input_dim is not None:
        k_nts = 1.0 / (non_ts_input_dim ** 0.5)
        key, kw, kb = jax.random.split(key, 3)
        w = jax.random.uniform(kw, (hidden_dim, non_ts_input_dim), jnp.float32, -k_nts, k_nts)
        b = jax.random.uniform(kb, (hidden_dim,), jnp.float32, -k_nts, k_nts)
        w_t, bb = _pad_linear(w, b, nts_pad, h_pad)
        params["fc_non_ts"] = {"w_t": w_t.astype(jnp.bfloat16), "b": bb}

        k_c = 1.0 / ((2 * hidden_dim) ** 0.5)
        key, kw, kb = jax.random.split(key, 3)
        w = jax.random.uniform(kw, (output_dim, 2 * hidden_dim), jnp.float32, -k_c, k_c)
        b = jax.random.uniform(kb, (output_dim,), jnp.float32, -k_c, k_c)
        # combined = [gru_out (H) | non_ts_output (H)] in padded 2*h_pad layout.
        w_t, bb = _pad_linear(w, b, 2 * h_pad, out_pad,
                              in_row_map=[(0, H, 0), (H, 2 * H, h_pad)])
        params["fc_combined"] = {"w_t": w_t.astype(jnp.bfloat16), "b": bb}
    return params


# -----------------------------------------------------------------------------
# Full forward pass (matches TimeSeriesGRU2.forward, eval mode).
# -----------------------------------------------------------------------------
def time_series_gru2_forward(params, x_ts, x_non_ts=None):
    cfg = params["cfg"]
    B, T, D = x_ts.shape
    B_pad = _round_up(max(B, 1), SUBLANE)
    H_pad, OUT_pad = cfg["h_pad"], cfg["out_pad"]
    num_layers = cfg["num_layers"]
    has_non_ts = x_non_ts is not None
    t_chunk = min(T, 64)            # bounds in-kernel gi scratch regardless of T
    unroll = max(1, min(8, T))      # bounded unroll of the serial time loop

    # Tiny fused XLA prologue: layer-0 input projection (off the serial path,
    # avoids padding D to 128 lanes), batch padded to 8 sublanes, time-major.
    l0 = params["gru_layers"][0]
    gi0_btg = (jnp.einsum("btd,dg->btg", x_ts.astype(jnp.float32), l0["w_ih_t"])
               + l0["b_ih"])
    gi0 = jnp.zeros((T, B_pad, 3 * H_pad), jnp.float32)
    gi0 = gi0.at[:, :B, :].set(jnp.transpose(gi0_btg, (1, 0, 2)))

    args = [gi0]
    if has_non_ts:
        nts_flat = x_non_ts.reshape(B, -1).astype(jnp.float32)   # nn.Flatten
        nts = jnp.zeros((B_pad, cfg["nts_pad"]), jnp.float32)
        nts = nts.at[:B, :nts_flat.shape[1]].set(nts_flat)
        args.append(nts)
    for li, layer in enumerate(params["gru_layers"]):
        if li > 0:
            args += [layer["w_ih_t"], layer["b_ih"]]
        args += [layer["w_hh_t"], layer["b_hh_n"]]
    if has_non_ts:
        args += [params["fc_non_ts"]["w_t"], params["fc_non_ts"]["b"],
                 params["fc_combined"]["w_t"], params["fc_combined"]["b"]]
    else:
        args += [params["fc_gru"]["w_t"], params["fc_gru"]["b"]]

    scratch_shapes = [
        pltpu.VMEM((t_chunk * B_pad, 3 * H_pad), jnp.float32),  # per-chunk gi
        pltpu.VMEM((T, B_pad, H_pad), jnp.float32),             # inter-layer sequence
    ]
    scratch_bytes = (t_chunk * B_pad * 3 * H_pad + T * B_pad * H_pad) * 4
    arg_bytes = sum(int(a.size) * a.dtype.itemsize for a in args)
    out_bytes = B_pad * OUT_pad * 4
    vmem_limit = int(min(max(2 * (arg_bytes + out_bytes + scratch_bytes) + (4 << 20),
                             16 << 20), 120 << 20))

    kernel = functools.partial(
        _fused_gru_kernel, num_layers=num_layers, seq_len=T, t_chunk=t_chunk,
        b_pad=B_pad, h_pad=H_pad, has_non_ts=has_non_ts, unroll=unroll)

    out_pad_arr = pl.pallas_call(
        kernel,
        out_shape=jax.ShapeDtypeStruct((B_pad, OUT_pad), jnp.float32),
        in_specs=[pl.BlockSpec(memory_space=pltpu.MemorySpace.VMEM)] * len(args),
        out_specs=pl.BlockSpec(memory_space=pltpu.MemorySpace.VMEM),
        scratch_shapes=scratch_shapes,
        compiler_params=pltpu.CompilerParams(vmem_limit_bytes=vmem_limit),
    )(*args)
    return out_pad_arr[:B, :cfg["output_dim"]]


if __name__ == "__main__":
    B, T, D = 2, 8, 4          # batch, seq len, input_dim
    H, L = 32, 2               # hidden_dim, num_layers
    OUT = 3                    # output_dim
    NON_TS = 5                 # non_ts_input_dim

    key = jax.random.PRNGKey(0)
    key, kp, kx, kn = jax.random.split(key, 4)

    params = init_params(kp, D, H, L, OUT, non_ts_input_dim=NON_TS)
    x_ts = jax.random.normal(kx, (B, T, D), jnp.float32)
    x_non_ts = jax.random.normal(kn, (B, NON_TS), jnp.float32)

    # Branch 1: time-series only (x_non_ts is None)
    out_ts = jax.block_until_ready(time_series_gru2_forward(params, x_ts))
    assert out_ts.shape == (B, OUT)

    # Branch 2: with non-time-series features
    out_comb = jax.block_until_ready(time_series_gru2_forward(params, x_ts, x_non_ts))
    assert out_comb.shape == (B, OUT)

    print("KERNEL_OK")
</pallas_src>

<mosaic_0001>
module attributes {stable_mosaic.version = 11 : i64} {
  func.func @_fused_gru_kernel(%arg0: memref<8x8x384xf32, #tpu.memory_space<vmem>>, %arg1: memref<128x384xbf16, #tpu.memory_space<vmem>>, %arg2: memref<1x128xf32, #tpu.memory_space<vmem>>, %arg3: memref<128x384xbf16, #tpu.memory_space<vmem>>, %arg4: memref<1x384xf32, #tpu.memory_space<vmem>>, %arg5: memref<128x384xbf16, #tpu.memory_space<vmem>>, %arg6: memref<1x128xf32, #tpu.memory_space<vmem>>, %arg7: memref<128x128xbf16, #tpu.memory_space<vmem>>, %arg8: memref<1x128xf32, #tpu.memory_space<vmem>>, %arg9: memref<8x128xf32, #tpu.memory_space<vmem>>, %arg10: memref<64x384xf32, #tpu.memory_space<vmem>>, %arg11: memref<8x8x128xf32, #tpu.memory_space<vmem>>) attributes {dimension_semantics = [], scalar_prefetch = 0 : i64, scratch_operands = 2 : i64, tpu.core_type = #tpu.core_type<tc>} {
    %c0 = arith.constant 0 : index
    %c0_0 = arith.constant 0 : index
    %0 = vector.load %arg1[%c0, %c0_0] : memref<128x384xbf16, #tpu.memory_space<vmem>>, vector<128x384xbf16>
    %c0_1 = arith.constant 0 : index
    %c0_2 = arith.constant 0 : index
    %1 = vector.load %arg2[%c0_1, %c0_2] : memref<1x128xf32, #tpu.memory_space<vmem>>, vector<1x128xf32>
    %cst = arith.constant 0.000000e+00 : f32
    %2 = vector.broadcast %cst : f32 to vector<8x128xf32>
    %c0_i32 = arith.constant 0 : i32
    %3 = arith.index_cast %c0_i32 : i32 to index
    %c0_3 = arith.constant 0 : index
    %c0_4 = arith.constant 0 : index
    %4 = vector.load %arg0[%3, %c0_3, %c0_4] : memref<8x8x384xf32, #tpu.memory_space<vmem>>, vector<1x8x384xf32>
    %5 = vector.shape_cast %4 : vector<1x8x384xf32> to vector<8x384xf32>
    %6 = arith.truncf %2 : vector<8x128xf32> to vector<8x128xbf16>
    %cst_5 = arith.constant dense<0.000000e+00> : vector<8x384xf32>
    %7 = tpu.matmul %6, %0, %cst_5 {dimension_numbers = #tpu.dot_dimension_numbers<[1], [0], [0], [1], [0, 0, 1, 1], [], []>} : vector<8x128xbf16>, vector<128x384xbf16>, vector<8x384xf32> -> vector<8x384xf32>
    %8 = vector.extract_strided_slice %5 {offsets = [0, 0], sizes = [8, 128], strides = [1, 1]} : vector<8x384xf32> to vector<8x128xf32>
    %9 = vector.extract_strided_slice %7 {offsets = [0, 0], sizes = [8, 128], strides = [1, 1]} : vector<8x384xf32> to vector<8x128xf32>
    %10 = arith.addf %8, %9 : vector<8x128xf32>
    %cst_6 = arith.constant 5.000000e-01 : f32
    %11 = vector.broadcast %cst_6 : f32 to vector<8x128xf32>
    %12 = arith.mulf %11, %10 : vector<8x128xf32>
    %13 = math.tanh %12 : vector<8x128xf32>
    %cst_7 = arith.constant 5.000000e-01 : f32
    %14 = vector.broadcast %cst_7 : f32 to vector<8x128xf32>
    %15 = arith.mulf %14, %13 : vector<8x128xf32>
    %cst_8 = arith.constant 5.000000e-01 : f32
    %16 = vector.broadcast %cst_8 : f32 to vector<8x128xf32>
    %17 = arith.addf %15, %16 : vector<8x128xf32>
    %18 = vector.extract_strided_slice %5 {offsets = [0, 128], sizes = [8, 128], strides = [1, 1]} : vector<8x384xf32> to vector<8x128xf32>
    %19 = vector.extract_strided_slice %7 {offsets = [0, 128], sizes = [8, 128], strides = [1, 1]} : vector<8x384xf32> to vector<8x128xf32>
    %20 = arith.addf %18, %19 : vector<8x128xf32>
    %cst_9 = arith.constant 5.000000e-01 : f32
    %21 = vector.broadcast %cst_9 : f32 to vector<8x128xf32>
    %22 = arith.mulf %21, %20 : vector<8x128xf32>
    %23 = math.tanh %22 : vector<8x128xf32>
    %cst_10 = arith.constant 5.000000e-01 : f32
    %24 = vector.broadcast %cst_10 : f32 to vector<8x128xf32>
    %25 = arith.mulf %24, %23 : vector<8x128xf32>
    %cst_11 = arith.constant 5.000000e-01 : f32
    %26 = vector.broadcast %cst_11 : f32 to vector<8x128xf32>
    %27 = arith.addf %25, %26 : vector<8x128xf32>
    %28 = vector.extract_strided_slice %5 {offsets = [0, 256], sizes = [8, 128], strides = [1, 1]} : vector<8x384xf32> to vector<8x128xf32>
    %29 = vector.extract_strided_slice %7 {offsets = [0, 256], sizes = [8, 128], strides = [1, 1]} : vector<8x384xf32> to vector<8x128xf32>
    %30 = vector.broadcast %1 : vector<1x128xf32> to vector<8x128xf32>
    %31 = arith.addf %29, %30 : vector<8x128xf32>
    %32 = arith.mulf %17, %31 : vector<8x128xf32>
    %33 = arith.addf %28, %32 : vector<8x128xf32>
    %34 = math.tanh %33 : vector<8x128xf32>
    %35 = arith.subf %2, %34 : vector<8x128xf32>
    %36 = arith.mulf %27, %35 : vector<8x128xf32>
    %37 = arith.addf %34, %36 : vector<8x128xf32>
    %38 = arith.index_cast %c0_i32 : i32 to index
    %c0_12 = arith.constant 0 : index
    %c0_13 = arith.constant 0 : index
    %39 = vector.load %arg11[%38, %c0_12, %c0_13] : memref<8x8x128xf32, #tpu.memory_space<vmem>>, vector<1x8x128xf32>
    %40 = vector.shape_cast %39 : vector<1x8x128xf32> to vector<8x128xf32>
    %41 = vector.shape_cast %37 : vector<8x128xf32> to vector<1x8x128xf32>
    tpu.vector_store %arg11[%38, %c0_12, %c0_13], %41 {strides = array<i32>} : memref<8x8x128xf32, #tpu.memory_space<vmem>>, vector<1x8x128xf32>,
    %c1_i32 = arith.constant 1 : i32
    %42 = arith.index_cast %c1_i32 : i32 to index
    %c0_14 = arith.constant 0 : index
    %c0_15 = arith.constant 0 : index
    %43 = vector.load %arg0[%42, %c0_14, %c0_15] : memref<8x8x384xf32, #tpu.memory_space<vmem>>, vector<1x8x384xf32>
    %44 = vector.shape_cast %43 : vector<1x8x384xf32> to vector<8x384xf32>
    %45 = arith.truncf %37 : vector<8x128xf32> to vector<8x128xbf16>
    %cst_16 = arith.constant dense<0.000000e+00> : vector<8x384xf32>
    %46 = tpu.matmul %45, %0, %cst_16 {dimension_numbers = #tpu.dot_dimension_numbers<[1], [0], [0], [1], [0, 0, 1, 1], [], []>} : vector<8x128xbf16>, vector<128x384xbf16>, vector<8x384xf32> -> vector<8x384xf32>
    %47 = vector.extract_strided_slice %44 {offsets = [0, 0], sizes = [8, 128], strides = [1, 1]} : vector<8x384xf32> to vector<8x128xf32>
    %48 = vector.extract_strided_slice %46 {offsets = [0, 0], sizes = [8, 128], strides = [1, 1]} : vector<8x384xf32> to vector<8x128xf32>
    %49 = arith.addf %47, %48 : vector<8x128xf32>
    %cst_17 = arith.constant 5.000000e-01 : f32
    %50 = vector.broadcast %cst_17 : f32 to vector<8x128xf32>
    %51 = arith.mulf %50, %49 : vector<8x128xf32>
    %52 = math.tanh %51 : vector<8x128xf32>
    %cst_18 = arith.constant 5.000000e-01 : f32
    %53 = vector.broadcast %cst_18 : f32 to vector<8x128xf32>
    %54 = arith.mulf %53, %52 : vector<8x128xf32>
    %cst_19 = arith.constant 5.000000e-01 : f32
    %55 = vector.broadcast %cst_19 : f32 to vector<8x128xf32>
    %56 = arith.addf %54, %55 : vector<8x128xf32>
    %57 = vector.extract_strided_slice %44 {offsets = [0, 128], sizes = [8, 128], strides = [1, 1]} : vector<8x384xf32> to vector<8x128xf32>
    %58 = vector.extract_strided_slice %46 {offsets = [0, 128], sizes = [8, 128], strides = [1, 1]} : vector<8x384xf32> to vector<8x128xf32>
    %59 = arith.addf %57, %58 : vector<8x128xf32>
    %cst_20 = arith.constant 5.000000e-01 : f32
    %60 = vector.broadcast %cst_20 : f32 to vector<8x128xf32>
    %61 = arith.mulf %60, %59 : vector<8x128xf32>
    %62 = math.tanh %61 : vector<8x128xf32>
    %cst_21 = arith.constant 5.000000e-01 : f32
    %63 = vector.broadcast %cst_21 : f32 to vector<8x128xf32>
    %64 = arith.mulf %63, %62 : vector<8x128xf32>
    %cst_22 = arith.constant 5.000000e-01 : f32
    %65 = vector.broadcast %cst_22 : f32 to vector<8x128xf32>
    %66 = arith.addf %64, %65 : vector<8x128xf32>
    %67 = vector.extract_strided_slice %44 {offsets = [0, 256], sizes = [8, 128], strides = [1, 1]} : vector<8x384xf32> to vector<8x128xf32>
    %68 = vector.extract_strided_slice %46 {offsets = [0, 256], sizes = [8, 128], strides = [1, 1]} : vector<8x384xf32> to vector<8x128xf32>
    %69 = vector.broadcast %1 : vector<1x128xf32> to vector<8x128xf32>
    %70 = arith.addf %68, %69 : vector<8x128xf32>
    %71 = arith.mulf %56, %70 : vector<8x128xf32>
    %72 = arith.addf %67, %71 : vector<8x128xf32>
    %73 = math.tanh %72 : vector<8x128xf32>
    %74 = arith.subf %37, %73 : vector<8x128xf32>
    %75 = arith.mulf %66, %74 : vector<8x128xf32>
    %76 = arith.addf %73, %75 : vector<8x128xf32>
    %77 = arith.index_cast %c1_i32 : i32 to index
    %c0_23 = arith.constant 0 : index
    %c0_24 = arith.constant 0 : index
    %78 = vector.load %arg11[%77, %c0_23, %c0_24] : memref<8x8x128xf32, #tpu.memory_space<vmem>>, vector<1x8x128xf32>
    %79 = vector.shape_cast %78 : vector<1x8x128xf32> to vector<8x128xf32>
    %80 = vector.shape_cast %76 : vector<8x128xf32> to vector<1x8x128xf32>
    tpu.vector_store %arg11[%77, %c0_23, %c0_24], %80 {strides = array<i32>} : memref<8x8x128xf32, #tpu.memory_space<vmem>>, vector<1x8x128xf32>,
    %c2_i32 = arith.constant 2 : i32
    %81 = arith.index_cast %c2_i32 : i32 to index
    %c0_25 = arith.constant 0 : index
    %c0_26 = arith.constant 0 : index
    %82 = vector.load %arg0[%81, %c0_25, %c0_26] : memref<8x8x384xf32, #tpu.memory_space<vmem>>, vector<1x8x384xf32>
    %83 = vector.shape_cast %82 : vector<1x8x384xf32> to vector<8x384xf32>
    %84 = arith.truncf %76 : vector<8x128xf32> to vector<8x128xbf16>
    %cst_27 = arith.constant dense<0.000000e+00> : vector<8x384xf32>
    %85 = tpu.matmul %84, %0, %cst_27 {dimension_numbers = #tpu.dot_dimension_numbers<[1], [0], [0], [1], [0, 0, 1, 1], [], []>} : vector<8x128xbf16>, vector<128x384xbf16>, vector<8x384xf32> -> vector<8x384xf32>
    %86 = vector.extract_strided_slice %83 {offsets = [0, 0], sizes = [8, 128], strides = [1, 1]} : vector<8x384xf32> to vector<8x128xf32>
    %87 = vector.extract_strided_slice %85 {offsets = [0, 0], sizes = [8, 128], strides = [1, 1]} : vector<8x384xf32> to vector<8x128xf32>
    %88 = arith.addf %86, %87 : vector<8x128xf32>
    %cst_28 = arith.constant 5.000000e-01 : f32
    %89 = vector.broadcast %cst_28 : f32 to vector<8x128xf32>
    %90 = arith.mulf %89, %88 : vector<8x128xf32>
    %91 = math.tanh %90 : vector<8x128xf32>
    %cst_29 = arith.constant 5.000000e-01 : f32
    %92 = vector.broadcast %cst_29 : f32 to vector<8x128xf32>
    %93 = arith.mulf %92, %91 : vector<8x128xf32>
    %cst_30 = arith.constant 5.000000e-01 : f32
    %94 = vector.broadcast %cst_30 : f32 to vector<8x128xf32>
    %95 = arith.addf %93, %94 : vector<8x128xf32>
    %96 = vector.extract_strided_slice %83 {offsets = [0, 128], sizes = [8, 128], strides = [1, 1]} : vector<8x384xf32> to vector<8x128xf32>
    %97 = vector.extract_strided_slice %85 {offsets = [0, 128], sizes = [8, 128], strides = [1, 1]} : vector<8x384xf32> to vector<8x128xf32>
    %98 = arith.addf %96, %97 : vector<8x128xf32>
    %cst_31 = arith.constant 5.000000e-01 : f32
    %99 = vector.broadcast %cst_31 : f32 to vector<8x128xf32>
    %100 = arith.mulf %99, %98 : vector<8x128xf32>
    %101 = math.tanh %100 : vector<8x128xf32>
    %cst_32 = arith.constant 5.000000e-01 : f32
    %102 = vector.broadcast %cst_32 : f32 to vector<8x128xf32>
    %103 = arith.mulf %102, %101 : vector<8x128xf32>
    %cst_33 = arith.constant 5.000000e-01 : f32
    %104 = vector.broadcast %cst_33 : f32 to vector<8x128xf32>
    %105 = arith.addf %103, %104 : vector<8x128xf32>
    %106 = vector.extract_strided_slice %83 {offsets = [0, 256], sizes = [8, 128], strides = [1, 1]} : vector<8x384xf32> to vector<8x128xf32>
    %107 = vector.extract_strided_slice %85 {offsets = [0, 256], sizes = [8, 128], strides = [1, 1]} : vector<8x384xf32> to vector<8x128xf32>
    %108 = vector.broadcast %1 : vector<1x128xf32> to vector<8x128xf32>
    %109 = arith.addf %107, %108 : vector<8x128xf32>
    %110 = arith.mulf %95, %109 : vector<8x128xf32>
    %111 = arith.addf %106, %110 : vector<8x128xf32>
    %112 = math.tanh %111 : vector<8x128xf32>
    %113 = arith.subf %76, %112 : vector<8x128xf32>
    %114 = arith.mulf %105, %113 : vector<8x128xf32>
    %115 = arith.addf %112, %114 : vector<8x128xf32>
    %116 = arith.index_cast %c2_i32 : i32 to index
    %c0_34 = arith.constant 0 : index
    %c0_35 = arith.constant 0 : index
    %117 = vector.load %arg11[%116, %c0_34, %c0_35] : memref<8x8x128xf32, #tpu.memory_space<vmem>>, vector<1x8x128xf32>
    %118 = vector.shape_cast %117 : vector<1x8x128xf32> to vector<8x128xf32>
    %119 = vector.shape_cast %115 : vector<8x128xf32> to vector<1x8x128xf32>
    tpu.vector_store %arg11[%116, %c0_34, %c0_35], %119 {strides = array<i32>} : memref<8x8x128xf32, #tpu.memory_space<vmem>>, vector<1x8x128xf32>,
    %c3_i32 = arith.constant 3 : i32
    %120 = arith.index_cast %c3_i32 : i32 to index
    %c0_36 = arith.constant 0 : index
    %c0_37 = arith.constant 0 : index
    %121 = vector.load %arg0[%120, %c0_36, %c0_37] : memref<8x8x384xf32, #tpu.memory_space<vmem>>, vector<1x8x384xf32>
    %122 = vector.shape_cast %121 : vector<1x8x384xf32> to vector<8x384xf32>
    %123 = arith.truncf %115 : vector<8x128xf32> to vector<8x128xbf16>
    %cst_38 = arith.constant dense<0.000000e+00> : vector<8x384xf32>
    %124 = tpu.matmul %123, %0, %cst_38 {dimension_numbers = #tpu.dot_dimension_numbers<[1], [0], [0], [1], [0, 0, 1, 1], [], []>} : vector<8x128xbf16>, vector<128x384xbf16>, vector<8x384xf32> -> vector<8x384xf32>
    %125 = vector.extract_strided_slice %122 {offsets = [0, 0], sizes = [8, 128], strides = [1, 1]} : vector<8x384xf32> to vector<8x128xf32>
    %126 = vector.extract_strided_slice %124 {offsets = [0, 0], sizes = [8, 128], strides = [1, 1]} : vector<8x384xf32> to vector<8x128xf32>
    %127 = arith.addf %125, %126 : vector<8x128xf32>
    %cst_39 = arith.constant 5.000000e-01 : f32
    %128 = vector.broadcast %cst_39 : f32 to vector<8x128xf32>
    %129 = arith.mulf %128, %127 : vector<8x128xf32>
    %130 = math.tanh %129 : vector<8x128xf32>
    %cst_40 = arith.constant 5.000000e-01 : f32
    %131 = vector.broadcast %cst_40 : f32 to vector<8x128xf32>
    %132 = arith.mulf %131, %130 : vector<8x128xf32>
    %cst_41 = arith.constant 5.000000e-01 : f32
    %133 = vector.broadcast %cst_41 : f32 to vector<8x128xf32>
    %134 = arith.addf %132, %133 : vector<8x128xf32>
    %135 = vector.extract_strided_slice %122 {offsets = [0, 128], sizes = [8, 128], strides = [1, 1]} : vector<8x384xf32> to vector<8x128xf32>
    %136 = vector.extract_strided_slice %124 {offsets = [0, 128], sizes = [8, 128], strides = [1, 1]} : vector<8x384xf32> to vector<8x128xf32>
    %137 = arith.addf %135, %136 : vector<8x128xf32>
    %cst_42 = arith.constant 5.000000e-01 : f32
    %138 = vector.broadcast %cst_42 : f32 to vector<8x128xf32>
    %139 = arith.mulf %138, %137 : vector<8x128xf32>
    %140 = math.tanh %139 : vector<8x128xf32>
    %cst_43 = arith.constant 5.000000e-01 : f32
    %141 = vector.broadcast %cst_43 : f32 to vector<8x128xf32>
    %142 = arith.mulf %141, %140 : vector<8x128xf32>
    %cst_44 = arith.constant 5.000000e-01 : f32
    %143 = vector.broadcast %cst_44 : f32 to vector<8x128xf32>
    %144 = arith.addf %142, %143 : vector<8x128xf32>
    %145 = vector.extract_strided_slice %122 {offsets = [0, 256], sizes = [8, 128], strides = [1, 1]} : vector<8x384xf32> to vector<8x128xf32>
    %146 = vector.extract_strided_slice %124 {offsets = [0, 256], sizes = [8, 128], strides = [1, 1]} : vector<8x384xf32> to vector<8x128xf32>
    %147 = vector.broadcast %1 : vector<1x128xf32> to vector<8x128xf32>
    %148 = arith.addf %146, %147 : vector<8x128xf32>
    %149 = arith.mulf %134, %148 : vector<8x128xf32>
    %150 = arith.addf %145, %149 : vector<8x128xf32>
    %151 = math.tanh %150 : vector<8x128xf32>
    %152 = arith.subf %115, %151 : vector<8x128xf32>
    %153 = arith.mulf %144, %152 : vector<8x128xf32>
    %154 = arith.addf %151, %153 : vector<8x128xf32>
    %155 = arith.index_cast %c3_i32 : i32 to index
    %c0_45 = arith.constant 0 : index
    %c0_46 = arith.constant 0 : index
    %156 = vector.load %arg11[%155, %c0_45, %c0_46] : memref<8x8x128xf32, #tpu.memory_space<vmem>>, vector<1x8x128xf32>
    %157 = vector.shape_cast %156 : vector<1x8x128xf32> to vector<8x128xf32>
    %158 = vector.shape_cast %154 : vector<8x128xf32> to vector<1x8x128xf32>
    tpu.vector_store %arg11[%155, %c0_45, %c0_46], %158 {strides = array<i32>} : memref<8x8x128xf32, #tpu.memory_space<vmem>>, vector<1x8x128xf32>,
    %c4_i32 = arith.constant 4 : i32
    %159 = arith.index_cast %c4_i32 : i32 to index
    %c0_47 = arith.constant 0 : index
    %c0_48 = arith.constant 0 : index
    %160 = vector.load %arg0[%159, %c0_47, %c0_48] : memref<8x8x384xf32, #tpu.memory_space<vmem>>, vector<1x8x384xf32>
    %161 = vector.shape_cast %160 : vector<1x8x384xf32> to vector<8x384xf32>
    %162 = arith.truncf %154 : vector<8x128xf32> to vector<8x128xbf16>
    %cst_49 = arith.constant dense<0.000000e+00> : vector<8x384xf32>
    %163 = tpu.matmul %162, %0, %cst_49 {dimension_numbers = #tpu.dot_dimension_numbers<[1], [0], [0], [1], [0, 0, 1, 1], [], []>} : vector<8x128xbf16>, vector<128x384xbf16>, vector<8x384xf32> -> vector<8x384xf32>
    %164 = vector.extract_strided_slice %161 {offsets = [0, 0], sizes = [8, 128], strides = [1, 1]} : vector<8x384xf32> to vector<8x128xf32>
    %165 = vector.extract_strided_slice %163 {offsets = [0, 0], sizes = [8, 128], strides = [1, 1]} : vector<8x384xf32> to vector<8x128xf32>
    %166 = arith.addf %164, %165 : vector<8x128xf32>
    %cst_50 = arith.constant 5.000000e-01 : f32
    %167 = vector.broadcast %cst_50 : f32 to vector<8x128xf32>
    %168 = arith.mulf %167, %166 : vector<8x128xf32>
    %169 = math.tanh %168 : vector<8x128xf32>
    %cst_51 = arith.constant 5.000000e-01 : f32
    %170 = vector.broadcast %cst_51 : f32 to vector<8x128xf32>
    %171 = arith.mulf %170, %169 : vector<8x128xf32>
    %cst_52 = arith.constant 5.000000e-01 : f32
    %172 = vector.broadcast %cst_52 : f32 to vector<8x128xf32>
    %173 = arith.addf %171, %172 : vector<8x128xf32>
    %174 = vector.extract_strided_slice %161 {offsets = [0, 128], sizes = [8, 128], strides = [1, 1]} : vector<8x384xf32> to vector<8x128xf32>
    %175 = vector.extract_strided_slice %163 {offsets = [0, 128], sizes = [8, 128], strides = [1, 1]} : vector<8x384xf32> to vector<8x128xf32>
    %176 = arith.addf %174, %175 : vector<8x128xf32>
    %cst_53 = arith.constant 5.000000e-01 : f32
    %177 = vector.broadcast %cst_53 : f32 to vector<8x128xf32>
    %178 = arith.mulf %177, %176 : vector<8x128xf32>
    %179 = math.tanh %178 : vector<8x128xf32>
    %cst_54 = arith.constant 5.000000e-01 : f32
    %180 = vector.broadcast %cst_54 : f32 to vector<8x128xf32>
    %181 = arith.mulf %180, %179 : vector<8x128xf32>
    %cst_55 = arith.constant 5.000000e-01 : f32
    %182 = vector.broadcast %cst_55 : f32 to vector<8x128xf32>
    %183 = arith.addf %181, %182 : vector<8x128xf32>
    %184 = vector.extract_strided_slice %161 {offsets = [0, 256], sizes = [8, 128], strides = [1, 1]} : vector<8x384xf32> to vector<8x128xf32>
    %185 = vector.extract_strided_slice %163 {offsets = [0, 256], sizes = [8, 128], strides = [1, 1]} : vector<8x384xf32> to vector<8x128xf32>
    %186 = vector.broadcast %1 : vector<1x128xf32> to vector<8x128xf32>
    %187 = arith.addf %185, %186 : vector<8x128xf32>
    %188 = arith.mulf %173, %187 : vector<8x128xf32>
    %189 = arith.addf %184, %188 : vector<8x128xf32>
    %190 = math.tanh %189 : vector<8x128xf32>
    %191 = arith.subf %154, %190 : vector<8x128xf32>
    %192 = arith.mulf %183, %191 : vector<8x128xf32>
    %193 = arith.addf %190, %192 : vector<8x128xf32>
    %194 = arith.index_cast %c4_i32 : i32 to index
    %c0_56 = arith.constant 0 : index
    %c0_57 = arith.constant 0 : index
    %195 = vector.load %arg11[%194, %c0_56, %c0_57] : memref<8x8x128xf32, #tpu.memory_space<vmem>>, vector<1x8x128xf32>
    %196 = vector.shape_cast %195 : vector<1x8x128xf32> to vector<8x128xf32>
    %197 = vector.shape_cast %193 : vector<8x128xf32> to vector<1x8x128xf32>
    tpu.vector_store %arg11[%194, %c0_56, %c0_57], %197 {strides = array<i32>} : memref<8x8x128xf32, #tpu.memory_space<vmem>>, vector<1x8x128xf32>,
    %c5_i32 = arith.constant 5 : i32
    %198 = arith.index_cast %c5_i32 : i32 to index
    %c0_58 = arith.constant 0 : index
    %c0_59 = arith.constant 0 : index
    %199 = vector.load %arg0[%198, %c0_58, %c0_59] : memref<8x8x384xf32, #tpu.memory_space<vmem>>, vector<1x8x384xf32>
    %200 = vector.shape_cast %199 : vector<1x8x384xf32> to vector<8x384xf32>
    %201 = arith.truncf %193 : vector<8x128xf32> to vector<8x128xbf16>
    %cst_60 = arith.constant dense<0.000000e+00> : vector<8x384xf32>
    %202 = tpu.matmul %201, %0, %cst_60 {dimension_numbers = #tpu.dot_dimension_numbers<[1], [0], [0], [1], [0, 0, 1, 1], [], []>} : vector<8x128xbf16>, vector<128x384xbf16>, vector<8x384xf32> -> vector<8x384xf32>
    %203 = vector.extract_strided_slice %200 {offsets = [0, 0], sizes = [8, 128], strides = [1, 1]} : vector<8x384xf32> to vector<8x128xf32>
    %204 = vector.extract_strided_slice %202 {offsets = [0, 0], sizes = [8, 128], strides = [1, 1]} : vector<8x384xf32> to vector<8x128xf32>
    %205 = arith.addf %203, %204 : vector<8x128xf32>
    %cst_61 = arith.constant 5.000000e-01 : f32
    %206 = vector.broadcast %cst_61 : f32 to vector<8x128xf32>
    %207 = arith.mulf %206, %205 : vector<8x128xf32>
    %208 = math.tanh %207 : vector<8x128xf32>
    %cst_62 = arith.constant 5.000000e-01 : f32
    %209 = vector.broadcast %cst_62 : f32 to vector<8x128xf32>
    %210 = arith.mulf %209, %208 : vector<8x128xf32>
    %cst_63 = arith.constant 5.000000e-01 : f32
    %211 = vector.broadcast %cst_63 : f32 to vector<8x128xf32>
    %212 = arith.addf %210, %211 : vector<8x128xf32>
    %213 = vector.extract_strided_slice %200 {offsets = [0, 128], sizes = [8, 128], strides = [1, 1]} : vector<8x384xf32> to vector<8x128xf32>
    %214 = vector.extract_strided_slice %202 {offsets = [0, 128], sizes = [8, 128], strides = [1, 1]} : vector<8x384xf32> to vector<8x128xf32>
    %215 = arith.addf %213, %214 : vector<8x128xf32>
    %cst_64 = arith.constant 5.000000e-01 : f32
    %216 = vector.broadcast %cst_64 : f32 to vector<8x128xf32>
    %217 = arith.mulf %216, %215 : vector<8x128xf32>
    %218 = math.tanh %217 : vector<8x128xf32>
    %cst_65 = arith.constant 5.000000e-01 : f32
    %219 = vector.broadcast %cst_65 : f32 to vector<8x128xf32>
    %220 = arith.mulf %219, %218 : vector<8x128xf32>
    %cst_66 = arith.constant 5.000000e-01 : f32
    %221 = vector.broadcast %cst_66 : f32 to vector<8x128xf32>
    %222 = arith.addf %220, %221 : vector<8x128xf32>
    %223 = vector.extract_strided_slice %200 {offsets = [0, 256], sizes = [8, 128], strides = [1, 1]} : vector<8x384xf32> to vector<8x128xf32>
    %224 = vector.extract_strided_slice %202 {offsets = [0, 256], sizes = [8, 128], strides = [1, 1]} : vector<8x384xf32> to vector<8x128xf32>
    %225 = vector.broadcast %1 : vector<1x128xf32> to vector<8x128xf32>
    %226 = arith.addf %224, %225 : vector<8x128xf32>
    %227 = arith.mulf %212, %226 : vector<8x128xf32>
    %228 = arith.addf %223, %227 : vector<8x128xf32>
    %229 = math.tanh %228 : vector<8x128xf32>
    %230 = arith.subf %193, %229 : vector<8x128xf32>
    %231 = arith.mulf %222, %230 : vector<8x128xf32>
    %232 = arith.addf %229, %231 : vector<8x128xf32>
    %233 = arith.index_cast %c5_i32 : i32 to index
    %c0_67 = arith.constant 0 : index
    %c0_68 = arith.constant 0 : index
    %234 = vector.load %arg11[%233, %c0_67, %c0_68] : memref<8x8x128xf32, #tpu.memory_space<vmem>>, vector<1x8x128xf32>
    %235 = vector.shape_cast %234 : vector<1x8x128xf32> to vector<8x128xf32>
    %236 = vector.shape_cast %232 : vector<8x128xf32> to vector<1x8x128xf32>
    tpu.vector_store %arg11[%233, %c0_67, %c0_68], %236 {strides = array<i32>} : memref<8x8x128xf32, #tpu.memory_space<vmem>>, vector<1x8x128xf32>,
    %c6_i32 = arith.constant 6 : i32
    %237 = arith.index_cast %c6_i32 : i32 to index
    %c0_69 = arith.constant 0 : index
    %c0_70 = arith.constant 0 : index
    %238 = vector.load %arg0[%237, %c0_69, %c0_70] : memref<8x8x384xf32, #tpu.memory_space<vmem>>, vector<1x8x384xf32>
    %239 = vector.shape_cast %238 : vector<1x8x384xf32> to vector<8x384xf32>
    %240 = arith.truncf %232 : vector<8x128xf32> to vector<8x128xbf16>
    %cst_71 = arith.constant dense<0.000000e+00> : vector<8x384xf32>
    %241 = tpu.matmul %240, %0, %cst_71 {dimension_numbers = #tpu.dot_dimension_numbers<[1], [0], [0], [1], [0, 0, 1, 1], [], []>} : vector<8x128xbf16>, vector<128x384xbf16>, vector<8x384xf32> -> vector<8x384xf32>
    %242 = vector.extract_strided_slice %239 {offsets = [0, 0], sizes = [8, 128], strides = [1, 1]} : vector<8x384xf32> to vector<8x128xf32>
    %243 = vector.extract_strided_slice %241 {offsets = [0, 0], sizes = [8, 128], strides = [1, 1]} : vector<8x384xf32> to vector<8x128xf32>
    %244 = arith.addf %242, %243 : vector<8x128xf32>
    %cst_72 = arith.constant 5.000000e-01 : f32
    %245 = vector.broadcast %cst_72 : f32 to vector<8x128xf32>
    %246 = arith.mulf %245, %244 : vector<8x128xf32>
    %247 = math.tanh %246 : vector<8x128xf32>
    %cst_73 = arith.constant 5.000000e-01 : f32
    %248 = vector.broadcast %cst_73 : f32 to vector<8x128xf32>
    %249 = arith.mulf %248, %247 : vector<8x128xf32>
    %cst_74 = arith.constant 5.000000e-01 : f32
    %250 = vector.broadcast %cst_74 : f32 to vector<8x128xf32>
    %251 = arith.addf %249, %250 : vector<8x128xf32>
    %252 = vector.extract_strided_slice %239 {offsets = [0, 128], sizes = [8, 128], strides = [1, 1]} : vector<8x384xf32> to vector<8x128xf32>
    %253 = vector.extract_strided_slice %241 {offsets = [0, 128], sizes = [8, 128], strides = [1, 1]} : vector<8x384xf32> to vector<8x128xf32>
    %254 = arith.addf %252, %253 : vector<8x128xf32>
    %cst_75 = arith.constant 5.000000e-01 : f32
    %255 = vector.broadcast %cst_75 : f32 to vector<8x128xf32>
    %256 = arith.mulf %255, %254 : vector<8x128xf32>
    %257 = math.tanh %256 : vector<8x128xf32>
    %cst_76 = arith.constant 5.000000e-01 : f32
    %258 = vector.broadcast %cst_76 : f32 to vector<8x128xf32>
    %259 = arith.mulf %258, %257 : vector<8x128xf32>
    %cst_77 = arith.constant 5.000000e-01 : f32
    %260 = vector.broadcast %cst_77 : f32 to vector<8x128xf32>
    %261 = arith.addf %259, %260 : vector<8x128xf32>
    %262 = vector.extract_strided_slice %239 {offsets = [0, 256], sizes = [8, 128], strides = [1, 1]} : vector<8x384xf32> to vector<8x128xf32>
    %263 = vector.extract_strided_slice %241 {offsets = [0, 256], sizes = [8, 128], strides = [1, 1]} : vector<8x384xf32> to vector<8x128xf32>
    %264 = vector.broadcast %1 : vector<1x128xf32> to vector<8x128xf32>
    %265 = arith.addf %263, %264 : vector<8x128xf32>
    %266 = arith.mulf %251, %265 : vector<8x128xf32>
    %267 = arith.addf %262, %266 : vector<8x128xf32>
    %268 = math.tanh %267 : vector<8x128xf32>
    %269 = arith.subf %232, %268 : vector<8x128xf32>
    %270 = arith.mulf %261, %269 : vector<8x128xf32>
    %271 = arith.addf %268, %270 : vector<8x128xf32>
    %272 = arith.index_cast %c6_i32 : i32 to index
    %c0_78 = arith.constant 0 : index
    %c0_79 = arith.constant 0 : index
    %273 = vector.load %arg11[%272, %c0_78, %c0_79] : memref<8x8x128xf32, #tpu.memory_space<vmem>>, vector<1x8x128xf32>
    %274 = vector.shape_cast %273 : vector<1x8x128xf32> to vector<8x128xf32>
    %275 = vector.shape_cast %271 : vector<8x128xf32> to vector<1x8x128xf32>
    tpu.vector_store %arg11[%272, %c0_78, %c0_79], %275 {strides = array<i32>} : memref<8x8x128xf32, #tpu.memory_space<vmem>>, vector<1x8x128xf32>,
    %c7_i32 = arith.constant 7 : i32
    %276 = arith.index_cast %c7_i32 : i32 to index
    %c0_80 = arith.constant 0 : index
    %c0_81 = arith.constant 0 : index
    %277 = vector.load %arg0[%276, %c0_80, %c0_81] : memref<8x8x384xf32, #tpu.memory_space<vmem>>, vector<1x8x384xf32>
    %278 = vector.shape_cast %277 : vector<1x8x384xf32> to vector<8x384xf32>
    %279 = arith.truncf %271 : vector<8x128xf32> to vector<8x128xbf16>
    %cst_82 = arith.constant dense<0.000000e+00> : vector<8x384xf32>
    %280 = tpu.matmul %279, %0, %cst_82 {dimension_numbers = #tpu.dot_dimension_numbers<[1], [0], [0], [1], [0, 0, 1, 1], [], []>} : vector<8x128xbf16>, vector<128x384xbf16>, vector<8x384xf32> -> vector<8x384xf32>
    %281 = vector.extract_strided_slice %278 {offsets = [0, 0], sizes = [8, 128], strides = [1, 1]} : vector<8x384xf32> to vector<8x128xf32>
    %282 = vector.extract_strided_slice %280 {offsets = [0, 0], sizes = [8, 128], strides = [1, 1]} : vector<8x384xf32> to vector<8x128xf32>
    %283 = arith.addf %281, %282 : vector<8x128xf32>
    %cst_83 = arith.constant 5.000000e-01 : f32
    %284 = vector.broadcast %cst_83 : f32 to vector<8x128xf32>
    %285 = arith.mulf %284, %283 : vector<8x128xf32>
    %286 = math.tanh %285 : vector<8x128xf32>
    %cst_84 = arith.constant 5.000000e-01 : f32
    %287 = vector.broadcast %cst_84 : f32 to vector<8x128xf32>
    %288 = arith.mulf %287, %286 : vector<8x128xf32>
    %cst_85 = arith.constant 5.000000e-01 : f32
    %289 = vector.broadcast %cst_85 : f32 to vector<8x128xf32>
    %290 = arith.addf %288, %289 : vector<8x128xf32>
    %291 = vector.extract_strided_slice %278 {offsets = [0, 128], sizes = [8, 128], strides = [1, 1]} : vector<8x384xf32> to vector<8x128xf32>
    %292 = vector.extract_strided_slice %280 {offsets = [0, 128], sizes = [8, 128], strides = [1, 1]} : vector<8x384xf32> to vector<8x128xf32>
    %293 = arith.addf %291, %292 : vector<8x128xf32>
    %cst_86 = arith.constant 5.000000e-01 : f32
    %294 = vector.broadcast %cst_86 : f32 to vector<8x128xf32>
    %295 = arith.mulf %294, %293 : vector<8x128xf32>
    %296 = math.tanh %295 : vector<8x128xf32>
    %cst_87 = arith.constant 5.000000e-01 : f32
    %297 = vector.broadcast %cst_87 : f32 to vector<8x128xf32>
    %298 = arith.mulf %297, %296 : vector<8x128xf32>
    %cst_88 = arith.constant 5.000000e-01 : f32
    %299 = vector.broadcast %cst_88 : f32 to vector<8x128xf32>
    %300 = arith.addf %298, %299 : vector<8x128xf32>
    %301 = vector.extract_strided_slice %278 {offsets = [0, 256], sizes = [8, 128], strides = [1, 1]} : vector<8x384xf32> to vector<8x128xf32>
    %302 = vector.extract_strided_slice %280 {offsets = [0, 256], sizes = [8, 128], strides = [1, 1]} : vector<8x384xf32> to vector<8x128xf32>
    %303 = vector.broadcast %1 : vector<1x128xf32> to vector<8x128xf32>
    %304 = arith.addf %302, %303 : vector<8x128xf32>
    %305 = arith.mulf %290, %304 : vector<8x128xf32>
    %306 = arith.addf %301, %305 : vector<8x128xf32>
    %307 = math.tanh %306 : vector<8x128xf32>
    %308 = arith.subf %271, %307 : vector<8x128xf32>
    %309 = arith.mulf %300, %308 : vector<8x128xf32>
    %310 = arith.addf %307, %309 : vector<8x128xf32>
    %311 = arith.index_cast %c7_i32 : i32 to index
    %c0_89 = arith.constant 0 : index
    %c0_90 = arith.constant 0 : index
    %312 = vector.load %arg11[%311, %c0_89, %c0_90] : memref<8x8x128xf32, #tpu.memory_space<vmem>>, vector<1x8x128xf32>
    %313 = vector.shape_cast %312 : vector<1x8x128xf32> to vector<8x128xf32>
    %314 = vector.shape_cast %310 : vector<8x128xf32> to vector<1x8x128xf32>
    tpu.vector_store %arg11[%311, %c0_89, %c0_90], %314 {strides = array<i32>} : memref<8x8x128xf32, #tpu.memory_space<vmem>>, vector<1x8x128xf32>,
    %c8_i32 = arith.constant 8 : i32
    %c0_91 = arith.constant 0 : index
    %c0_92 = arith.constant 0 : index
    %315 = vector.load %arg5[%c0_91, %c0_92] : memref<128x384xbf16, #tpu.memory_space<vmem>>, vector<128x384xbf16>
    %c0_93 = arith.constant 0 : index
    %c0_94 = arith.constant 0 : index
    %316 = vector.load %arg6[%c0_93, %c0_94] : memref<1x128xf32, #tpu.memory_space<vmem>>, vector<1x128xf32>
    %cst_95 = arith.constant 0.000000e+00 : f32
    %317 = vector.broadcast %cst_95 : f32 to vector<8x128xf32>
    %c0_96 = arith.constant 0 : index
    %c0_97 = arith.constant 0 : index
    %318 = vector.load %arg3[%c0_96, %c0_97] : memref<128x384xbf16, #tpu.memory_space<vmem>>, vector<128x384xbf16>
    %c0_98 = arith.constant 0 : index
    %c0_99 = arith.constant 0 : index
    %319 = vector.load %arg4[%c0_98, %c0_99] : memref<1x384xf32, #tpu.memory_space<vmem>>, vector<1x384xf32>
    %c0_100 = arith.constant 0 : index
    %c0_101 = arith.constant 0 : index
    %c0_102 = arith.constant 0 : index
    %320 = vector.load %arg11[%c0_100, %c0_101, %c0_102] : memref<8x8x128xf32, #tpu.memory_space<vmem>>, vector<8x8x128xf32>
    %321 = vector.shape_cast %320 : vector<8x8x128xf32> to vector<64x128xf32>
    %322 = arith.truncf %321 : vector<64x128xf32> to vector<64x128xbf16>
    %cst_103 = arith.constant dense<0.000000e+00> : vector<64x384xf32>
    %323 = tpu.matmul %322, %318, %cst_103 {dimension_numbers = #tpu.dot_dimension_numbers<[1], [0], [0], [1], [0, 0, 1, 1], [], []>} : vector<64x128xbf16>, vector<128x384xbf16>, vector<64x384xf32> -> vector<64x384xf32>
    %324 = vector.broadcast %319 : vector<1x384xf32> to vector<64x384xf32>
    %325 = arith.addf %323, %324 : vector<64x384xf32>
    %c0_104 = arith.constant 0 : index
    %c0_105 = arith.constant 0 : index
    %326 = vector.load %arg10[%c0_104, %c0_105] : memref<64x384xf32, #tpu.memory_space<vmem>>, vector<64x384xf32>
    tpu.vector_store %arg10[%c0_104, %c0_105], %325 {strides = array<i32>} : memref<64x384xf32, #tpu.memory_space<vmem>>, vector<64x384xf32>,
    %c0_i32_106 = arith.constant 0 : i32
    %c8_i32_107 = arith.constant 8 : i32
    %327 = arith.muli %c0_i32_106, %c8_i32_107 : i32
    %328 = tpu.assume_multiple %327, 8 : i32
    %329 = arith.index_cast %328 : i32 to index
    %c0_108 = arith.constant 0 : index
    %330 = vector.load %arg10[%329, %c0_108] : memref<64x384xf32, #tpu.memory_space<vmem>>, vector<8x384xf32>
    %331 = arith.truncf %317 : vector<8x128xf32> to vector<8x128xbf16>
    %cst_109 = arith.constant dense<0.000000e+00> : vector<8x384xf32>
    %332 = tpu.matmul %331, %315, %cst_109 {dimension_numbers = #tpu.dot_dimension_numbers<[1], [0], [0], [1], [0, 0, 1, 1], [], []>} : vector<8x128xbf16>, vector<128x384xbf16>, vector<8x384xf32> -> vector<8x384xf32>
    %333 = vector.extract_strided_slice %330 {offsets = [0, 0], sizes = [8, 128], strides = [1, 1]} : vector<8x384xf32> to vector<8x128xf32>
    %334 = vector.extract_strided_slice %332 {offsets = [0, 0], sizes = [8, 128], strides = [1, 1]} : vector<8x384xf32> to vector<8x128xf32>
    %335 = arith.addf %333, %334 : vector<8x128xf32>
    %cst_110 = arith.constant 5.000000e-01 : f32
    %336 = vector.broadcast %cst_110 : f32 to vector<8x128xf32>
    %337 = arith.mulf %336, %335 : vector<8x128xf32>
    %338 = math.tanh %337 : vector<8x128xf32>
    %cst_111 = arith.constant 5.000000e-01 : f32
    %339 = vector.broadcast %cst_111 : f32 to vector<8x128xf32>
    %340 = arith.mulf %339, %338 : vector<8x128xf32>
    %cst_112 = arith.constant 5.000000e-01 : f32
    %341 = vector.broadcast %cst_112 : f32 to vector<8x128xf32>
    %342 = arith.addf %340, %341 : vector<8x128xf32>
    %343 = vector.extract_strided_slice %330 {offsets = [0, 128], sizes = [8, 128], strides = [1, 1]} : vector<8x384xf32> to vector<8x128xf32>
    %344 = vector.extract_strided_slice %332 {offsets = [0, 128], sizes = [8, 128], strides = [1, 1]} : vector<8x384xf32> to vector<8x128xf32>
    %345 = arith.addf %343, %344 : vector<8x128xf32>
    %cst_113 = arith.constant 5.000000e-01 : f32
    %346 = vector.broadcast %cst_113 : f32 to vector<8x128xf32>
    %347 = arith.mulf %346, %345 : vector<8x128xf32>
    %348 = math.tanh %347 : vector<8x128xf32>
    %cst_114 = arith.constant 5.000000e-01 : f32
    %349 = vector.broadcast %cst_114 : f32 to vector<8x128xf32>
    %350 = arith.mulf %349, %348 : vector<8x128xf32>
    %cst_115 = arith.constant 5.000000e-01 : f32
    %351 = vector.broadcast %cst_115 : f32 to vector<8x128xf32>
    %352 = arith.addf %350, %351 : vector<8x128xf32>
    %353 = vector.extract_strided_slice %330 {offsets = [0, 256], sizes = [8, 128], strides = [1, 1]} : vector<8x384xf32> to vector<8x128xf32>
    %354 = vector.extract_strided_slice %332 {offsets = [0, 256], sizes = [8, 128], strides = [1, 1]} : vector<8x384xf32> to vector<8x128xf32>
    %355 = vector.broadcast %316 : vector<1x128xf32> to vector<8x128xf32>
    %356 = arith.addf %354, %355 : vector<8x128xf32>
    %357 = arith.mulf %342, %356 : vector<8x128xf32>
    %358 = arith.addf %353, %357 : vector<8x128xf32>
    %359 = math.tanh %358 : vector<8x128xf32>
    %360 = arith.subf %317, %359 : vector<8x128xf32>
    %361 = arith.mulf %352, %360 : vector<8x128xf32>
    %362 = arith.addf %359, %361 : vector<8x128xf32>
    %c1_i32_116 = arith.constant 1 : i32
    %c8_i32_117 = arith.constant 8 : i32
    %363 = arith.muli %c1_i32_116, %c8_i32_117 : i32
    %364 = tpu.assume_multiple %363, 8 : i32
    %365 = arith.index_cast %364 : i32 to index
    %c0_118 = arith.constant 0 : index
    %366 = vector.load %arg10[%365, %c0_118] : memref<64x384xf32, #tpu.memory_space<vmem>>, vector<8x384xf32>
    %367 = arith.truncf %362 : vector<8x128xf32> to vector<8x128xbf16>
    %cst_119 = arith.constant dense<0.000000e+00> : vector<8x384xf32>
    %368 = tpu.matmul %367, %315, %cst_119 {dimension_numbers = #tpu.dot_dimension_numbers<[1], [0], [0], [1], [0, 0, 1, 1], [], []>} : vector<8x128xbf16>, vector<128x384xbf16>, vector<8x384xf32> -> vector<8x384xf32>
    %369 = vector.extract_strided_slice %366 {offsets = [0, 0], sizes = [8, 128], strides = [1, 1]} : vector<8x384xf32> to vector<8x128xf32>
    %370 = vector.extract_strided_slice %368 {offsets = [0, 0], sizes = [8, 128], strides = [1, 1]} : vector<8x384xf32> to vector<8x128xf32>
    %371 = arith.addf %369, %370 : vector<8x128xf32>
    %cst_120 = arith.constant 5.000000e-01 : f32
    %372 = vector.broadcast %cst_120 : f32 to vector<8x128xf32>
    %373 = arith.mulf %372, %371 : vector<8x128xf32>
    %374 = math.tanh %373 : vector<8x128xf32>
    %cst_121 = arith.constant 5.000000e-01 : f32
    %375 = vector.broadcast %cst_121 : f32 to vector<8x128xf32>
    %376 = arith.mulf %375, %374 : vector<8x128xf32>
    %cst_122 = arith.constant 5.000000e-01 : f32
    %377 = vector.broadcast %cst_122 : f32 to vector<8x128xf32>
    %378 = arith.addf %376, %377 : vector<8x128xf32>
    %379 = vector.extract_strided_slice %366 {offsets = [0, 128], sizes = [8, 128], strides = [1, 1]} : vector<8x384xf32> to vector<8x128xf32>
    %380 = vector.extract_strided_slice %368 {offsets = [0, 128], sizes = [8, 128], strides = [1, 1]} : vector<8x384xf32> to vector<8x128xf32>
    %381 = arith.addf %379, %380 : vector<8x128xf32>
    %cst_123 = arith.constant 5.000000e-01 : f32
    %382 = vector.broadcast %cst_123 : f32 to vector<8x128xf32>
    %383 = arith.mulf %382, %381 : vector<8x128xf32>
    %384 = math.tanh %383 : vector<8x128xf32>
    %cst_124 = arith.constant 5.000000e-01 : f32
    %385 = vector.broadcast %cst_124 : f32 to vector<8x128xf32>
    %386 = arith.mulf %385, %384 : vector<8x128xf32>
    %cst_125 = arith.constant 5.000000e-01 : f32
    %387 = vector.broadcast %cst_125 : f32 to vector<8x128xf32>
    %388 = arith.addf %386, %387 : vector<8x128xf32>
    %389 = vector.extract_strided_slice %366 {offsets = [0, 256], sizes = [8, 128], strides = [1, 1]} : vector<8x384xf32> to vector<8x128xf32>
    %390 = vector.extract_strided_slice %368 {offsets = [0, 256], sizes = [8, 128], strides = [1, 1]} : vector<8x384xf32> to vector<8x128xf32>
    %391 = vector.broadcast %316 : vector<1x128xf32> to vector<8x128xf32>
    %392 = arith.addf %390, %391 : vector<8x128xf32>
    %393 = arith.mulf %378, %392 : vector<8x128xf32>
    %394 = arith.addf %389, %393 : vector<8x128xf32>
    %395 = math.tanh %394 : vector<8x128xf32>
    %396 = arith.subf %362, %395 : vector<8x128xf32>
    %397 = arith.mulf %388, %396 : vector<8x128xf32>
    %398 = arith.addf %395, %397 : vector<8x128xf32>
    %c2_i32_126 = arith.constant 2 : i32
    %c8_i32_127 = arith.constant 8 : i32
    %399 = arith.muli %c2_i32_126, %c8_i32_127 : i32
    %400 = tpu.assume_multiple %399, 8 : i32
    %401 = arith.index_cast %400 : i32 to index
    %c0_128 = arith.constant 0 : index
    %402 = vector.load %arg10[%401, %c0_128] : memref<64x384xf32, #tpu.memory_space<vmem>>, vector<8x384xf32>
    %403 = arith.truncf %398 : vector<8x128xf32> to vector<8x128xbf16>
    %cst_129 = arith.constant dense<0.000000e+00> : vector<8x384xf32>
    %404 = tpu.matmul %403, %315, %cst_129 {dimension_numbers = #tpu.dot_dimension_numbers<[1], [0], [0], [1], [0, 0, 1, 1], [], []>} : vector<8x128xbf16>, vector<128x384xbf16>, vector<8x384xf32> -> vector<8x384xf32>
    %405 = vector.extract_strided_slice %402 {offsets = [0, 0], sizes = [8, 128], strides = [1, 1]} : vector<8x384xf32> to vector<8x128xf32>
    %406 = vector.extract_strided_slice %404 {offsets = [0, 0], sizes = [8, 128], strides = [1, 1]} : vector<8x384xf32> to vector<8x128xf32>
    %407 = arith.addf %405, %406 : vector<8x128xf32>
    %cst_130 = arith.constant 5.000000e-01 : f32
    %408 = vector.broadcast %cst_130 : f32 to vector<8x128xf32>
    %409 = arith.mulf %408, %407 : vector<8x128xf32>
    %410 = math.tanh %409 : vector<8x128xf32>
    %cst_131 = arith.constant 5.000000e-01 : f32
    %411 = vector.broadcast %cst_131 : f32 to vector<8x128xf32>
    %412 = arith.mulf %411, %410 : vector<8x128xf32>
    %cst_132 = arith.constant 5.000000e-01 : f32
    %413 = vector.broadcast %cst_132 : f32 to vector<8x128xf32>
    %414 = arith.addf %412, %413 : vector<8x128xf32>
    %415 = vector.extract_strided_slice %402 {offsets = [0, 128], sizes = [8, 128], strides = [1, 1]} : vector<8x384xf32> to vector<8x128xf32>
    %416 = vector.extract_strided_slice %404 {offsets = [0, 128], sizes = [8, 128], strides = [1, 1]} : vector<8x384xf32> to vector<8x128xf32>
    %417 = arith.addf %415, %416 : vector<8x128xf32>
    %cst_133 = arith.constant 5.000000e-01 : f32
    %418 = vector.broadcast %cst_133 : f32 to vector<8x128xf32>
    %419 = arith.mulf %418, %417 : vector<8x128xf32>
    %420 = math.tanh %419 : vector<8x128xf32>
    %cst_134 = arith.constant 5.000000e-01 : f32
    %421 = vector.broadcast %cst_134 : f32 to vector<8x128xf32>
    %422 = arith.mulf %421, %420 : vector<8x128xf32>
    %cst_135 = arith.constant 5.000000e-01 : f32
    %423 = vector.broadcast %cst_135 : f32 to vector<8x128xf32>
    %424 = arith.addf %422, %423 : vector<8x128xf32>
    %425 = vector.extract_strided_slice %402 {offsets = [0, 256], sizes = [8, 128], strides = [1, 1]} : vector<8x384xf32> to vector<8x128xf32>
    %426 = vector.extract_strided_slice %404 {offsets = [0, 256], sizes = [8, 128], strides = [1, 1]} : vector<8x384xf32> to vector<8x128xf32>
    %427 = vector.broadcast %316 : vector<1x128xf32> to vector<8x128xf32>
    %428 = arith.addf %426, %427 : vector<8x128xf32>
    %429 = arith.mulf %414, %428 : vector<8x128xf32>
    %430 = arith.addf %425, %429 : vector<8x128xf32>
    %431 = math.tanh %430 : vector<8x128xf32>
    %432 = arith.subf %398, %431 : vector<8x128xf32>
    %433 = arith.mulf %424, %432 : vector<8x128xf32>
    %434 = arith.addf %431, %433 : vector<8x128xf32>
    %c3_i32_136 = arith.constant 3 : i32
    %c8_i32_137 = arith.constant 8 : i32
    %435 = arith.muli %c3_i32_136, %c8_i32_137 : i32
    %436 = tpu.assume_multiple %435, 8 : i32
    %437 = arith.index_cast %436 : i32 to index
    %c0_138 = arith.constant 0 : index
    %438 = vector.load %arg10[%437, %c0_138] : memref<64x384xf32, #tpu.memory_space<vmem>>, vector<8x384xf32>
    %439 = arith.truncf %434 : vector<8x128xf32> to vector<8x128xbf16>
    %cst_139 = arith.constant dense<0.000000e+00> : vector<8x384xf32>
    %440 = tpu.matmul %439, %315, %cst_139 {dimension_numbers = #tpu.dot_dimension_numbers<[1], [0], [0], [1], [0, 0, 1, 1], [], []>} : vector<8x128xbf16>, vector<128x384xbf16>, vector<8x384xf32> -> vector<8x384xf32>
    %441 = vector.extract_strided_slice %438 {offsets = [0, 0], sizes = [8, 128], strides = [1, 1]} : vector<8x384xf32> to vector<8x128xf32>
    %442 = vector.extract_strided_slice %440 {offsets = [0, 0], sizes = [8, 128], strides = [1, 1]} : vector<8x384xf32> to vector<8x128xf32>
    %443 = arith.addf %441, %442 : vector<8x128xf32>
    %cst_140 = arith.constant 5.000000e-01 : f32
    %444 = vector.broadcast %cst_140 : f32 to vector<8x128xf32>
    %445 = arith.mulf %444, %443 : vector<8x128xf32>
    %446 = math.tanh %445 : vector<8x128xf32>
    %cst_141 = arith.constant 5.000000e-01 : f32
    %447 = vector.broadcast %cst_141 : f32 to vector<8x128xf32>
    %448 = arith.mulf %447, %446 : vector<8x128xf32>
    %cst_142 = arith.constant 5.000000e-01 : f32
    %449 = vector.broadcast %cst_142 : f32 to vector<8x128xf32>
    %450 = arith.addf %448, %449 : vector<8x128xf32>
    %451 = vector.extract_strided_slice %438 {offsets = [0, 128], sizes = [8, 128], strides = [1, 1]} : vector<8x384xf32> to vector<8x128xf32>
    %452 = vector.extract_strided_slice %440 {offsets = [0, 128], sizes = [8, 128], strides = [1, 1]} : vector<8x384xf32> to vector<8x128xf32>
    %453 = arith.addf %451, %452 : vector<8x128xf32>
    %cst_143 = arith.constant 5.000000e-01 : f32
    %454 = vector.broadcast %cst_143 : f32 to vector<8x128xf32>
    %455 = arith.mulf %454, %453 : vector<8x128xf32>
    %456 = math.tanh %455 : vector<8x128xf32>
    %cst_144 = arith.constant 5.000000e-01 : f32
    %457 = vector.broadcast %cst_144 : f32 to vector<8x128xf32>
    %458 = arith.mulf %457, %456 : vector<8x128xf32>
    %cst_145 = arith.constant 5.000000e-01 : f32
    %459 = vector.broadcast %cst_145 : f32 to vector<8x128xf32>
    %460 = arith.addf %458, %459 : vector<8x128xf32>
    %461 = vector.extract_strided_slice %438 {offsets = [0, 256], sizes = [8, 128], strides = [1, 1]} : vector<8x384xf32> to vector<8x128xf32>
    %462 = vector.extract_strided_slice %440 {offsets = [0, 256], sizes = [8, 128], strides = [1, 1]} : vector<8x384xf32> to vector<8x128xf32>
    %463 = vector.broadcast %316 : vector<1x128xf32> to vector<8x128xf32>
    %464 = arith.addf %462, %463 : vector<8x128xf32>
    %465 = arith.mulf %450, %464 : vector<8x128xf32>
    %466 = arith.addf %461, %465 : vector<8x128xf32>
    %467 = math.tanh %466 : vector<8x128xf32>
    %468 = arith.subf %434, %467 : vector<8x128xf32>
    %469 = arith.mulf %460, %468 : vector<8x128xf32>
    %470 = arith.addf %467, %469 : vector<8x128xf32>
    %c4_i32_146 = arith.constant 4 : i32
    %c8_i32_147 = arith.constant 8 : i32
    %471 = arith.muli %c4_i32_146, %c8_i32_147 : i32
    %472 = tpu.assume_multiple %471, 8 : i32
    %473 = arith.index_cast %472 : i32 to index
    %c0_148 = arith.constant 0 : index
    %474 = vector.load %arg10[%473, %c0_148] : memref<64x384xf32, #tpu.memory_space<vmem>>, vector<8x384xf32>
    %475 = arith.truncf %470 : vector<8x128xf32> to vector<8x128xbf16>
    %cst_149 = arith.constant dense<0.000000e+00> : vector<8x384xf32>
    %476 = tpu.matmul %475, %315, %cst_149 {dimension_numbers = #tpu.dot_dimension_numbers<[1], [0], [0], [1], [0, 0, 1, 1], [], []>} : vector<8x128xbf16>, vector<128x384xbf16>, vector<8x384xf32> -> vector<8x384xf32>
    %477 = vector.extract_strided_slice %474 {offsets = [0, 0], sizes = [8, 128], strides = [1, 1]} : vector<8x384xf32> to vector<8x128xf32>
    %478 = vector.extract_strided_slice %476 {offsets = [0, 0], sizes = [8, 128], strides = [1, 1]} : vector<8x384xf32> to vector<8x128xf32>
    %479 = arith.addf %477, %478 : vector<8x128xf32>
    %cst_150 = arith.constant 5.000000e-01 : f32
    %480 = vector.broadcast %cst_150 : f32 to vector<8x128xf32>
    %481 = arith.mulf %480, %479 : vector<8x128xf32>
    %482 = math.tanh %481 : vector<8x128xf32>
    %cst_151 = arith.constant 5.000000e-01 : f32
    %483 = vector.broadcast %cst_151 : f32 to vector<8x128xf32>
    %484 = arith.mulf %483, %482 : vector<8x128xf32>
    %cst_152 = arith.constant 5.000000e-01 : f32
    %485 = vector.broadcast %cst_152 : f32 to vector<8x128xf32>
    %486 = arith.addf %484, %485 : vector<8x128xf32>
    %487 = vector.extract_strided_slice %474 {offsets = [0, 128], sizes = [8, 128], strides = [1, 1]} : vector<8x384xf32> to vector<8x128xf32>
    %488 = vector.extract_strided_slice %476 {offsets = [0, 128], sizes = [8, 128], strides = [1, 1]} : vector<8x384xf32> to vector<8x128xf32>
    %489 = arith.addf %487, %488 : vector<8x128xf32>
    %cst_153 = arith.constant 5.000000e-01 : f32
    %490 = vector.broadcast %cst_153 : f32 to vector<8x128xf32>
    %491 = arith.mulf %490, %489 : vector<8x128xf32>
    %492 = math.tanh %491 : vector<8x128xf32>
    %cst_154 = arith.constant 5.000000e-01 : f32
    %493 = vector.broadcast %cst_154 : f32 to vector<8x128xf32>
    %494 = arith.mulf %493, %492 : vector<8x128xf32>
    %cst_155 = arith.constant 5.000000e-01 : f32
    %495 = vector.broadcast %cst_155 : f32 to vector<8x128xf32>
    %496 = arith.addf %494, %495 : vector<8x128xf32>
    %497 = vector.extract_strided_slice %474 {offsets = [0, 256], sizes = [8, 128], strides = [1, 1]} : vector<8x384xf32> to vector<8x128xf32>
    %498 = vector.extract_strided_slice %476 {offsets = [0, 256], sizes = [8, 128], strides = [1, 1]} : vector<8x384xf32> to vector<8x128xf32>
    %499 = vector.broadcast %316 : vector<1x128xf32> to vector<8x128xf32>
    %500 = arith.addf %498, %499 : vector<8x128xf32>
    %501 = arith.mulf %486, %500 : vector<8x128xf32>
    %502 = arith.addf %497, %501 : vector<8x128xf32>
    %503 = math.tanh %502 : vector<8x128xf32>
    %504 = arith.subf %470, %503 : vector<8x128xf32>
    %505 = arith.mulf %496, %504 : vector<8x128xf32>
    %506 = arith.addf %503, %505 : vector<8x128xf32>
    %c5_i32_156 = arith.constant 5 : i32
    %c8_i32_157 = arith.constant 8 : i32
    %507 = arith.muli %c5_i32_156, %c8_i32_157 : i32
    %508 = tpu.assume_multiple %507, 8 : i32
    %509 = arith.index_cast %508 : i32 to index
    %c0_158 = arith.constant 0 : index
    %510 = vector.load %arg10[%509, %c0_158] : memref<64x384xf32, #tpu.memory_space<vmem>>, vector<8x384xf32>
    %511 = arith.truncf %506 : vector<8x128xf32> to vector<8x128xbf16>
    %cst_159 = arith.constant dense<0.000000e+00> : vector<8x384xf32>
    %512 = tpu.matmul %511, %315, %cst_159 {dimension_numbers = #tpu.dot_dimension_numbers<[1], [0], [0], [1], [0, 0, 1, 1], [], []>} : vector<8x128xbf16>, vector<128x384xbf16>, vector<8x384xf32> -> vector<8x384xf32>
    %513 = vector.extract_strided_slice %510 {offsets = [0, 0], sizes = [8, 128], strides = [1, 1]} : vector<8x384xf32> to vector<8x128xf32>
    %514 = vector.extract_strided_slice %512 {offsets = [0, 0], sizes = [8, 128], strides = [1, 1]} : vector<8x384xf32> to vector<8x128xf32>
    %515 = arith.addf %513, %514 : vector<8x128xf32>
    %cst_160 = arith.constant 5.000000e-01 : f32
    %516 = vector.broadcast %cst_160 : f32 to vector<8x128xf32>
    %517 = arith.mulf %516, %515 : vector<8x128xf32>
    %518 = math.tanh %517 : vector<8x128xf32>
    %cst_161 = arith.constant 5.000000e-01 : f32
    %519 = vector.broadcast %cst_161 : f32 to vector<8x128xf32>
    %520 = arith.mulf %519, %518 : vector<8x128xf32>
    %cst_162 = arith.constant 5.000000e-01 : f32
    %521 = vector.broadcast %cst_162 : f32 to vector<8x128xf32>
    %522 = arith.addf %520, %521 : vector<8x128xf32>
    %523 = vector.extract_strided_slice %510 {offsets = [0, 128], sizes = [8, 128], strides = [1, 1]} : vector<8x384xf32> to vector<8x128xf32>
    %524 = vector.extract_strided_slice %512 {offsets = [0, 128], sizes = [8, 128], strides = [1, 1]} : vector<8x384xf32> to vector<8x128xf32>
    %525 = arith.addf %523, %524 : vector<8x128xf32>
    %cst_163 = arith.constant 5.000000e-01 : f32
    %526 = vector.broadcast %cst_163 : f32 to vector<8x128xf32>
    %527 = arith.mulf %526, %525 : vector<8x128xf32>
    %528 = math.tanh %527 : vector<8x128xf32>
    %cst_164 = arith.constant 5.000000e-01 : f32
    %529 = vector.broadcast %cst_164 : f32 to vector<8x128xf32>
    %530 = arith.mulf %529, %528 : vector<8x128xf32>
    %cst_165 = arith.constant 5.000000e-01 : f32
    %531 = vector.broadcast %cst_165 : f32 to vector<8x128xf32>
    %532 = arith.addf %530, %531 : vector<8x128xf32>
    %533 = vector.extract_strided_slice %510 {offsets = [0, 256], sizes = [8, 128], strides = [1, 1]} : vector<8x384xf32> to vector<8x128xf32>
    %534 = vector.extract_strided_slice %512 {offsets = [0, 256], sizes = [8, 128], strides = [1, 1]} : vector<8x384xf32> to vector<8x128xf32>
    %535 = vector.broadcast %316 : vector<1x128xf32> to vector<8x128xf32>
    %536 = arith.addf %534, %535 : vector<8x128xf32>
    %537 = arith.mulf %522, %536 : vector<8x128xf32>
    %538 = arith.addf %533, %537 : vector<8x128xf32>
    %539 = math.tanh %538 : vector<8x128xf32>
    %540 = arith.subf %506, %539 : vector<8x128xf32>
    %541 = arith.mulf %532, %540 : vector<8x128xf32>
    %542 = arith.addf %539, %541 : vector<8x128xf32>
    %c6_i32_166 = arith.constant 6 : i32
    %c8_i32_167 = arith.constant 8 : i32
    %543 = arith.muli %c6_i32_166, %c8_i32_167 : i32
    %544 = tpu.assume_multiple %543, 8 : i32
    %545 = arith.index_cast %544 : i32 to index
    %c0_168 = arith.constant 0 : index
    %546 = vector.load %arg10[%545, %c0_168] : memref<64x384xf32, #tpu.memory_space<vmem>>, vector<8x384xf32>
    %547 = arith.truncf %542 : vector<8x128xf32> to vector<8x128xbf16>
    %cst_169 = arith.constant dense<0.000000e+00> : vector<8x384xf32>
    %548 = tpu.matmul %547, %315, %cst_169 {dimension_numbers = #tpu.dot_dimension_numbers<[1], [0], [0], [1], [0, 0, 1, 1], [], []>} : vector<8x128xbf16>, vector<128x384xbf16>, vector<8x384xf32> -> vector<8x384xf32>
    %549 = vector.extract_strided_slice %546 {offsets = [0, 0], sizes = [8, 128], strides = [1, 1]} : vector<8x384xf32> to vector<8x128xf32>
    %550 = vector.extract_strided_slice %548 {offsets = [0, 0], sizes = [8, 128], strides = [1, 1]} : vector<8x384xf32> to vector<8x128xf32>
    %551 = arith.addf %549, %550 : vector<8x128xf32>
    %cst_170 = arith.constant 5.000000e-01 : f32
    %552 = vector.broadcast %cst_170 : f32 to vector<8x128xf32>
    %553 = arith.mulf %552, %551 : vector<8x128xf32>
    %554 = math.tanh %553 : vector<8x128xf32>
    %cst_171 = arith.constant 5.000000e-01 : f32
    %555 = vector.broadcast %cst_171 : f32 to vector<8x128xf32>
    %556 = arith.mulf %555, %554 : vector<8x128xf32>
    %cst_172 = arith.constant 5.000000e-01 : f32
    %557 = vector.broadcast %cst_172 : f32 to vector<8x128xf32>
    %558 = arith.addf %556, %557 : vector<8x128xf32>
    %559 = vector.extract_strided_slice %546 {offsets = [0, 128], sizes = [8, 128], strides = [1, 1]} : vector<8x384xf32> to vector<8x128xf32>
    %560 = vector.extract_strided_slice %548 {offsets = [0, 128], sizes = [8, 128], strides = [1, 1]} : vector<8x384xf32> to vector<8x128xf32>
    %561 = arith.addf %559, %560 : vector<8x128xf32>
    %cst_173 = arith.constant 5.000000e-01 : f32
    %562 = vector.broadcast %cst_173 : f32 to vector<8x128xf32>
    %563 = arith.mulf %562, %561 : vector<8x128xf32>
    %564 = math.tanh %563 : vector<8x128xf32>
    %cst_174 = arith.constant 5.000000e-01 : f32
    %565 = vector.broadcast %cst_174 : f32 to vector<8x128xf32>
    %566 = arith.mulf %565, %564 : vector<8x128xf32>
    %cst_175 = arith.constant 5.000000e-01 : f32
    %567 = vector.broadcast %cst_175 : f32 to vector<8x128xf32>
    %568 = arith.addf %566, %567 : vector<8x128xf32>
    %569 = vector.extract_strided_slice %546 {offsets = [0, 256], sizes = [8, 128], strides = [1, 1]} : vector<8x384xf32> to vector<8x128xf32>
    %570 = vector.extract_strided_slice %548 {offsets = [0, 256], sizes = [8, 128], strides = [1, 1]} : vector<8x384xf32> to vector<8x128xf32>
    %571 = vector.broadcast %316 : vector<1x128xf32> to vector<8x128xf32>
    %572 = arith.addf %570, %571 : vector<8x128xf32>
    %573 = arith.mulf %558, %572 : vector<8x128xf32>
    %574 = arith.addf %569, %573 : vector<8x128xf32>
    %575 = math.tanh %574 : vector<8x128xf32>
    %576 = arith.subf %542, %575 : vector<8x128xf32>
    %577 = arith.mulf %568, %576 : vector<8x128xf32>
    %578 = arith.addf %575, %577 : vector<8x128xf32>
    %c7_i32_176 = arith.constant 7 : i32
    %c8_i32_177 = arith.constant 8 : i32
    %579 = arith.muli %c7_i32_176, %c8_i32_177 : i32
    %580 = tpu.assume_multiple %579, 8 : i32
    %581 = arith.index_cast %580 : i32 to index
    %c0_178 = arith.constant 0 : index
    %582 = vector.load %arg10[%581, %c0_178] : memref<64x384xf32, #tpu.memory_space<vmem>>, vector<8x384xf32>
    %583 = arith.truncf %578 : vector<8x128xf32> to vector<8x128xbf16>
    %cst_179 = arith.constant dense<0.000000e+00> : vector<8x384xf32>
    %584 = tpu.matmul %583, %315, %cst_179 {dimension_numbers = #tpu.dot_dimension_numbers<[1], [0], [0], [1], [0, 0, 1, 1], [], []>} : vector<8x128xbf16>, vector<128x384xbf16>, vector<8x384xf32> -> vector<8x384xf32>
    %585 = vector.extract_strided_slice %582 {offsets = [0, 0], sizes = [8, 128], strides = [1, 1]} : vector<8x384xf32> to vector<8x128xf32>
    %586 = vector.extract_strided_slice %584 {offsets = [0, 0], sizes = [8, 128], strides = [1, 1]} : vector<8x384xf32> to vector<8x128xf32>
    %587 = arith.addf %585, %586 : vector<8x128xf32>
    %cst_180 = arith.constant 5.000000e-01 : f32
    %588 = vector.broadcast %cst_180 : f32 to vector<8x128xf32>
    %589 = arith.mulf %588, %587 : vector<8x128xf32>
    %590 = math.tanh %589 : vector<8x128xf32>
    %cst_181 = arith.constant 5.000000e-01 : f32
    %591 = vector.broadcast %cst_181 : f32 to vector<8x128xf32>
    %592 = arith.mulf %591, %590 : vector<8x128xf32>
    %cst_182 = arith.constant 5.000000e-01 : f32
    %593 = vector.broadcast %cst_182 : f32 to vector<8x128xf32>
    %594 = arith.addf %592, %593 : vector<8x128xf32>
    %595 = vector.extract_strided_slice %582 {offsets = [0, 128], sizes = [8, 128], strides = [1, 1]} : vector<8x384xf32> to vector<8x128xf32>
    %596 = vector.extract_strided_slice %584 {offsets = [0, 128], sizes = [8, 128], strides = [1, 1]} : vector<8x384xf32> to vector<8x128xf32>
    %597 = arith.addf %595, %596 : vector<8x128xf32>
    %cst_183 = arith.constant 5.000000e-01 : f32
    %598 = vector.broadcast %cst_183 : f32 to vector<8x128xf32>
    %599 = arith.mulf %598, %597 : vector<8x128xf32>
    %600 = math.tanh %599 : vector<8x128xf32>
    %cst_184 = arith.constant 5.000000e-01 : f32
    %601 = vector.broadcast %cst_184 : f32 to vector<8x128xf32>
    %602 = arith.mulf %601, %600 : vector<8x128xf32>
    %cst_185 = arith.constant 5.000000e-01 : f32
    %603 = vector.broadcast %cst_185 : f32 to vector<8x128xf32>
    %604 = arith.addf %602, %603 : vector<8x128xf32>
    %605 = vector.extract_strided_slice %582 {offsets = [0, 256], sizes = [8, 128], strides = [1, 1]} : vector<8x384xf32> to vector<8x128xf32>
    %606 = vector.extract_strided_slice %584 {offsets = [0, 256], sizes = [8, 128], strides = [1, 1]} : vector<8x384xf32> to vector<8x128xf32>
    %607 = vector.broadcast %316 : vector<1x128xf32> to vector<8x128xf32>
    %608 = arith.addf %606, %607 : vector<8x128xf32>
    %609 = arith.mulf %594, %608 : vector<8x128xf32>
    %610 = arith.addf %605, %609 : vector<8x128xf32>
    %611 = math.tanh %610 : vector<8x128xf32>
    %612 = arith.subf %578, %611 : vector<8x128xf32>
    %613 = arith.mulf %604, %612 : vector<8x128xf32>
    %614 = arith.addf %611, %613 : vector<8x128xf32>
    %c8_i32_186 = arith.constant 8 : i32
    %cst_187 = arith.constant 0.000000e+00 : f32
    %615 = vector.broadcast %cst_187 : f32 to vector<8x128xf32>
    %616 = arith.maximumf %614, %615 : vector<8x128xf32>
    %617 = arith.truncf %616 : vector<8x128xf32> to vector<8x128xbf16>
    %c0_188 = arith.constant 0 : index
    %c0_189 = arith.constant 0 : index
    %618 = vector.load %arg7[%c0_188, %c0_189] : memref<128x128xbf16, #tpu.memory_space<vmem>>, vector<128x128xbf16>
    %cst_190 = arith.constant dense<0.000000e+00> : vector<8x128xf32>
    %619 = tpu.matmul %617, %618, %cst_190 {dimension_numbers = #tpu.dot_dimension_numbers<[1], [0], [0], [1], [0, 0, 1, 1], [], []>} : vector<8x128xbf16>, vector<128x128xbf16>, vector<8x128xf32> -> vector<8x128xf32>
    %c0_191 = arith.constant 0 : index
    %c0_192 = arith.constant 0 : index
    %620 = vector.load %arg8[%c0_191, %c0_192] : memref<1x128xf32, #tpu.memory_space<vmem>>, vector<1x128xf32>
    %621 = vector.broadcast %620 : vector<1x128xf32> to vector<8x128xf32>
    %622 = arith.addf %619, %621 : vector<8x128xf32>
    %c0_193 = arith.constant 0 : index
    %c0_194 = arith.constant 0 : index
    %623 = vector.load %arg9[%c0_193, %c0_194] : memref<8x128xf32, #tpu.memory_space<vmem>>, vector<8x128xf32>
    tpu.vector_store %arg9[%c0_193, %c0_194], %622 {strides = array<i32>} : memref<8x128xf32, #tpu.memory_space<vmem>>, vector<8x128xf32>,
    return
  }
}

</mosaic_0001>

<bundles_post_ra>
// kernel: tpu_custom_call.1
= control target key start
LH: loop header
LB: loop body
LE: loop exit
PB: predicated region body
PF: predicated region fallthrough
CT: control target
= control target key end

     0   :  { %14 = vsyncpa [#allocation5], 0  ;;  %s4597_s0 = inlined_call_operand.hbm [shape: f32[8,8,384], index: 0, kind: input, shape index: {}]   ;;  %s4598_s1 = inlined_call_operand.hbm [shape: bf16[128,384], index: 1, kind: input, shape index: {}]   ;;  %s4599_s2 = inlined_call_operand.vmem [shape: f32[1,128], index: 2, kind: input, shape index: {}]   ;;  %s4600_s3 = inlined_call_operand.hbm [shape: bf16[128,384], index: 3, kind: input, shape index: {}]   ;;  %s4601_s4 = inlined_call_operand.vmem [shape: f32[1,384], index: 4, kind: input, shape index: {}]   ;;  %s4602_s5 = inlined_call_operand.hbm [shape: bf16[128,384], index: 5, kind: input, shape index: {}]   ;;  %s4603_s6 = inlined_call_operand.vmem [shape: f32[1,128], index: 6, kind: input, shape index: {}]   ;;  %s4604_s7 = inlined_call_operand.hbm [shape: bf16[128,128], index: 7, kind: input, shape index: {}]   ;;  %s4605_s8 = inlined_call_operand.vmem [shape: f32[1,128], index: 8, kind: input, shape index: {}]   ;;  %s4606_s9 = inlined_call_operand.hbm [shape: f32[8,128], index: 9, kind: output, shape index: {}]  }
   0x1   :  { %15 = vsyncpa [#allocation8], 0 }
   0x2   :  { %16 = vsyncpa [#allocation11], 0 }
   0x3   :  { %17 = vsyncpa [#allocation6], 0  ;;  %s3614_s30 = smov [#allocation7]   ;;  %s3474_s13 = scalar_lea.hbm %s4598_s1, 3072 }
   0x4   :  { %s35_s10 = sshll.u32 %s3614_s30, 4  ;;  %p3475_p0 = scmp.ne.s32.totalorder %s4598_s1, %s3474_s13  ;;  %s36_s10 = int_to_ptr.vmem [resolvable:$true] %s35_s10 }
   0x5   :  { %p3478_p1 = scmp.lt.u32.totalorder %s3474_s13, %s4598_s1 }
   0x7   :  { %p3480_p2 = pnand %p3478_p1, %p3475_p0 }
   0x9   :  { %3483 = shalt.err (!%p3480_p2)
}
   0xa   :  { %s3484_s18 = scalar_lea.vmem %s36_s10, 3072  ;;  %p3489_p4 = scmp.lt.s32.totalorder %s36_s10, %s36_s10 }
   0xb   :  { %p3485_p3 = scmp.ne.s32.totalorder %s36_s10, %s3484_s18  ;;  %p3490_p5 = scmp.lt.s32.totalorder %s3484_s18, %s3484_s18 }
   0xd   :  { %p3491_p6 = por %p3490_p5, %p3489_p4 }
   0xf   :  { %p3492_p7 = pnand %p3491_p6, %p3485_p3 }
  0x11   :  { %3495 = shalt.err (!%p3492_p7)
}
  0x12   :  { %s3615_s19 = smov 192   ;;  %s3616_s20 = smov 12  }
  0x13   :  { %41 = dma.hbm_to_vmem [thread:$0]  %s4598_s1, 3072, %s36_s10, [#allocation8], %s3615_s19, %s3615_s19, %s3616_s20  }
  0x14   :  { %s3617_s23 = smov [#allocation10]   ;;  %s3618_s25 = smov [#allocation4]  }
  0x15   :  { %s63_s24 = sshll.u32 %s3617_s23, 4  ;;  %s23_s26 = sshll.u32 %s3618_s25, 4  ;;  %s64_s24 = int_to_ptr.vmem [resolvable:$true] %s63_s24  ;;  %s24_s26 = int_to_ptr.vmem [resolvable:$true] %s23_s26 }
  0x16   :  { %s3496_s29 = scalar_lea.hbm %s4602_s5, 3072 }
  0x17   :  { %p3497_p8 = scmp.ne.s32.totalorder %s4602_s5, %s3496_s29  ;;  %p3500_p9 = scmp.lt.u32.totalorder %s3496_s29, %s4602_s5 }
  0x19   :  { %p3502_p10 = pnand %p3500_p9, %p3497_p8 }
  0x1b   :  { %3505 = shalt.err (!%p3502_p10)
}
  0x1c   :  { %s3506_s1 = scalar_lea.vmem %s64_s24, 3072  ;;  %p3511_p12 = scmp.lt.s32.totalorder %s64_s24, %s64_s24 }
  0x1d   :  { %p3507_p11 = scmp.ne.s32.totalorder %s64_s24, %s3506_s1  ;;  %p3512_p13 = scmp.lt.s32.totalorder %s3506_s1, %s3506_s1 }
  0x1f   :  { %p3513_p0 = por %p3512_p13, %p3511_p12 }
  0x21   :  { %p3514_p1 = pnand %p3513_p0, %p3507_p11 }
  0x23   :  { %3517 = shalt.err (!%p3514_p1)
}
  0x24   :  { %69 = dma.hbm_to_vmem [thread:$0]  %s4602_s5, 3072, %s64_s24, [#allocation11], %s3615_s19, %s3615_s19, %s3616_s20  }
  0x25   :  { %s3518_s17 = scalar_lea.hbm %s4597_s0, 3072 }
  0x26   :  { %p3519_p2 = scmp.ne.s32.totalorder %s4597_s0, %s3518_s17  ;;  %p3522_p3 = scmp.lt.u32.totalorder %s3518_s17, %s4597_s0 }
  0x28   :  { %p3524_p4 = pnand %p3522_p3, %p3519_p2 }
  0x2a   :  { %3527 = shalt.err (!%p3524_p4)
}
  0x2b   :  { %s3528_s25 = scalar_lea.vmem %s24_s26, 3072  ;;  %p3533_p6 = scmp.lt.s32.totalorder %s24_s26, %s24_s26 }
  0x2c   :  { %p3529_p5 = scmp.ne.s32.totalorder %s24_s26, %s3528_s25  ;;  %p3534_p7 = scmp.lt.s32.totalorder %s3528_s25, %s3528_s25 }
  0x2e   :  { %p3535_p8 = por %p3534_p7, %p3533_p6 }
  0x30   :  { %p3536_p9 = pnand %p3535_p8, %p3529_p5 }
  0x32   :  { %3539 = shalt.err (!%p3536_p9)
}
  0x33   :  { %s3619_s5 = smov 384   ;;  %s3620_s24 = smov 24  }
  0x34   :  { %29 = dma.hbm_to_vmem [thread:$0]  %s4597_s0, 3072, %s24_s26, [#allocation5], %s3619_s5, %s3619_s5, %s3620_s24  }
  0x35   :  { %s3621_s29 = smov [#allocation9]   ;;  %s3622_s11 = smov [#allocation12]  }
  0x36   :  { %s49_s30 = sshll.u32 %s3621_s29, 4  ;;  %s77_s12 = sshll.u32 %s3622_s11, 4  ;;  %s50_s30 = int_to_ptr.vmem [resolvable:$true] %s49_s30  ;;  %s78_s12 = int_to_ptr.vmem [resolvable:$true] %s77_s12 }
  0x37   :  { %s3540_s10 = scalar_lea.hbm %s4600_s3, 3072 }
  0x38   :  { %p3541_p10 = scmp.ne.s32.totalorder %s4600_s3, %s3540_s10  ;;  %p3544_p11 = scmp.lt.u32.totalorder %s3540_s10, %s4600_s3 }
  0x3a   :  { %p3546_p12 = pnand %p3544_p11, %p3541_p10 }
  0x3c   :  { %3549 = shalt.err (!%p3546_p12)
}
  0x3d   :  { %s3550_s0 = scalar_lea.vmem %s50_s30, 3072  ;;  %p3555_p0 = scmp.lt.s32.totalorder %s50_s30, %s50_s30 }
  0x3e   :  { %p3551_p13 = scmp.ne.s32.totalorder %s50_s30, %s3550_s0  ;;  %p3556_p1 = scmp.lt.s32.totalorder %s3550_s0, %s3550_s0 }
  0x40   :  { %p3557_p2 = por %p3556_p1, %p3555_p0 }
  0x42   :  { %p3558_p3 = pnand %p3557_p2, %p3551_p13 }
  0x44   :  { %3561 = shalt.err (!%p3558_p3)
}
  0x45   :  { %55 = dma.hbm_to_vmem [thread:$0]  %s4600_s3, 3072, %s50_s30, [#allocation8], %s3615_s19, %s3615_s19, %s3616_s20  }
  0x46   :  { %s3562_s23 = scalar_lea.hbm %s4604_s7, 1024 }
  0x47   :  { %p3563_p4 = scmp.ne.s32.totalorder %s4604_s7, %s3562_s23  ;;  %p3566_p5 = scmp.lt.u32.totalorder %s3562_s23, %s4604_s7 }
  0x49   :  { %p3568_p6 = pnand %p3566_p5, %p3563_p4 }
  0x4b   :  { %3571 = shalt.err (!%p3568_p6)
}
  0x4c   :  { %s3572_s28 = scalar_lea.vmem %s78_s12, 1024  ;;  %p3577_p8 = scmp.lt.s32.totalorder %s78_s12, %s78_s12 }
  0x4d   :  { %p3573_p7 = scmp.ne.s32.totalorder %s78_s12, %s3572_s28  ;;  %p3578_p9 = scmp.lt.s32.totalorder %s3572_s28, %s3572_s28 }
  0x4f   :  { %p3579_p10 = por %p3578_p9, %p3577_p8 }
  0x51   :  { %p3580_p11 = pnand %p3579_p10, %p3573_p7 }
  0x53   :  { %3583 = shalt.err (!%p3580_p11)
}
  0x54   :  { %s3623_s3 = smov 64   ;;  %s3624_s19 = smov 4  }
  0x55   :  { %83 = dma.hbm_to_vmem [thread:$0]  %s4604_s7, 1024, %s78_s12, [#allocation11], %s3623_s3, %s3623_s3, %s3624_s19  }
  0x56   :  { %3606 = dma.done.wait [#allocation5], 3072  }
  0x57   :  { %3607 = vsyncadd [#allocation5], 4294964224 }
  0x58   :  { %3608 = dma.done.wait [#allocation8], 6144  }
  0x59   :  { %3609 = vsyncadd [#allocation8], 4294961152 }
  0x5a   :  { %3610 = dma.done.wait [#allocation11], 4096  }
  0x5b   :  { %3611 = vsyncadd [#allocation11], 4294963200  ;;  %v4609_v0 = vmov 0.0   ;;  %v4607_v1 = vmov 0   ;;  %vm3627_vm0 = vmmov 0   ;;  %v135_v26 = vld [vmem:[#allocation4] sm:$0xff] }
  0x5c   :  { %2849 = vmatprep.subr.bf16.mxu1 %v4609_v0  ;;  %298 = vmatprep.mubr.bf16.mxu0 %v4607_v1  ;;  %v3752_v2 = vld [vmem:[#allocation7 + $0x4] ss:$12 sps:$4 sm:$0xff]   ;;  %v3754_v3 = vld [vmem:[#allocation7] ss:$12 sps:$4 sm:$0xff]   ;;  %v3757_v4 = vld [vmem:[#allocation7 + $0x1c] ss:$12 sps:$4 sm:$0xff]  }
  0x5d   :  { %2865 = vmatprep.mubr.msk.bf16.mxu1 %vm3627_vm0, %v4609_v0  ;;  %266 = vmatprep.subr.bf16.mxu0 %v3752_v2  ;;  %v3760_v5 = vld [vmem:[#allocation7 + $0x18] ss:$12 sps:$4 sm:$0xff]   ;;  %v3763_v6 = vld [vmem:[#allocation7 + $0x34] ss:$12 sps:$4 sm:$0xff]   ;;  %v3768_v8 = vld [vmem:[#allocation7 + $0x30] ss:$12 sps:$4 sm:$0xff]  }
  0x5e   :  { %267 = vmatpush1.bf16.msra.mxu0 %v3754_v3  ;;  %v3765_v7 = vld [vmem:[#allocation7 + $0x8] ss:$12 sps:$4 sm:$0xff]   ;;  %v3770_v9 = vld [vmem:[#allocation7 + $0x4c] ss:$12 sps:$4 sm:$0xff]   ;;  %v3780_v12 = vld [vmem:[#allocation7 + $0x64] ss:$12 sps:$4 sm:$0xff]  }
  0x5f   :  { %268 = vmatprep.subr.bf16.mxu0 %v3757_v4  ;;  %2850 = vmatpush3.bf16.msra.mxu1 %v3765_v7  ;;  %v3774_v10 = vld [vmem:[#allocation7 + $0x20] ss:$12 sps:$4 sm:$0xff]   ;;  %v3777_v11 = vld [vmem:[#allocation7 + $0x48] ss:$12 sps:$4 sm:$0xff]   ;;  %v3784_v13 = vld [vmem:[#allocation7 + $0x38] ss:$12 sps:$4 sm:$0xff]  }
  0x60   :  { %2851 = vmatprep.subr.bf16.mxu1 %v4609_v0  ;;  %v3787_v14 = vld [vmem:[#allocation7 + $0x60] ss:$12 sps:$4 sm:$0xff]   ;;  %v3790_v15 = vld [vmem:[#allocation7 + $0x7c] ss:$12 sps:$4 sm:$0xff]   ;;  %v3796_v17 = vld [vmem:[#allocation7 + $0x78] ss:$12 sps:$4 sm:$0xff]  }
  0x61   :  { %v3794_v16 = vld [vmem:[#allocation7 + $0x50] ss:$12 sps:$4 sm:$0xff]   ;;  %v3799_v18 = vld [vmem:[#allocation7 + $0x94] ss:$12 sps:$4 sm:$0xff]   ;;  %v3809_v21 = vld [vmem:[#allocation7 + $0xac] ss:$12 sps:$4 sm:$0xff]  }
  0x62   :  { %269 = vmatpush1.bf16.msra.mxu0 %v3760_v5  ;;  %v3801_v19 = vld [vmem:[#allocation7 + $0x68] ss:$12 sps:$4 sm:$0xff]   ;;  %v3806_v20 = vld [vmem:[#allocation7 + $0x90] ss:$12 sps:$4 sm:$0xff]   ;;  %v3811_v22 = vld [vmem:[#allocation7 + $0x80] ss:$12 sps:$4 sm:$0xff]  }
  0x63   :  { %270 = vmatprep.subr.bf16.mxu0 %v3763_v6  ;;  %2852 = vmatpush3.bf16.msra.mxu1 %v3774_v10  ;;  %v3816_v23 = vld [vmem:[#allocation7 + $0xa8] ss:$12 sps:$4 sm:$0xff]   ;;  %v3819_v24 = vld [vmem:[#allocation7 + $0x98] ss:$12 sps:$4 sm:$0xff]   ;;  %v3825_v25 = vld [vmem:[#allocation7 + $0xb0] ss:$12 sps:$4 sm:$0xff]  }
  0x64   :  { %2853 = vmatprep.subr.bf16.mxu1 %v4609_v0  ;;  %v136_v35 = vld [vmem:[#allocation4 + $0x8] sm:$0xff]  ;;  %v3873_v39 = vld [vmem:[%s4599_s2] ss:$0 sm:$0xff]  ;;  %v137_v45 = vld [vmem:[#allocation4 + $0x10] sm:$0xff]  ;;  %s3628_s14 = smov [#allocation13]  }
  0x65   :  { %v372_v56 = vld [vmem:[#allocation4 + $0x18] sm:$0xff]  ;;  %s2583_s15 = sshll.u32 %s3628_s14, 4  ;;  %s2584_s15 = int_to_ptr.vmem [resolvable:$true] %s2583_s15 }
  0x66   :  { %271 = vmatpush1.bf16.msra.mxu0 %v3768_v8  ;;  %s3584_s16 = scalar_lea.vmem %s2584_s15, 128  ;;  %p3589_p13 = scmp.lt.s32.totalorder %s2584_s15, %s2584_s15 }
  0x67   :  { %272 = vmatprep.subr.bf16.mxu0 %v3770_v9  ;;  %2854 = vmatpush3.bf16.msra.mxu1 %v3784_v13  ;;  %p3585_p12 = scmp.ne.s32.totalorder %s2584_s15, %s3584_s16  ;;  %p3590_p0 = scmp.lt.s32.totalorder %s3584_s16, %s3584_s16 }
  0x68   :  { %2855 = vmatprep.subr.bf16.mxu1 %v4609_v0 }
  0x69   :  { %p3591_p1 = por %p3590_p0, %p3589_p13 }
  0x6a   :  { %273 = vmatpush1.bf16.msra.mxu0 %v3777_v11 }
  0x6b   :  { %274 = vmatprep.subr.bf16.mxu0 %v3780_v12  ;;  %2856 = vmatpush3.bf16.msra.mxu1 %v3794_v16  ;;  %p3592_p2 = pnand %p3591_p1, %p3585_p12 }
  0x6c   :  { %2857 = vmatprep.subr.bf16.mxu1 %v4609_v0 }
  0x6e   :  { %275 = vmatpush1.bf16.msra.mxu0 %v3787_v14 }
  0x6f   :  { %276 = vmatprep.subr.bf16.mxu0 %v3790_v15  ;;  %2858 = vmatpush3.bf16.msra.mxu1 %v3801_v19 }
  0x70   :  { %2859 = vmatprep.subr.bf16.mxu1 %v4609_v0 }
  0x72   :  { %277 = vmatpush1.bf16.msra.mxu0 %v3796_v17 }
  0x73   :  { %278 = vmatprep.subr.bf16.mxu0 %v3799_v18  ;;  %2860 = vmatpush3.bf16.msra.mxu1 %v3811_v22 }
  0x74   :  { %2861 = vmatprep.subr.bf16.mxu1 %v4609_v0 }
  0x76   :  { %279 = vmatpush1.bf16.msra.mxu0 %v3806_v20 }
  0x77   :  { %280 = vmatprep.subr.bf16.mxu0 %v3809_v21  ;;  %2862 = vmatpush3.bf16.msra.mxu1 %v3819_v24 }
  0x78   :  { %2863 = vmatprep.subr.bf16.mxu1 %v4609_v0 }
  0x7a   :  { %281 = vmatpush1.bf16.msra.mxu0 %v3816_v23 }
  0x7b   :  { %376 = vmatprep.subr.bf16.mxu0 %v3752_v2  ;;  %2864 = vmatpush3.bf16.msra.mxu1 %v3825_v25 }
  0x7c   :  { %2869 = vmatprep.subr.bf16.mxu1 %v4609_v0 }
  0x7d   :  { %299 = vmatmul.mubr.bf16.vlgmr.msra.gmra.mrb[0].mxu0 %v4607_v1 }
  0x7e   :  { %377 = vmatpush1.bf16.msra.mxu0 %v3754_v3  ;;  %408 = vmatprep.mubr.bf16.mxu0 %v4607_v1 }
  0x7f   :  { %378 = vmatprep.subr.bf16.mxu0 %v3757_v4  ;;  %2866 = vmatmul.mubr.bf16.vlgmr.msra.gmra.mrb[0].mxu1 %v4607_v1 }
  0x80   :  { %2870 = vmatpush3.bf16.msra.mxu1 %v3765_v7  ;;  %2885 = vmatprep.mubr.msk.bf16.mxu1 %vm3627_vm0, %v4609_v0 }
  0x81   :  { %2871 = vmatprep.subr.bf16.mxu1 %v4609_v0 }
  0x82   :  { %379 = vmatpush1.bf16.msra.mxu0 %v3760_v5 }
  0x83   :  { %380 = vmatprep.subr.bf16.mxu0 %v3763_v6 }
  0x84   :  { %2872 = vmatpush3.bf16.msra.mxu1 %v3774_v10 }
  0x85   :  { %2873 = vmatprep.subr.bf16.mxu1 %v4609_v0 }
  0x86   :  { %381 = vmatpush1.bf16.msra.mxu0 %v3768_v8 }
  0x87   :  { %382 = vmatprep.subr.bf16.mxu0 %v3770_v9 }
  0x88   :  { %2874 = vmatpush3.bf16.msra.mxu1 %v3784_v13 }
  0x89   :  { %2875 = vmatprep.subr.bf16.mxu1 %v4609_v0 }
  0x8a   :  { %383 = vmatpush1.bf16.msra.mxu0 %v3777_v11 }
  0x8b   :  { %384 = vmatprep.subr.bf16.mxu0 %v3780_v12 }
  0x8c   :  { %2876 = vmatpush3.bf16.msra.mxu1 %v3794_v16 }
  0x8d   :  { %2877 = vmatprep.subr.bf16.mxu1 %v4609_v0 }
  0x8e   :  { %385 = vmatpush1.bf16.msra.mxu0 %v3787_v14 }
  0x8f   :  { %386 = vmatprep.subr.bf16.mxu0 %v3790_v15 }
  0x90   :  { %2878 = vmatpush3.bf16.msra.mxu1 %v3801_v19 }
  0x91   :  { %2879 = vmatprep.subr.bf16.mxu1 %v4609_v0 }
  0x92   :  { %387 = vmatpush1.bf16.msra.mxu0 %v3796_v17 }
  0x93   :  { %388 = vmatprep.subr.bf16.mxu0 %v3799_v18 }
  0x94   :  { %2880 = vmatpush3.bf16.msra.mxu1 %v3811_v22 }
  0x95   :  { %2881 = vmatprep.subr.bf16.mxu1 %v4609_v0 }
  0x96   :  { %389 = vmatpush1.bf16.msra.mxu0 %v3806_v20 }
  0x97   :  { %390 = vmatprep.subr.bf16.mxu0 %v3809_v21 }
  0x98   :  { %2882 = vmatpush3.bf16.msra.mxu1 %v3819_v24 }
  0x99   :  { %2883 = vmatprep.subr.bf16.mxu1 %v4609_v0 }
  0x9a   :  { %391 = vmatpush1.bf16.msra.mxu0 %v3816_v23 }
  0x9b   :  { %481 = vmatprep.subr.bf16.mxu0 %v3752_v2 }
  0x9c   :  { %2884 = vmatpush3.bf16.msra.mxu1 %v3825_v25 }
  0x9d   :  { %2889 = vmatprep.subr.bf16.mxu1 %v4609_v0 }
 0x150   :  { %v300_v27 = vpop.f32.mrb[0].mxu0 }
 0x151   :  { %v347_v28 = vadd.f32 %v300_v27, %v135_v26  ;;  %v302_v29 = vpop.f32.mrb[1].mxu0 }
 0x152   :  { %v304_v30 = vpop.f32.mrb[2].mxu0  ;;  %v341_v33 = vpop.f32.mrb[0].mxu1  ;;  %v352_v38 = vadd.f32 %v302_v29, %v136_v35  ;;  %v373_v29 = vld [vmem:[#allocation4 + $0x20] sm:$0xff] }
 0x153   :  { %v348_v31 = vmul.f32 0.5, %v347_v28  ;;  %v305_v32 = vpop.f32.mrb[3].mxu0  ;;  %v2867_v34 = vpop.f32.mrb[1].mxu1  ;;  %v363_v43 = vadd.f32 %v3873_v39, %v341_v33 }
 0x154   :  { %v344_v36 = vpop.f32.mrb[2].mxu1  ;;  %v353_v40 = vmul.f32 0.5, %v352_v38 }
 0x155   :  { %3332 = vtanh.f32 %v348_v31  ;;  %v2868_v37 = vpop.f32.mrb[3].mxu1  ;;  %v374_v36 = vld [vmem:[#allocation4 + $0x28] sm:$0xff] }
 0x156   :  { %3334 = vtanh.f32 %v353_v40 }
 0x15f   :  { %v3333_v41 = vpop.eup %3332 }
 0x160   :  { %v350_v42 = vmul.f32 0.5, %v3333_v41  ;;  %v3335_v48 = vpop.eup %3334 }
 0x161   :  { %v355_v49 = vmul.f32 0.5, %v3335_v48  ;;  %v477_v48 = vld [vmem:[#allocation4 + $0x30] sm:$0xff] }
 0x162   :  { %v351_v44 = vadd.f32 0.5, %v350_v42 }
 0x163   :  { %v356_v51 = vadd.f32 0.5, %v355_v49 }
 0x164   :  { %v364_v46 = vmul.f32 %v363_v43, %v351_v44 }
 0x166   :  { %v365_v47 = vadd.f32 %v364_v46, %v137_v45 }
 0x168   :  { %3336 = vtanh.f32 %v365_v47 }
 0x172   :  { %v3337_v50 = vpop.eup %3336 }
 0x173   :  { %v367_v52 = vsub.f32 0.0, %v3337_v50 }
 0x175   :  { %v368_v53 = vmul.f32 %v367_v52, %v356_v51 }
 0x177   :  { %v3876_v54 = vadd.f32 %v3337_v50, %v368_v53 }
 0x179   :  { %v375_v55 = vpack.c.bf16 %v3876_v54, %v3876_v54 }
 0x17b   :  { %409 = vmatmul.mubr.bf16.vlgmr.msra.gmra.mrb[4].mxu0 %v375_v55  ;;  %2886 = vmatmul.mubr.bf16.vlgmr.msra.gmra.mrb[4].mxu1 %v375_v55 }
 0x17c   :  { %482 = vmatpush1.bf16.msra.mxu0 %v3754_v3  ;;  %2890 = vmatpush3.bf16.msra.mxu1 %v3765_v7 }
 0x17d   :  { %483 = vmatprep.subr.bf16.mxu0 %v3757_v4  ;;  %2891 = vmatprep.subr.bf16.mxu1 %v4609_v0 }
 0x17e   :  { %513 = vmatprep.mubr.bf16.mxu0 %v4607_v1  ;;  %2905 = vmatprep.mubr.msk.bf16.mxu1 %vm3627_vm0, %v4609_v0 }
 0x180   :  { %484 = vmatpush1.bf16.msra.mxu0 %v3760_v5  ;;  %2892 = vmatpush3.bf16.msra.mxu1 %v3774_v10 }
 0x181   :  { %485 = vmatprep.subr.bf16.mxu0 %v3763_v6  ;;  %2893 = vmatprep.subr.bf16.mxu1 %v4609_v0 }
 0x184   :  { %486 = vmatpush1.bf16.msra.mxu0 %v3768_v8  ;;  %2894 = vmatpush3.bf16.msra.mxu1 %v3784_v13 }
 0x185   :  { %487 = vmatprep.subr.bf16.mxu0 %v3770_v9  ;;  %2895 = vmatprep.subr.bf16.mxu1 %v4609_v0 }
 0x188   :  { %488 = vmatpush1.bf16.msra.mxu0 %v3777_v11  ;;  %2896 = vmatpush3.bf16.msra.mxu1 %v3794_v16 }
 0x189   :  { %489 = vmatprep.subr.bf16.mxu0 %v3780_v12  ;;  %2897 = vmatprep.subr.bf16.mxu1 %v4609_v0 }
 0x18c   :  { %490 = vmatpush1.bf16.msra.mxu0 %v3787_v14  ;;  %2898 = vmatpush3.bf16.msra.mxu1 %v3801_v19 }
 0x18d   :  { %491 = vmatprep.subr.bf16.mxu0 %v3790_v15  ;;  %2899 = vmatprep.subr.bf16.mxu1 %v4609_v0 }
 0x190   :  { %492 = vmatpush1.bf16.msra.mxu0 %v3796_v17  ;;  %2900 = vmatpush3.bf16.msra.mxu1 %v3811_v22 }
 0x191   :  { %493 = vmatprep.subr.bf16.mxu0 %v3799_v18  ;;  %2901 = vmatprep.subr.bf16.mxu1 %v4609_v0 }
 0x194   :  { %494 = vmatpush1.bf16.msra.mxu0 %v3806_v20  ;;  %2902 = vmatpush3.bf16.msra.mxu1 %v3819_v24 }
 0x195   :  { %495 = vmatprep.subr.bf16.mxu0 %v3809_v21  ;;  %2903 = vmatprep.subr.bf16.mxu1 %v4609_v0 }
 0x198   :  { %496 = vmatpush1.bf16.msra.mxu0 %v3816_v23  ;;  %2904 = vmatpush3.bf16.msra.mxu1 %v3825_v25 }
 0x199   :  { %586 = vmatprep.subr.bf16.mxu0 %v3752_v2  ;;  %2909 = vmatprep.subr.bf16.mxu1 %v4609_v0 }
 0x24e   :  { %v410_v57 = vpop.f32.mrb[4].mxu0  ;;  %v451_v58 = vpop.f32.mrb[4].mxu1 }
 0x24f   :  { %v457_v59 = vadd.f32 %v410_v57, %v372_v56  ;;  %v412_v60 = vpop.f32.mrb[5].mxu0  ;;  %v2887_v61 = vpop.f32.mrb[5].mxu1  ;;  %v467_v35 = vadd.f32 %v3873_v39, %v451_v58 }
 0x250   :  { %v414_v62 = vpop.f32.mrb[6].mxu0  ;;  %v454_v63 = vpop.f32.mrb[6].mxu1  ;;  %v462_v30 = vadd.f32 %v412_v60, %v373_v29  ;;  %v478_v60 = vld [vmem:[#allocation4 + $0x38] sm:$0xff]  ;;  %v479_v29 = vld [vmem:[#allocation4 + $0x40] sm:$0xff] }
 0x251   :  { %v458_v26 = vmul.f32 0.5, %v457_v59  ;;  %v415_v27 = vpop.f32.mrb[7].mxu0  ;;  %v2888_v28 = vpop.f32.mrb[7].mxu1 }
 0x252   :  { %v463_v31 = vmul.f32 0.5, %v462_v30 }
 0x253   :  { %3338 = vtanh.f32 %v458_v26 }
 0x254   :  { %3340 = vtanh.f32 %v463_v31 }
 0x25d   :  { %v3339_v32 = vpop.eup %3338 }
 0x25e   :  { %v460_v33 = vmul.f32 0.5, %v3339_v32  ;;  %v3341_v40 = vpop.eup %3340 }
 0x25f   :  { %v465_v41 = vmul.f32 0.5, %v3341_v40 }
 0x260   :  { %v461_v34 = vadd.f32 0.5, %v460_v33 }
 0x261   :  { %v466_v43 = vadd.f32 0.5, %v465_v41  ;;  %v582_v41 = vld [vmem:[#allocation4 + $0x48] sm:$0xff] }
 0x262   :  { %v468_v37 = vmul.f32 %v467_v35, %v461_v34 }
 0x264   :  { %v469_v38 = vadd.f32 %v468_v37, %v374_v36 }
 0x266   :  { %3342 = vtanh.f32 %v469_v38 }
 0x270   :  { %v3343_v42 = vpop.eup %3342 }
 0x271   :  { %v471_v44 = vsub.f32 %v3876_v54, %v3343_v42 }
 0x273   :  { %v472_v45 = vmul.f32 %v471_v44, %v466_v43 }
 0x275   :  { %v3917_v46 = vadd.f32 %v3343_v42, %v472_v45 }
 0x277   :  { %v480_v47 = vpack.c.bf16 %v3917_v46, %v3917_v46 }
 0x279   :  { %514 = vmatmul.mubr.bf16.vlgmr.msra.gmra.mrb[8].mxu0 %v480_v47  ;;  %2906 = vmatmul.mubr.bf16.vlgmr.msra.gmra.mrb[8].mxu1 %v480_v47 }
 0x27a   :  { %587 = vmatpush1.bf16.msra.mxu0 %v3754_v3  ;;  %2910 = vmatpush3.bf16.msra.mxu1 %v3765_v7 }
 0x27b   :  { %588 = vmatprep.subr.bf16.mxu0 %v3757_v4  ;;  %2911 = vmatprep.subr.bf16.mxu1 %v4609_v0 }
 0x27c   :  { %618 = vmatprep.mubr.bf16.mxu0 %v4607_v1  ;;  %2925 = vmatprep.mubr.msk.bf16.mxu1 %vm3627_vm0, %v4609_v0 }
 0x27e   :  { %589 = vmatpush1.bf16.msra.mxu0 %v3760_v5  ;;  %2912 = vmatpush3.bf16.msra.mxu1 %v3774_v10 }
 0x27f   :  { %590 = vmatprep.subr.bf16.mxu0 %v3763_v6  ;;  %2913 = vmatprep.subr.bf16.mxu1 %v4609_v0 }
 0x282   :  { %591 = vmatpush1.bf16.msra.mxu0 %v3768_v8  ;;  %2914 = vmatpush3.bf16.msra.mxu1 %v3784_v13 }
 0x283   :  { %592 = vmatprep.subr.bf16.mxu0 %v3770_v9  ;;  %2915 = vmatprep.subr.bf16.mxu1 %v4609_v0 }
 0x286   :  { %593 = vmatpush1.bf16.msra.mxu0 %v3777_v11  ;;  %2916 = vmatpush3.bf16.msra.mxu1 %v3794_v16 }
 0x287   :  { %594 = vmatprep.subr.bf16.mxu0 %v3780_v12  ;;  %2917 = vmatprep.subr.bf16.mxu1 %v4609_v0 }
 0x28a   :  { %595 = vmatpush1.bf16.msra.mxu0 %v3787_v14  ;;  %2918 = vmatpush3.bf16.msra.mxu1 %v3801_v19 }
 0x28b   :  { %596 = vmatprep.subr.bf16.mxu0 %v3790_v15  ;;  %2919 = vmatprep.subr.bf16.mxu1 %v4609_v0 }
 0x28e   :  { %597 = vmatpush1.bf16.msra.mxu0 %v3796_v17  ;;  %2920 = vmatpush3.bf16.msra.mxu1 %v3811_v22 }
 0x28f   :  { %598 = vmatprep.subr.bf16.mxu0 %v3799_v18  ;;  %2921 = vmatprep.subr.bf16.mxu1 %v4609_v0 }
 0x292   :  { %599 = vmatpush1.bf16.msra.mxu0 %v3806_v20  ;;  %2922 = vmatpush3.bf16.msra.mxu1 %v3819_v24 }
 0x293   :  { %600 = vmatprep.subr.bf16.mxu0 %v3809_v21  ;;  %2923 = vmatprep.subr.bf16.mxu1 %v4609_v0 }
 0x296   :  { %601 = vmatpush1.bf16.msra.mxu0 %v3816_v23  ;;  %2924 = vmatpush3.bf16.msra.mxu1 %v3825_v25 }
 0x297   :  { %691 = vmatprep.subr.bf16.mxu0 %v3752_v2  ;;  %2929 = vmatprep.subr.bf16.mxu1 %v4609_v0 }
 0x34c   :  { %v515_v49 = vpop.f32.mrb[8].mxu0  ;;  %v556_v50 = vpop.f32.mrb[8].mxu1 }
 0x34d   :  { %v562_v51 = vadd.f32 %v515_v49, %v477_v48  ;;  %v517_v52 = vpop.f32.mrb[9].mxu0  ;;  %v2907_v53 = vpop.f32.mrb[9].mxu1  ;;  %v572_v28 = vadd.f32 %v3873_v39, %v556_v50 }
 0x34e   :  { %v519_v55 = vpop.f32.mrb[10].mxu0  ;;  %v559_v56 = vpop.f32.mrb[10].mxu1  ;;  %v567_v61 = vadd.f32 %v517_v52, %v478_v60  ;;  %v583_v53 = vld [vmem:[#allocation4 + $0x50] sm:$0xff] }
 0x34f   :  { %v563_v57 = vmul.f32 0.5, %v562_v51  ;;  %v520_v58 = vpop.f32.mrb[11].mxu0  ;;  %v2908_v59 = vpop.f32.mrb[11].mxu1 }
 0x350   :  { %v568_v62 = vmul.f32 0.5, %v567_v61  ;;  %v584_v61 = vld [vmem:[#allocation4 + $0x58] sm:$0xff] }
 0x351   :  { %3344 = vtanh.f32 %v563_v57 }
 0x352   :  { %3346 = vtanh.f32 %v568_v62 }
 0x35b   :  { %v3345_v63 = vpop.eup %3344 }
 0x35c   :  { %v565_v26 = vmul.f32 0.5, %v3345_v63  ;;  %v3347_v32 = vpop.eup %3346 }
 0x35d   :  { %v570_v33 = vmul.f32 0.5, %v3347_v32 }
 0x35e   :  { %v566_v27 = vadd.f32 0.5, %v565_v26 }
 0x35f   :  { %v571_v35 = vadd.f32 0.5, %v570_v33 }
 0x360   :  { %v573_v30 = vmul.f32 %v572_v28, %v566_v27 }
 0x362   :  { %v574_v31 = vadd.f32 %v573_v30, %v479_v29 }
 0x364   :  { %3348 = vtanh.f32 %v574_v31 }
 0x36e   :  { %v3349_v34 = vpop.eup %3348 }
 0x36f   :  { %v576_v36 = vsub.f32 %v3917_v46, %v3349_v34 }
 0x371   :  { %v577_v37 = vmul.f32 %v576_v36, %v571_v35 }
 0x373   :  { %v3958_v38 = vadd.f32 %v3349_v34, %v577_v37  ;;  %v687_v34 = vld [vmem:[#allocation4 + $0x60] sm:$0xff] }
 0x375   :  { %v585_v40 = vpack.c.bf16 %v3958_v38, %v3958_v38 }
 0x377   :  { %619 = vmatmul.mubr.bf16.vlgmr.msra.gmra.mrb[12].mxu0 %v585_v40  ;;  %2926 = vmatmul.mubr.bf16.vlgmr.msra.gmra.mrb[12].mxu1 %v585_v40 }
 0x378   :  { %692 = vmatpush1.bf16.msra.mxu0 %v3754_v3  ;;  %2930 = vmatpush3.bf16.msra.mxu1 %v3765_v7 }
 0x379   :  { %693 = vmatprep.subr.bf16.mxu0 %v3757_v4  ;;  %2931 = vmatprep.subr.bf16.mxu1 %v4609_v0 }
 0x37a   :  { %723 = vmatprep.mubr.bf16.mxu0 %v4607_v1  ;;  %2945 = vmatprep.mubr.msk.bf16.mxu1 %vm3627_vm0, %v4609_v0 }
 0x37c   :  { %694 = vmatpush1.bf16.msra.mxu0 %v3760_v5  ;;  %2932 = vmatpush3.bf16.msra.mxu1 %v3774_v10 }
 0x37d   :  { %695 = vmatprep.subr.bf16.mxu0 %v3763_v6  ;;  %2933 = vmatprep.subr.bf16.mxu1 %v4609_v0 }
 0x380   :  { %696 = vmatpush1.bf16.msra.mxu0 %v3768_v8  ;;  %2934 = vmatpush3.bf16.msra.mxu1 %v3784_v13 }
 0x381   :  { %697 = vmatprep.subr.bf16.mxu0 %v3770_v9  ;;  %2935 = vmatprep.subr.bf16.mxu1 %v4609_v0 }
 0x384   :  { %698 = vmatpush1.bf16.msra.mxu0 %v3777_v11  ;;  %2936 = vmatpush3.bf16.msra.mxu1 %v3794_v16 }
 0x385   :  { %699 = vmatprep.subr.bf16.mxu0 %v3780_v12  ;;  %2937 = vmatprep.subr.bf16.mxu1 %v4609_v0 }
 0x388   :  { %700 = vmatpush1.bf16.msra.mxu0 %v3787_v14  ;;  %2938 = vmatpush3.bf16.msra.mxu1 %v3801_v19 }
 0x389   :  { %701 = vmatprep.subr.bf16.mxu0 %v3790_v15  ;;  %2939 = vmatprep.subr.bf16.mxu1 %v4609_v0 }
 0x38c   :  { %702 = vmatpush1.bf16.msra.mxu0 %v3796_v17  ;;  %2940 = vmatpush3.bf16.msra.mxu1 %v3811_v22 }
 0x38d   :  { %703 = vmatprep.subr.bf16.mxu0 %v3799_v18  ;;  %2941 = vmatprep.subr.bf16.mxu1 %v4609_v0 }
 0x390   :  { %704 = vmatpush1.bf16.msra.mxu0 %v3806_v20  ;;  %2942 = vmatpush3.bf16.msra.mxu1 %v3819_v24 }
 0x391   :  { %705 = vmatprep.subr.bf16.mxu0 %v3809_v21  ;;  %2943 = vmatprep.subr.bf16.mxu1 %v4609_v0 }
 0x394   :  { %706 = vmatpush1.bf16.msra.mxu0 %v3816_v23  ;;  %2944 = vmatpush3.bf16.msra.mxu1 %v3825_v25 }
 0x395   :  { %796 = vmatprep.subr.bf16.mxu0 %v3752_v2  ;;  %2949 = vmatprep.subr.bf16.mxu1 %v4609_v0 }
 0x44a   :  { %v620_v42 = vpop.f32.mrb[12].mxu0  ;;  %v661_v43 = vpop.f32.mrb[12].mxu1 }
 0x44b   :  { %v667_v44 = vadd.f32 %v620_v42, %v582_v41  ;;  %v622_v45 = vpop.f32.mrb[13].mxu0  ;;  %v2927_v47 = vpop.f32.mrb[13].mxu1  ;;  %v677_v60 = vadd.f32 %v3873_v39, %v661_v43 }
 0x44c   :  { %v624_v48 = vpop.f32.mrb[14].mxu0  ;;  %v664_v49 = vpop.f32.mrb[14].mxu1  ;;  %v672_v55 = vadd.f32 %v622_v45, %v583_v53 }
 0x44d   :  { %v668_v50 = vmul.f32 0.5, %v667_v44  ;;  %v625_v51 = vpop.f32.mrb[15].mxu0  ;;  %v2928_v52 = vpop.f32.mrb[15].mxu1  ;;  %v688_v48 = vld [vmem:[#allocation4 + $0x68] sm:$0xff] }
 0x44e   :  { %v673_v56 = vmul.f32 0.5, %v672_v55  ;;  %v689_v55 = vld [vmem:[#allocation4 + $0x70] sm:$0xff] }
 0x44f   :  { %3350 = vtanh.f32 %v668_v50 }
 0x450   :  { %3352 = vtanh.f32 %v673_v56 }
 0x459   :  { %v3351_v57 = vpop.eup %3350 }
 0x45a   :  { %v670_v58 = vmul.f32 0.5, %v3351_v57  ;;  %v3353_v26 = vpop.eup %3352 }
 0x45b   :  { %v675_v27 = vmul.f32 0.5, %v3353_v26 }
 0x45c   :  { %v671_v59 = vadd.f32 0.5, %v670_v58 }
 0x45d   :  { %v676_v29 = vadd.f32 0.5, %v675_v27 }
 0x45e   :  { %v678_v62 = vmul.f32 %v677_v60, %v671_v59 }
 0x460   :  { %v679_v63 = vadd.f32 %v678_v62, %v584_v61 }
 0x462   :  { %3354 = vtanh.f32 %v679_v63 }
 0x46c   :  { %v3355_v28 = vpop.eup %3354 }
 0x46d   :  { %v681_v30 = vsub.f32 %v3958_v38, %v3355_v28 }
 0x46f   :  { %v682_v31 = vmul.f32 %v681_v30, %v676_v29 }
 0x471   :  { %v3999_v32 = vadd.f32 %v3355_v28, %v682_v31 }
 0x473   :  { %v690_v33 = vpack.c.bf16 %v3999_v32, %v3999_v32 }
 0x475   :  { %724 = vmatmul.mubr.bf16.vlgmr.msra.gmra.mrb[16].mxu0 %v690_v33  ;;  %2946 = vmatmul.mubr.bf16.vlgmr.msra.gmra.mrb[16].mxu1 %v690_v33 }
 0x476   :  { %797 = vmatpush1.bf16.msra.mxu0 %v3754_v3  ;;  %2950 = vmatpush3.bf16.msra.mxu1 %v3765_v7 }
 0x477   :  { %798 = vmatprep.subr.bf16.mxu0 %v3757_v4  ;;  %2951 = vmatprep.subr.bf16.mxu1 %v4609_v0 }
 0x478   :  { %828 = vmatprep.mubr.bf16.mxu0 %v4607_v1  ;;  %2965 = vmatprep.mubr.msk.bf16.mxu1 %vm3627_vm0, %v4609_v0 }
 0x47a   :  { %799 = vmatpush1.bf16.msra.mxu0 %v3760_v5  ;;  %2952 = vmatpush3.bf16.msra.mxu1 %v3774_v10 }
 0x47b   :  { %800 = vmatprep.subr.bf16.mxu0 %v3763_v6  ;;  %2953 = vmatprep.subr.bf16.mxu1 %v4609_v0 }
 0x47e   :  { %801 = vmatpush1.bf16.msra.mxu0 %v3768_v8  ;;  %2954 = vmatpush3.bf16.msra.mxu1 %v3784_v13 }
 0x47f   :  { %802 = vmatprep.subr.bf16.mxu0 %v3770_v9  ;;  %2955 = vmatprep.subr.bf16.mxu1 %v4609_v0 }
 0x482   :  { %803 = vmatpush1.bf16.msra.mxu0 %v3777_v11  ;;  %2956 = vmatpush3.bf16.msra.mxu1 %v3794_v16 }
 0x483   :  { %804 = vmatprep.subr.bf16.mxu0 %v3780_v12  ;;  %2957 = vmatprep.subr.bf16.mxu1 %v4609_v0 }
 0x486   :  { %805 = vmatpush1.bf16.msra.mxu0 %v3787_v14  ;;  %2958 = vmatpush3.bf16.msra.mxu1 %v3801_v19 }
 0x487   :  { %806 = vmatprep.subr.bf16.mxu0 %v3790_v15  ;;  %2959 = vmatprep.subr.bf16.mxu1 %v4609_v0 }
 0x48a   :  { %807 = vmatpush1.bf16.msra.mxu0 %v3796_v17  ;;  %2960 = vmatpush3.bf16.msra.mxu1 %v3811_v22 }
 0x48b   :  { %808 = vmatprep.subr.bf16.mxu0 %v3799_v18  ;;  %2961 = vmatprep.subr.bf16.mxu1 %v4609_v0 }
 0x48e   :  { %809 = vmatpush1.bf16.msra.mxu0 %v3806_v20  ;;  %2962 = vmatpush3.bf16.msra.mxu1 %v3819_v24 }
 0x48f   :  { %810 = vmatprep.subr.bf16.mxu0 %v3809_v21  ;;  %2963 = vmatprep.subr.bf16.mxu1 %v4609_v0 }
 0x492   :  { %811 = vmatpush1.bf16.msra.mxu0 %v3816_v23  ;;  %2964 = vmatpush3.bf16.msra.mxu1 %v3825_v25 }
 0x493   :  { %901 = vmatprep.subr.bf16.mxu0 %v3752_v2  ;;  %2969 = vmatprep.subr.bf16.mxu1 %v4609_v0 }
 0x548   :  { %v725_v35 = vpop.f32.mrb[16].mxu0  ;;  %v766_v36 = vpop.f32.mrb[16].mxu1 }
 0x549   :  { %v772_v37 = vadd.f32 %v725_v35, %v687_v34  ;;  %v727_v40 = vpop.f32.mrb[17].mxu0  ;;  %v2947_v41 = vpop.f32.mrb[17].mxu1  ;;  %v782_v53 = vadd.f32 %v3873_v39, %v766_v36 }
 0x54a   :  { %v729_v42 = vpop.f32.mrb[18].mxu0  ;;  %v769_v43 = vpop.f32.mrb[18].mxu1  ;;  %v777_v49 = vadd.f32 %v727_v40, %v688_v48  ;;  %v3429_v40 = vld [vmem:[#allocation7] ss:$12 sps:$4 sm:$0xff]   ;;  %v3430_v41 = vld [vmem:[#allocation7 + $0x8] ss:$12 sps:$4 sm:$0xff]  }
 0x54b   :  { %v773_v44 = vmul.f32 0.5, %v772_v37  ;;  %v730_v45 = vpop.f32.mrb[19].mxu0  ;;  %v2948_v47 = vpop.f32.mrb[19].mxu1  ;;  %v3431_v42 = vld [vmem:[#allocation7 + $0x1c] ss:$12 sps:$4 sm:$0xff]  }
 0x54c   :  { %v778_v50 = vmul.f32 0.5, %v777_v49  ;;  %v3432_v43 = vld [vmem:[#allocation7 + $0x18] ss:$12 sps:$4 sm:$0xff]   ;;  %v3434_v45 = vld [vmem:[#allocation7 + $0x34] ss:$12 sps:$4 sm:$0xff]  }
 0x54d   :  { %3356 = vtanh.f32 %v773_v44  ;;  %v3433_v44 = vld [vmem:[#allocation7 + $0x20] ss:$12 sps:$4 sm:$0xff]   ;;  %v3435_v47 = vld [vmem:[#allocation7 + $0x30] ss:$12 sps:$4 sm:$0xff]   ;;  %v3436_v48 = vld [vmem:[#allocation7 + $0x38] ss:$12 sps:$4 sm:$0xff]  }
 0x54e   :  { %3358 = vtanh.f32 %v778_v50  ;;  %v3437_v49 = vld [vmem:[#allocation7 + $0x4c] ss:$12 sps:$4 sm:$0xff]   ;;  %v3438_v50 = vld [vmem:[#allocation7 + $0x48] ss:$12 sps:$4 sm:$0xff]  }
 0x557   :  { %v3357_v51 = vpop.eup %3356 }
 0x558   :  { %v775_v52 = vmul.f32 0.5, %v3357_v51  ;;  %v3359_v58 = vpop.eup %3358  ;;  %v3439_v51 = vld [vmem:[#allocation7 + $0x50] ss:$12 sps:$4 sm:$0xff]  }
 0x559   :  { %v780_v59 = vmul.f32 0.5, %v3359_v58  ;;  %v3446_v58 = vld [vmem:[#allocation7 + $0x94] ss:$12 sps:$4 sm:$0xff]  }
 0x55a   :  { %v776_v2 = vadd.f32 0.5, %v775_v52  ;;  %v3440_v52 = vld [vmem:[#allocation7 + $0x64] ss:$12 sps:$4 sm:$0xff]  }
 0x55b   :  { %v781_v61 = vadd.f32 0.5, %v780_v59  ;;  %v3447_v59 = vld [vmem:[#allocation7 + $0x90] ss:$12 sps:$4 sm:$0xff]  }
 0x55c   :  { %v783_v56 = vmul.f32 %v782_v53, %v776_v2  ;;  %v3441_v2 = vld [vmem:[#allocation7 + $0x60] ss:$12 sps:$4 sm:$0xff]   ;;  %v3442_v53 = vld [vmem:[#allocation7 + $0x68] ss:$12 sps:$4 sm:$0xff]  }
 0x55e   :  { %v784_v57 = vadd.f32 %v783_v56, %v689_v55  ;;  %v3443_v55 = vld [vmem:[#allocation7 + $0x7c] ss:$12 sps:$4 sm:$0xff]   ;;  %v3444_v56 = vld [vmem:[#allocation7 + $0x78] ss:$12 sps:$4 sm:$0xff]  }
 0x560   :  { %3360 = vtanh.f32 %v784_v57  ;;  %v3445_v57 = vld [vmem:[#allocation7 + $0x80] ss:$12 sps:$4 sm:$0xff]  }
 0x56a   :  { %v3361_v60 = vpop.eup %3360 }
 0x56b   :  { %v786_v62 = vsub.f32 %v3999_v32, %v3361_v60 }
 0x56d   :  { %v787_v63 = vmul.f32 %v786_v62, %v781_v61  ;;  %v3449_v61 = vld [vmem:[#allocation7 + $0xa8] ss:$12 sps:$4 sm:$0xff]   ;;  %v3262_v62 = vld [vmem:[#allocation9 + $0x4] ss:$12 sps:$4 sm:$0xff]  }
 0x56f   :  { %v4040_v26 = vadd.f32 %v3361_v60, %v787_v63  ;;  %v3448_v60 = vld [vmem:[#allocation7 + $0xac] ss:$12 sps:$4 sm:$0xff]   ;;  %v3263_v63 = vld [vmem:[#allocation9 + $0x8] ss:$12 sps:$4 sm:$0xff]  }
 0x571   :  { %v795_v27 = vpack.c.bf16 %v4040_v26, %v4040_v26 }
 0x573   :  { %829 = vmatmul.mubr.bf16.vlgmr.msra.gmra.mrb[20].mxu0 %v795_v27  ;;  %2966 = vmatmul.mubr.bf16.vlgmr.msra.gmra.mrb[20].mxu1 %v795_v27  ;;  %v897_v27 = vld [vmem:[#allocation4 + $0x90] sm:$0xff] }
 0x574   :  { %902 = vmatpush1.bf16.msra.mxu0 %v3754_v3  ;;  %2970 = vmatpush3.bf16.msra.mxu1 %v3765_v7  ;;  %v3428_v3 = vld [vmem:[#allocation7 + $0x4] ss:$12 sps:$4 sm:$0xff]  }
 0x575   :  { %903 = vmatprep.subr.bf16.mxu0 %v3757_v4  ;;  %2971 = vmatprep.subr.bf16.mxu1 %v4609_v0  ;;  %v792_v4 = vld [vmem:[#allocation4 + $0x78] sm:$0xff] }
 0x576   :  { %933 = vmatprep.mubr.bf16.mxu0 %v4607_v1  ;;  %2985 = vmatprep.mubr.msk.bf16.mxu1 %vm3627_vm0, %v4609_v0 }
 0x578   :  { %904 = vmatpush1.bf16.msra.mxu0 %v3760_v5  ;;  %2972 = vmatpush3.bf16.msra.mxu1 %v3774_v10 }
 0x579   :  { %905 = vmatprep.subr.bf16.mxu0 %v3763_v6  ;;  %2973 = vmatprep.subr.bf16.mxu1 %v4609_v0 }
 0x57c   :  { %906 = vmatpush1.bf16.msra.mxu0 %v3768_v8  ;;  %2974 = vmatpush3.bf16.msra.mxu1 %v3784_v13 }
 0x57d   :  { %907 = vmatprep.subr.bf16.mxu0 %v3770_v9  ;;  %2975 = vmatprep.subr.bf16.mxu1 %v4609_v0 }
 0x580   :  { %908 = vmatpush1.bf16.msra.mxu0 %v3777_v11  ;;  %2976 = vmatpush3.bf16.msra.mxu1 %v3794_v16 }
 0x581   :  { %909 = vmatprep.subr.bf16.mxu0 %v3780_v12  ;;  %2977 = vmatprep.subr.bf16.mxu1 %v4609_v0 }
 0x584   :  { %910 = vmatpush1.bf16.msra.mxu0 %v3787_v14  ;;  %2978 = vmatpush3.bf16.msra.mxu1 %v3801_v19 }
 0x585   :  { %911 = vmatprep.subr.bf16.mxu0 %v3790_v15  ;;  %2979 = vmatprep.subr.bf16.mxu1 %v4609_v0  ;;  %v793_v15 = vld [vmem:[#allocation4 + $0x80] sm:$0xff] }
 0x588   :  { %912 = vmatpush1.bf16.msra.mxu0 %v3796_v17  ;;  %2980 = vmatpush3.bf16.msra.mxu1 %v3811_v22  ;;  %v794_v22 = vld [vmem:[#allocation4 + $0x88] sm:$0xff] }
 0x589   :  { %913 = vmatprep.subr.bf16.mxu0 %v3799_v18  ;;  %2981 = vmatprep.subr.bf16.mxu1 %v4609_v0 }
 0x58c   :  { %914 = vmatpush1.bf16.msra.mxu0 %v3806_v20  ;;  %2982 = vmatpush3.bf16.msra.mxu1 %v3819_v24 }
 0x58d   :  { %915 = vmatprep.subr.bf16.mxu0 %v3809_v21  ;;  %2983 = vmatprep.subr.bf16.mxu1 %v4609_v0 }
 0x590   :  { %916 = vmatpush1.bf16.msra.mxu0 %v3816_v23  ;;  %2984 = vmatpush3.bf16.msra.mxu1 %v3825_v25 }
 0x591   :  { %1006 = vmatprep.subr.bf16.mxu0 %v3428_v3  ;;  %2989 = vmatprep.subr.bf16.mxu1 %v4609_v0 }
 0x646   :  { %v830_v5 = vpop.f32.mrb[20].mxu0  ;;  %v871_v6 = vpop.f32.mrb[20].mxu1 }
 0x647   :  { %v877_v7 = vadd.f32 %v830_v5, %v792_v4  ;;  %v832_v8 = vpop.f32.mrb[21].mxu0  ;;  %v2967_v9 = vpop.f32.mrb[21].mxu1  ;;  %v887_v21 = vadd.f32 %v3873_v39, %v871_v6 }
 0x648   :  { %v834_v10 = vpop.f32.mrb[22].mxu0  ;;  %v874_v11 = vpop.f32.mrb[22].mxu1  ;;  %v882_v16 = vadd.f32 %v832_v8, %v793_v15 }
 0x649   :  { %v878_v12 = vmul.f32 0.5, %v877_v7  ;;  %v835_v13 = vpop.f32.mrb[23].mxu0  ;;  %v2968_v14 = vpop.f32.mrb[23].mxu1 }
 0x64a   :  { %v883_v17 = vmul.f32 0.5, %v882_v16 }
 0x64b   :  { %3362 = vtanh.f32 %v878_v12  ;;  %v898_v12 = vld [vmem:[#allocation4 + $0x98] sm:$0xff] }
 0x64c   :  { %3364 = vtanh.f32 %v883_v17 }
 0x655   :  { %v3363_v18 = vpop.eup %3362 }
 0x656   :  { %v880_v19 = vmul.f32 0.5, %v3363_v18  ;;  %v3365_v29 = vpop.eup %3364  ;;  %v899_v18 = vld [vmem:[#allocation4 + $0xa0] sm:$0xff] }
 0x657   :  { %v885_v30 = vmul.f32 0.5, %v3365_v29 }
 0x658   :  { %v881_v20 = vadd.f32 0.5, %v880_v19 }
 0x659   :  { %v886_v33 = vadd.f32 0.5, %v885_v30 }
 0x65a   :  { %v888_v23 = vmul.f32 %v887_v21, %v881_v20 }
 0x65c   :  { %v889_v28 = vadd.f32 %v888_v23, %v794_v22 }
 0x65e   :  { %3366 = vtanh.f32 %v889_v28 }
 0x668   :  { %v3367_v31 = vpop.eup %3366 }
 0x669   :  { %v891_v34 = vsub.f32 %v4040_v26, %v3367_v31 }
 0x66b   :  { %v892_v35 = vmul.f32 %v891_v34, %v886_v33  ;;  %v3260_v33 = vld [vmem:[#allocation9] ss:$12 sps:$4 sm:$0xff]  }
 0x66d   :  { %v4080_v36 = vadd.f32 %v3367_v31, %v892_v35  ;;  %v3266_v35 = vld [vmem:[#allocation9 + $0x1c] ss:$12 sps:$4 sm:$0xff]  }
 0x66f   :  { %v900_v37 = vpack.c.bf16 %v4080_v36, %v4080_v36 }
 0x671   :  { %934 = vmatmul.mubr.bf16.vlgmr.msra.gmra.mrb[24].mxu0 %v900_v37  ;;  %2986 = vmatmul.mubr.bf16.vlgmr.msra.gmra.mrb[24].mxu1 %v900_v37  ;;  %v1180_v37 = vpack.c.bf16 %v3917_v46, %v3876_v54  ;;  %v3272_v54 = vld [vmem:[#allocation9 + $0x48] ss:$12 sps:$4 sm:$0xff]   ;;  %v3278_v46 = vld [vmem:[#allocation9 + $0x64] ss:$12 sps:$4 sm:$0xff]  }
 0x672   :  { %1007 = vmatpush1.bf16.msra.mxu0 %v3429_v40  ;;  %2990 = vmatpush3.bf16.msra.mxu1 %v3430_v41  ;;  %v3264_v40 = vld [vmem:[#allocation9 + $0x18] ss:$12 sps:$4 sm:$0xff]   ;;  %v3270_v41 = vld [vmem:[#allocation9 + $0x34] ss:$12 sps:$4 sm:$0xff]  }
 0x673   :  { %1008 = vmatprep.subr.bf16.mxu0 %v3431_v42  ;;  %2991 = vmatprep.subr.bf16.mxu1 %v4609_v0  ;;  %v3271_v42 = vld [vmem:[#allocation9 + $0x38] ss:$12 sps:$4 sm:$0xff]  }
 0x674   :  { %1038 = vmatprep.mubr.bf16.mxu0 %v4607_v1  ;;  %3005 = vmatprep.mubr.msk.bf16.mxu1 %vm3627_vm0, %v4609_v0 }
 0x676   :  { %1009 = vmatpush1.bf16.msra.mxu0 %v3432_v43  ;;  %2992 = vmatpush3.bf16.msra.mxu1 %v3433_v44  ;;  %v3268_v43 = vld [vmem:[#allocation9 + $0x30] ss:$12 sps:$4 sm:$0xff]   ;;  %v3274_v44 = vld [vmem:[#allocation9 + $0x4c] ss:$12 sps:$4 sm:$0xff]  }
 0x677   :  { %1010 = vmatprep.subr.bf16.mxu0 %v3434_v45  ;;  %2993 = vmatprep.subr.bf16.mxu1 %v4609_v0  ;;  %v3275_v45 = vld [vmem:[#allocation9 + $0x50] ss:$12 sps:$4 sm:$0xff]  }
 0x67a   :  { %1011 = vmatpush1.bf16.msra.mxu0 %v3435_v47  ;;  %2994 = vmatpush3.bf16.msra.mxu1 %v3436_v48  ;;  %v3279_v47 = vld [vmem:[#allocation9 + $0x68] ss:$12 sps:$4 sm:$0xff]   ;;  %v3276_v48 = vld [vmem:[#allocation9 + $0x60] ss:$12 sps:$4 sm:$0xff]  }
 0x67b   :  { %1012 = vmatprep.subr.bf16.mxu0 %v3437_v49  ;;  %2995 = vmatprep.subr.bf16.mxu1 %v4609_v0  ;;  %v3282_v49 = vld [vmem:[#allocation9 + $0x7c] ss:$12 sps:$4 sm:$0xff]  }
 0x67e   :  { %1013 = vmatpush1.bf16.msra.mxu0 %v3438_v50  ;;  %2996 = vmatpush3.bf16.msra.mxu1 %v3439_v51  ;;  %v3283_v50 = vld [vmem:[#allocation9 + $0x80] ss:$12 sps:$4 sm:$0xff]   ;;  %v3280_v51 = vld [vmem:[#allocation9 + $0x78] ss:$12 sps:$4 sm:$0xff]  }
 0x67f   :  { %1014 = vmatprep.subr.bf16.mxu0 %v3440_v52  ;;  %2997 = vmatprep.subr.bf16.mxu1 %v4609_v0  ;;  %v3286_v52 = vld [vmem:[#allocation9 + $0x94] ss:$12 sps:$4 sm:$0xff]  }
 0x682   :  { %1015 = vmatpush1.bf16.msra.mxu0 %v3441_v2  ;;  %2998 = vmatpush3.bf16.msra.mxu1 %v3442_v53  ;;  %v3287_v2 = vld [vmem:[#allocation9 + $0x98] ss:$12 sps:$4 sm:$0xff]   ;;  %v3284_v53 = vld [vmem:[#allocation9 + $0x90] ss:$12 sps:$4 sm:$0xff]  }
 0x683   :  { %1016 = vmatprep.subr.bf16.mxu0 %v3443_v55  ;;  %2999 = vmatprep.subr.bf16.mxu1 %v4609_v0  ;;  %v3290_v55 = vld [vmem:[#allocation9 + $0xac] ss:$12 sps:$4 sm:$0xff]  }
 0x686   :  { %1017 = vmatpush1.bf16.msra.mxu0 %v3444_v56  ;;  %3000 = vmatpush3.bf16.msra.mxu1 %v3445_v57  ;;  %v3291_v56 = vld [vmem:[#allocation9 + $0xb0] ss:$12 sps:$4 sm:$0xff]   ;;  %v3288_v57 = vld [vmem:[#allocation9 + $0xa8] ss:$12 sps:$4 sm:$0xff]  }
 0x687   :  { %1018 = vmatprep.subr.bf16.mxu0 %v3446_v58  ;;  %3001 = vmatprep.subr.bf16.mxu1 %v4609_v0  ;;  %v1181_v58 = vpack.c.bf16 %v3999_v32, %v3958_v38  ;;  %v4119_v38 = vld [vmem:[#allocation10 + $0x1c] ss:$12 sps:$4 sm:$0xff]   ;;  %v4121_v32 = vld [vmem:[#allocation10 + $0x18] ss:$12 sps:$4 sm:$0xff]  }
 0x68a   :  { %1019 = vmatpush1.bf16.msra.mxu0 %v3447_v59  ;;  %3002 = vmatpush3.bf16.msra.mxu1 %v3819_v24  ;;  %v1182_v59 = vpack.c.bf16 %v4080_v36, %v4040_v26  ;;  %v4125_v26 = vld [vmem:[#allocation10 + $0x34] ss:$12 sps:$4 sm:$0xff]  }
 0x68b   :  { %1020 = vmatprep.subr.bf16.mxu0 %v3448_v60  ;;  %3003 = vmatprep.subr.bf16.mxu1 %v4609_v0  ;;  %v4113_v60 = vld [vmem:[#allocation10 + $0x4] ss:$12 sps:$4 sm:$0xff]  }
 0x68e   :  { %1021 = vmatpush1.bf16.msra.mxu0 %v3449_v61  ;;  %3004 = vmatpush3.bf16.msra.mxu1 %v3825_v25  ;;  %v4115_v61 = vld [vmem:[#allocation10] ss:$12 sps:$4 sm:$0xff]  }
 0x68f   :  { %1328 = vmatprep.subr.bf16.mxu0 %v3262_v62  ;;  %3009 = vmatprep.subr.bf16.mxu1 %v3263_v63  ;;  %v4131_v62 = vld [vmem:[#allocation10 + $0x4c] ss:$12 sps:$4 sm:$0xff]  }
 0x744   :  { %v935_v3 = vpop.f32.mrb[24].mxu0  ;;  %v976_v4 = vpop.f32.mrb[24].mxu1 }
 0x745   :  { %v982_v5 = vadd.f32 %v935_v3, %v897_v27  ;;  %v937_v6 = vpop.f32.mrb[25].mxu0  ;;  %v2987_v7 = vpop.f32.mrb[25].mxu1  ;;  %v992_v17 = vadd.f32 %v3873_v39, %v976_v4  ;;  %v3267_v39 = vld [vmem:[#allocation9 + $0x20] ss:$12 sps:$4 sm:$0xff]   ;;  %v4137_v27 = vld [vmem:[#allocation10 + $0x8] ss:$12 sps:$4 sm:$0xff]  }
 0x746   :  { %v939_v8 = vpop.f32.mrb[26].mxu0  ;;  %v979_v24 = vpop.f32.mrb[26].mxu1  ;;  %v987_v13 = vadd.f32 %v937_v6, %v898_v12  ;;  %v4139_v3 = vld [vmem:[#allocation10 + $0x64] ss:$12 sps:$4 sm:$0xff]   ;;  %v4142_v4 = vld [vmem:[#allocation10 + $0x60] ss:$12 sps:$4 sm:$0xff]  }
 0x747   :  { %v983_v9 = vmul.f32 0.5, %v982_v5  ;;  %v940_v10 = vpop.f32.mrb[27].mxu0  ;;  %v2988_v11 = vpop.f32.mrb[27].mxu1  ;;  %v4147_v5 = vld [vmem:[#allocation10 + $0x7c] ss:$12 sps:$4 sm:$0xff]  }
 0x748   :  { %v988_v14 = vmul.f32 0.5, %v987_v13  ;;  %v4149_v6 = vld [vmem:[#allocation10 + $0x20] ss:$12 sps:$4 sm:$0xff]   ;;  %v4153_v7 = vld [vmem:[#allocation10 + $0x78] ss:$12 sps:$4 sm:$0xff]  }
 0x749   :  { %3368 = vtanh.f32 %v983_v9  ;;  %v4157_v8 = vld [vmem:[#allocation10 + $0x38] ss:$12 sps:$4 sm:$0xff]   ;;  %v4159_v24 = vld [vmem:[#allocation10 + $0x94] ss:$12 sps:$4 sm:$0xff]   ;;  %v4162_v9 = vld [vmem:[#allocation10 + $0x90] ss:$12 sps:$4 sm:$0xff]  }
 0x74a   :  { %3370 = vtanh.f32 %v988_v14  ;;  %v4166_v10 = vld [vmem:[#allocation10 + $0xac] ss:$12 sps:$4 sm:$0xff]   ;;  %v4168_v11 = vld [vmem:[#allocation10 + $0x50] ss:$12 sps:$4 sm:$0xff]   ;;  %v4173_v12 = vld [vmem:[#allocation10 + $0xa8] ss:$12 sps:$4 sm:$0xff]  }
 0x74b   :  { %v4177_v13 = vld [vmem:[#allocation10 + $0x68] ss:$12 sps:$4 sm:$0xff]   ;;  %v4182_v14 = vld [vmem:[#allocation10 + $0x80] ss:$12 sps:$4 sm:$0xff]  }
 0x753   :  { %v3369_v25 = vpop.eup %3368 }
 0x754   :  { %v985_v15 = vmul.f32 0.5, %v3369_v25  ;;  %v3371_v21 = vpop.eup %3370  ;;  %v4185_v25 = vld [vmem:[#allocation10 + $0x98] ss:$12 sps:$4 sm:$0xff]  }
 0x755   :  { %v990_v22 = vmul.f32 0.5, %v3371_v21 }
 0x756   :  { %v986_v16 = vadd.f32 0.5, %v985_v15  ;;  %v4189_v15 = vld [vmem:[#allocation10 + $0xb0] ss:$12 sps:$4 sm:$0xff]  }
 0x757   :  { %v991_v28 = vadd.f32 0.5, %v990_v22 }
 0x758   :  { %v993_v19 = vmul.f32 %v992_v17, %v986_v16  ;;  %v1002_v16 = vld [vmem:[#allocation4 + $0xa8] sm:$0xff] }
 0x75a   :  { %v994_v20 = vadd.f32 %v993_v19, %v899_v18 }
 0x75c   :  { %3372 = vtanh.f32 %v994_v20 }
 0x766   :  { %v3373_v23 = vpop.eup %3372 }
 0x767   :  { %v996_v29 = vsub.f32 %v4080_v36, %v3373_v23  ;;  %v4127_v36 = vld [vmem:[#allocation10 + $0x30] ss:$12 sps:$4 sm:$0xff]  }
 0x769   :  { %v997_v30 = vmul.f32 %v996_v29, %v991_v28 }
 0x76b   :  { %v4098_v31 = vadd.f32 %v3373_v23, %v997_v30 }
 0x76d   :  { %v1005_v34 = vpack.c.bf16 %v4098_v31, %v4098_v31 }
 0x76f   :  { %1039 = vmatmul.mubr.bf16.vlgmr.msra.gmra.mrb[28].mxu0 %v1005_v34  ;;  %3006 = vmatmul.mubr.bf16.vlgmr.msra.gmra.mrb[28].mxu1 %v1005_v34 }
 0x770   :  { %1329 = vmatpush1.bf16.msra.mxu0 %v3260_v33  ;;  %3010 = vmatpush3.bf16.msra.mxu1 %v3263_v63  ;;  %v4133_v63 = vld [vmem:[#allocation10 + $0x48] ss:$12 sps:$4 sm:$0xff]  }
 0x771   :  { %3025 = vmatprep.mubr.bf16.mxu1 %v1180_v37  ;;  %1330 = vmatprep.subr.bf16.mxu0 %v3266_v35  ;;  %v1003_v33 = vld [vmem:[#allocation4 + $0xb0] sm:$0xff] }
 0x772   :  { %3011 = vmatprep.subr.bf16.mxu1 %v3267_v39  ;;  %1360 = vmatprep.mubr.bf16.mxu0 %v4607_v1 }
 0x774   :  { %1331 = vmatpush1.bf16.msra.mxu0 %v3264_v40  ;;  %3012 = vmatpush3.bf16.msra.mxu1 %v3267_v39 }
 0x775   :  { %1332 = vmatprep.subr.bf16.mxu0 %v3270_v41  ;;  %3013 = vmatprep.subr.bf16.mxu1 %v3271_v42  ;;  %v3450_v41 = vld [vmem:[%s4599_s2] ss:$0 sm:$0xff] }
 0x778   :  { %1333 = vmatpush1.bf16.msra.mxu0 %v3268_v43  ;;  %3014 = vmatpush3.bf16.msra.mxu1 %v3271_v42  ;;  %v1004_v43 = vld [vmem:[#allocation4 + $0xb8] sm:$0xff] }
 0x779   :  { %1334 = vmatprep.subr.bf16.mxu0 %v3274_v44  ;;  %3015 = vmatprep.subr.bf16.mxu1 %v3275_v45 }
 0x77c   :  { %1335 = vmatpush1.bf16.msra.mxu0 %v3272_v54  ;;  %3016 = vmatpush3.bf16.msra.mxu1 %v3275_v45 }
 0x77d   :  { %1336 = vmatprep.subr.bf16.mxu0 %v3278_v46  ;;  %3017 = vmatprep.subr.bf16.mxu1 %v3279_v47 }
 0x780   :  { %1337 = vmatpush1.bf16.msra.mxu0 %v3276_v48  ;;  %3018 = vmatpush3.bf16.msra.mxu1 %v3279_v47 }
 0x781   :  { %1338 = vmatprep.subr.bf16.mxu0 %v3282_v49  ;;  %3019 = vmatprep.subr.bf16.mxu1 %v3283_v50 }
 0x784   :  { %1339 = vmatpush1.bf16.msra.mxu0 %v3280_v51  ;;  %3020 = vmatpush3.bf16.msra.mxu1 %v3283_v50 }
 0x785   :  { %1340 = vmatprep.subr.bf16.mxu0 %v3286_v52  ;;  %3021 = vmatprep.subr.bf16.mxu1 %v3287_v2 }
 0x788   :  { %1341 = vmatpush1.bf16.msra.mxu0 %v3284_v53  ;;  %3022 = vmatpush3.bf16.msra.mxu1 %v3287_v2 }
 0x789   :  { %1342 = vmatprep.subr.bf16.mxu0 %v3290_v55  ;;  %3023 = vmatprep.subr.bf16.mxu1 %v3291_v56 }
 0x78c   :  { %1343 = vmatpush1.bf16.msra.mxu0 %v3288_v57  ;;  %3024 = vmatpush3.bf16.msra.mxu1 %v3291_v56 }
 0x78d   :  { %3033 = vmatprep.subr.bf16.mxu1 %v4609_v0  ;;  %1624 = vmatprep.subr.bf16.mxu0 %v4113_v60 }
 0x78f   :  { %1361 = vmatmul.mubr.bf16.vlgmr.msra.gmra.mrb[32].mxu0 %v1180_v37  ;;  %3026 = vmatmul.mubr.bf16.vlgmr.msra.gmra.mrb[32].mxu1 %v1181_v58 }
 0x790   :  { %3029 = vmatprep.mubr.bf16.mxu1 %v1182_v59  ;;  %1370 = vmatprep.mubr.bf16.mxu0 %v4607_v1 }
 0x791   :  { %1625 = vmatpush1.bf16.msra.mxu0 %v4115_v61  ;;  %3034 = vmatpush3.bf16.msra.mxu1 %v4137_v27 }
 0x792   :  { %1626 = vmatprep.subr.bf16.mxu0 %v4119_v38  ;;  %3035 = vmatprep.subr.bf16.mxu1 %v4609_v0 }
 0x795   :  { %1627 = vmatpush1.bf16.msra.mxu0 %v4121_v32  ;;  %3036 = vmatpush3.bf16.msra.mxu1 %v4149_v6 }
 0x796   :  { %1628 = vmatprep.subr.bf16.mxu0 %v4125_v26  ;;  %3037 = vmatprep.subr.bf16.mxu1 %v4609_v0 }
 0x797   :  { %1371 = vmatmul.mubr.bf16.gmra.mrb[36].mxu0 %v1181_v58 }
 0x798   :  { %1380 = vmatprep.mubr.bf16.mxu0 %v4607_v1 }
 0x799   :  { %1629 = vmatpush1.bf16.msra.mxu0 %v4127_v36  ;;  %3038 = vmatpush3.bf16.msra.mxu1 %v4157_v8 }
 0x79a   :  { %1630 = vmatprep.subr.bf16.mxu0 %v4131_v62  ;;  %3039 = vmatprep.subr.bf16.mxu1 %v4609_v0 }
 0x79d   :  { %1631 = vmatpush1.bf16.msra.mxu0 %v4133_v63  ;;  %3040 = vmatpush3.bf16.msra.mxu1 %v4168_v11 }
 0x79e   :  { %1632 = vmatprep.subr.bf16.mxu0 %v4139_v3  ;;  %3041 = vmatprep.subr.bf16.mxu1 %v4609_v0 }
 0x79f   :  { %1381 = vmatmul.mubr.bf16.gmra.mrb[40].mxu0 %v1182_v59 }
 0x7a0   :  { %1390 = vmatprep.mubr.bf16.mxu0 %v4607_v1 }
 0x7a1   :  { %1633 = vmatpush1.bf16.msra.mxu0 %v4142_v4  ;;  %3042 = vmatpush3.bf16.msra.mxu1 %v4177_v13 }
 0x7a2   :  { %1634 = vmatprep.subr.bf16.mxu0 %v4147_v5  ;;  %3043 = vmatprep.subr.bf16.mxu1 %v4609_v0 }
 0x7a5   :  { %1635 = vmatpush1.bf16.msra.mxu0 %v4153_v7  ;;  %3044 = vmatpush3.bf16.msra.mxu1 %v4182_v14 }
 0x7a6   :  { %1636 = vmatprep.subr.bf16.mxu0 %v4159_v24  ;;  %3045 = vmatprep.subr.bf16.mxu1 %v4609_v0 }
 0x7a9   :  { %1637 = vmatpush1.bf16.msra.mxu0 %v4162_v9  ;;  %3046 = vmatpush3.bf16.msra.mxu1 %v4185_v25 }
 0x7aa   :  { %1638 = vmatprep.subr.bf16.mxu0 %v4166_v10  ;;  %3047 = vmatprep.subr.bf16.mxu1 %v4609_v0 }
 0x7ad   :  { %1639 = vmatpush1.bf16.msra.mxu0 %v4173_v12  ;;  %3048 = vmatpush3.bf16.msra.mxu1 %v4189_v15 }
 0x7ae   :  { %1735 = vmatprep.subr.bf16.mxu0 %v4113_v60  ;;  %3053 = vmatprep.subr.bf16.mxu1 %v4609_v0 }
 0x842   :  { %v1040_v17 = vpop.f32.mrb[28].mxu0  ;;  %v1081_v18 = vpop.f32.mrb[28].mxu1 }
 0x843   :  { %v1087_v19 = vadd.f32 %v1040_v17, %v1002_v16  ;;  %v1042_v20 = vpop.f32.mrb[29].mxu0  ;;  %v3007_v21 = vpop.f32.mrb[29].mxu1  ;;  %v1097_v42 = vadd.f32 %v3450_v41, %v1081_v18 }
 0x844   :  { %v1044_v22 = vpop.f32.mrb[30].mxu0  ;;  %v1084_v23 = vpop.f32.mrb[30].mxu1  ;;  %v1092_v34 = vadd.f32 %v1042_v20, %v1003_v33  ;;  %v1171_v33 = vld [vmem:[%s4601_s4] sm:$0x7] }
 0x845   :  { %v1088_v28 = vmul.f32 0.5, %v1087_v19  ;;  %v1045_v29 = vpop.f32.mrb[31].mxu0  ;;  %v3008_v30 = vpop.f32.mrb[31].mxu1 }
 0x846   :  { %v1093_v35 = vmul.f32 0.5, %v1092_v34 }
 0x847   :  { %3374 = vtanh.f32 %v1088_v28 }
 0x848   :  { %3376 = vtanh.f32 %v1093_v35 }
 0x851   :  { %v3375_v39 = vpop.eup %3374 }
 0x852   :  { %v1090_v37 = vmul.f32 0.5, %v3375_v39  ;;  %v3377_v54 = vpop.eup %3376 }
 0x853   :  { %v1095_v46 = vmul.f32 0.5, %v3377_v54 }
 0x854   :  { %v1091_v40 = vadd.f32 0.5, %v1090_v37 }
 0x855   :  { %v1096_v53 = vadd.f32 0.5, %v1095_v46 }
 0x856   :  { %v1098_v44 = vmul.f32 %v1097_v42, %v1091_v40 }
 0x858   :  { %v1099_v45 = vadd.f32 %v1098_v44, %v1004_v43 }
 0x85a   :  { %3378 = vtanh.f32 %v1099_v45 }
 0x862   :  { %v4197_v47 = vpop.f32.mrb[32].mxu0  ;;  %v4199_v48 = vpop.f32.mrb[32].mxu1 }
 0x863   :  { %v4201_v49 = vpop.f32.mrb[33].mxu0  ;;  %v4203_v50 = vpop.f32.mrb[33].mxu1 }
 0x864   :  { %v3379_v51 = vpop.eup %3378  ;;  %v4205_v52 = vpop.f32.mrb[34].mxu0 }
 0x865   :  { %v4207_v2 = vpop.f32.mrb[34].mxu1  ;;  %v1101_v55 = vsub.f32 %v4098_v31, %v3379_v51  ;;  %v4210_v56 = vpop.f32.mrb[35].mxu0 }
 0x866   :  { %v4212_v57 = vpop.f32.mrb[35].mxu1 }
 0x867   :  { %v1102_v58 = vmul.f32 %v1101_v55, %v1096_v53 }
 0x869   :  { %v1103_v59 = vadd.f32 %v3379_v51, %v1102_v58 }
 0x86a   :  { %v4214_v16 = vpop.f32.mrb[36].mxu0 }
 0x86b   :  { %v4216_v17 = vpop.f32.mrb[37].mxu0  ;;  %v1183_v18 = vpack.c.bf16 %v1103_v59, %v4098_v31  ;;  %v1185_v31 = vlaneseq }
 0x86c   :  { %v4219_v19 = vpop.f32.mrb[38].mxu0 }
 0x86d   :  { %v4221_v20 = vpop.f32.mrb[39].mxu0  ;;  %1391 = vmatmul.mubr.bf16.gmra.mrb[44].mxu0 %v1183_v18  ;;  %3030 = vmatmul.mubr.bf16.gmra.mrb[36].mxu1 %v1183_v18  ;;  %v1186_v29 = vshrl.u32 %v1185_v31, 7 }
 0x86e   :  { %1656 = vmatprep.mubr.bf16.mxu0 %v4607_v1  ;;  %3049 = vmatprep.mubr.msk.bf16.mxu1 %vm3627_vm0, %v4609_v0 }
 0x86f   :  { %v1187_v30 = vsub.s32 0, %v1186_v29  ;;  %v1191_v34 = vsub.s32 1, %v1186_v29 }
 0x871   :  { %v4286_v43 = vrot.slane %v1171_v33, %v1187_v30  ;;  %v4292_v54 = vrot.slane %v1171_v33, %v1191_v34  ;;  %v1195_v34 = vsub.s32 2, %v1186_v29 }
 0x872   :  { %v4226_v21 = vpop.f32.mrb[40].mxu0 }
 0x873   :  { %v4228_v22 = vpop.f32.mrb[41].mxu0  ;;  %v1363_v46 = vadd.f32 %v4197_v47, %v4286_v43  ;;  %v1365_v51 = vadd.f32 %v4201_v49, %v4292_v54  ;;  %v4301_v47 = vld [vmem:[%s4603_s6] ss:$0 sm:$0xff] }
 0x874   :  { %v4230_v23 = vpop.f32.mrb[42].mxu0 }
 0x875   :  { %v4232_v28 = vpop.f32.mrb[43].mxu0  ;;  %1657 = vmatmul.mubr.bf16.vlgmr.msra.gmra.mrb[48].mxu0 %v4607_v1  ;;  %3050 = vmatmul.mubr.bf16.vlgmr.msra.gmra.mrb[40].mxu1 %v4607_v1 }
 0x876   :  { %1736 = vmatpush1.bf16.msra.mxu0 %v4115_v61  ;;  %3054 = vmatpush3.bf16.msra.mxu1 %v4137_v27 }
 0x877   :  { %1737 = vmatprep.subr.bf16.mxu0 %v4119_v38  ;;  %3055 = vmatprep.subr.bf16.mxu1 %v4609_v0 }
 0x878   :  { %1767 = vmatprep.mubr.bf16.mxu0 %v4607_v1  ;;  %3069 = vmatprep.mubr.msk.bf16.mxu1 %vm3627_vm0, %v4609_v0 }
 0x87a   :  { %1738 = vmatpush1.bf16.msra.mxu0 %v4121_v32  ;;  %3056 = vmatpush3.bf16.msra.mxu1 %v4149_v6 }
 0x87b   :  { %1739 = vmatprep.subr.bf16.mxu0 %v4125_v26  ;;  %3057 = vmatprep.subr.bf16.mxu1 %v4609_v0 }
 0x87e   :  { %1740 = vmatpush1.bf16.msra.mxu0 %v4127_v36  ;;  %3058 = vmatpush3.bf16.msra.mxu1 %v4157_v8 }
 0x87f   :  { %1741 = vmatprep.subr.bf16.mxu0 %v4131_v62  ;;  %3059 = vmatprep.subr.bf16.mxu1 %v4609_v0 }
 0x882   :  { %1742 = vmatpush1.bf16.msra.mxu0 %v4133_v63  ;;  %3060 = vmatpush3.bf16.msra.mxu1 %v4168_v11 }
 0x883   :  { %1743 = vmatprep.subr.bf16.mxu0 %v4139_v3  ;;  %3061 = vmatprep.subr.bf16.mxu1 %v4609_v0 }
 0x886   :  { %1744 = vmatpush1.bf16.msra.mxu0 %v4142_v4  ;;  %3062 = vmatpush3.bf16.msra.mxu1 %v4177_v13 }
 0x887   :  { %1745 = vmatprep.subr.bf16.mxu0 %v4147_v5  ;;  %3063 = vmatprep.subr.bf16.mxu1 %v4609_v0 }
 0x88a   :  { %1746 = vmatpush1.bf16.msra.mxu0 %v4153_v7  ;;  %3064 = vmatpush3.bf16.msra.mxu1 %v4182_v14 }
 0x88b   :  { %1747 = vmatprep.subr.bf16.mxu0 %v4159_v24  ;;  %3065 = vmatprep.subr.bf16.mxu1 %v4609_v0 }
 0x88e   :  { %1748 = vmatpush1.bf16.msra.mxu0 %v4162_v9  ;;  %3066 = vmatpush3.bf16.msra.mxu1 %v4185_v25 }
 0x88f   :  { %1749 = vmatprep.subr.bf16.mxu0 %v4166_v10  ;;  %3067 = vmatprep.subr.bf16.mxu1 %v4609_v0 }
 0x892   :  { %1750 = vmatpush1.bf16.msra.mxu0 %v4173_v12  ;;  %3068 = vmatpush3.bf16.msra.mxu1 %v4189_v15 }
 0x893   :  { %1840 = vmatprep.subr.bf16.mxu0 %v4113_v60  ;;  %3073 = vmatprep.subr.bf16.mxu1 %v4609_v0 }
 0x940   :  { %v4274_v35 = vpop.f32.mrb[44].mxu0  ;;  %v4276_v39 = vpop.f32.mrb[36].mxu1 }
 0x941   :  { %4611 = vst [vmem:[#allocation18_spill] sm:$0xff] %v4276_v39  ;;  %v4278_v37 = vpop.f32.mrb[45].mxu0  ;;  %v4280_v40 = vpop.f32.mrb[37].mxu1  ;;  %v4303_v39 = vrot.slane %v1171_v33, %v1195_v34  ;;  %v1369_v34 = vadd.f32 %v4210_v56, %v4292_v54 }
 0x942   :  { %4612 = vst [vmem:[#allocation19_spill] sm:$0xff] %v4278_v37  ;;  %v4282_v41 = vpop.f32.mrb[46].mxu0  ;;  %v4284_v42 = vpop.f32.mrb[38].mxu1 }
 0x943   :  { %4613 = vst [vmem:[#allocation20_spill] sm:$0xff] %v4282_v41  ;;  %4614 = vst [vmem:[#allocation21_spill] sm:$0xff] %v4284_v42  ;;  %v4288_v44 = vpop.f32.mrb[47].mxu0  ;;  %v4290_v45 = vpop.f32.mrb[39].mxu1  ;;  %v1439_v56 = vadd.f32 %v4212_v57, %v4303_v39  ;;  %v1373_v57 = vadd.f32 %v4214_v16, %v4286_v43 }
 0x944   :  { %4615 = vst [vmem:[#allocation22_spill] sm:$0xff] %v4288_v44 }
 0x948   :  { %v1658_v53 = vpop.f32.mrb[48].mxu0  ;;  %v1699_v55 = vpop.f32.mrb[40].mxu1 }
 0x949   :  { %v1705_v58 = vadd.f32 %v1658_v53, %v1363_v46  ;;  %v1660_v59 = vpop.f32.mrb[49].mxu0  ;;  %v3051_v18 = vpop.f32.mrb[41].mxu1  ;;  %v1721_v53 = vadd.f32 %v4301_v47, %v1699_v55  ;;  %v1367_v55 = vadd.f32 %v4205_v52, %v4286_v43 }
 0x94a   :  { %v1710_v31 = vadd.f32 %v1660_v59, %v1365_v51  ;;  %v1662_v30 = vpop.f32.mrb[50].mxu0  ;;  %v1702_v1 = vpop.f32.mrb[42].mxu1 }
 0x94b   :  { %v1706_v0 = vmul.f32 0.5, %v1705_v58  ;;  %v1663_v42 = vpop.f32.mrb[51].mxu0  ;;  %v3052_v44 = vpop.f32.mrb[43].mxu1  ;;  %v1436_v1 = vadd.f32 %v4203_v50, %v4303_v39  ;;  %v4616_v50 = vmov 0.0  }
 0x94c   :  { %v1711_v41 = vmul.f32 0.5, %v1710_v31 }
 0x94d   :  { %3380 = vtanh.f32 %v1706_v0 }
 0x94e   :  { %3382 = vtanh.f32 %v1711_v41  ;;  %v4617_v41 = vmov 0  }
 0x957   :  { %v3381_v49 = vpop.eup %3380 }
 0x958   :  { %v1708_v46 = vmul.f32 0.5, %v3381_v49  ;;  %v3383_v29 = vpop.eup %3382 }
 0x959   :  { %v1713_v44 = vmul.f32 0.5, %v3383_v29 }
 0x95a   :  { %v1709_v51 = vadd.f32 0.5, %v1708_v46 }
 0x95b   :  { %v1714_v59 = vadd.f32 0.5, %v1713_v44 }
 0x95c   :  { %v1722_v42 = vmul.f32 %v1721_v53, %v1709_v51 }
 0x95e   :  { %v1723_v0 = vadd.f32 %v1722_v42, %v1436_v1 }
 0x960   :  { %3384 = vtanh.f32 %v1723_v0 }
 0x96a   :  { %v3385_v58 = vpop.eup %3384 }
 0x96b   :  { %v1725_v18 = vsub.f32 0.0, %v3385_v58 }
 0x96d   :  { %v1726_v31 = vmul.f32 %v1725_v18, %v1714_v59 }
 0x96f   :  { %v4308_v30 = vadd.f32 %v3385_v58, %v1726_v31 }
 0x971   :  { %v1734_v33 = vpack.c.bf16 %v4308_v30, %v4308_v30 }
 0x973   :  { %1768 = vmatmul.mubr.bf16.vlgmr.msra.gmra.mrb[52].mxu0 %v1734_v33  ;;  %3070 = vmatmul.mubr.bf16.vlgmr.msra.gmra.mrb[44].mxu1 %v1734_v33 }
 0x974   :  { %1841 = vmatpush1.bf16.msra.mxu0 %v4115_v61  ;;  %3074 = vmatpush3.bf16.msra.mxu1 %v4137_v27 }
 0x975   :  { %1842 = vmatprep.subr.bf16.mxu0 %v4119_v38  ;;  %3075 = vmatprep.subr.bf16.mxu1 %v4616_v50 }
 0x976   :  { %1872 = vmatprep.mubr.bf16.mxu0 %v4617_v41  ;;  %3089 = vmatprep.mubr.msk.bf16.mxu1 %vm3627_vm0, %v4616_v50 }
 0x978   :  { %1843 = vmatpush1.bf16.msra.mxu0 %v4121_v32  ;;  %3076 = vmatpush3.bf16.msra.mxu1 %v4149_v6 }
 0x979   :  { %1844 = vmatprep.subr.bf16.mxu0 %v4125_v26  ;;  %3077 = vmatprep.subr.bf16.mxu1 %v4616_v50 }
 0x97c   :  { %1845 = vmatpush1.bf16.msra.mxu0 %v4127_v36  ;;  %3078 = vmatpush3.bf16.msra.mxu1 %v4157_v8 }
 0x97d   :  { %1846 = vmatprep.subr.bf16.mxu0 %v4131_v62  ;;  %3079 = vmatprep.subr.bf16.mxu1 %v4616_v50 }
 0x980   :  { %1847 = vmatpush1.bf16.msra.mxu0 %v4133_v63  ;;  %3080 = vmatpush3.bf16.msra.mxu1 %v4168_v11 }
 0x981   :  { %1848 = vmatprep.subr.bf16.mxu0 %v4139_v3  ;;  %3081 = vmatprep.subr.bf16.mxu1 %v4616_v50 }
 0x984   :  { %1849 = vmatpush1.bf16.msra.mxu0 %v4142_v4  ;;  %3082 = vmatpush3.bf16.msra.mxu1 %v4177_v13 }
 0x985   :  { %1850 = vmatprep.subr.bf16.mxu0 %v4147_v5  ;;  %3083 = vmatprep.subr.bf16.mxu1 %v4616_v50 }
 0x988   :  { %1851 = vmatpush1.bf16.msra.mxu0 %v4153_v7  ;;  %3084 = vmatpush3.bf16.msra.mxu1 %v4182_v14 }
 0x989   :  { %1852 = vmatprep.subr.bf16.mxu0 %v4159_v24  ;;  %3085 = vmatprep.subr.bf16.mxu1 %v4616_v50 }
 0x98c   :  { %1853 = vmatpush1.bf16.msra.mxu0 %v4162_v9  ;;  %3086 = vmatpush3.bf16.msra.mxu1 %v4185_v25 }
 0x98d   :  { %1854 = vmatprep.subr.bf16.mxu0 %v4166_v10  ;;  %3087 = vmatprep.subr.bf16.mxu1 %v4616_v50 }
 0x990   :  { %1855 = vmatpush1.bf16.msra.mxu0 %v4173_v12  ;;  %3088 = vmatpush3.bf16.msra.mxu1 %v4189_v15 }
 0x991   :  { %1945 = vmatprep.subr.bf16.mxu0 %v4113_v60  ;;  %3093 = vmatprep.subr.bf16.mxu1 %v4616_v50 }
 0xa46   :  { %v1769_v49 = vpop.f32.mrb[52].mxu0  ;;  %v1810_v46 = vpop.f32.mrb[44].mxu1 }
 0xa47   :  { %v1816_v53 = vadd.f32 %v1769_v49, %v1367_v55  ;;  %v1771_v51 = vpop.f32.mrb[53].mxu0  ;;  %v3071_v1 = vpop.f32.mrb[45].mxu1  ;;  %v1826_v52 = vadd.f32 %v4301_v47, %v1810_v46 }
 0xa48   :  { %v1821_v42 = vadd.f32 %v1771_v51, %v1369_v34  ;;  %v1773_v0 = vpop.f32.mrb[54].mxu0  ;;  %v1813_v29 = vpop.f32.mrb[46].mxu1 }
 0xa49   :  { %v1817_v44 = vmul.f32 0.5, %v1816_v53  ;;  %v1774_v58 = vpop.f32.mrb[55].mxu0  ;;  %v3072_v59 = vpop.f32.mrb[47].mxu1 }
 0xa4a   :  { %v1822_v18 = vmul.f32 0.5, %v1821_v42 }
 0xa4b   :  { %3386 = vtanh.f32 %v1817_v44 }
 0xa4c   :  { %3388 = vtanh.f32 %v1822_v18 }
 0xa55   :  { %v3387_v31 = vpop.eup %3386 }
 0xa56   :  { %v1819_v33 = vmul.f32 0.5, %v3387_v31  ;;  %v3389_v34 = vpop.eup %3388 }
 0xa57   :  { %v1824_v51 = vmul.f32 0.5, %v3389_v34 }
 0xa58   :  { %v1820_v37 = vadd.f32 0.5, %v1819_v33 }
 0xa59   :  { %v1825_v53 = vadd.f32 0.5, %v1824_v51 }
 0xa5a   :  { %v1827_v55 = vmul.f32 %v1826_v52, %v1820_v37  ;;  %v1375_v37 = vadd.f32 %v4216_v17, %v4292_v54  ;;  %v1444_v17 = vadd.f32 %v4199_v48, %v4303_v39  ;;  %v1377_v48 = vadd.f32 %v4219_v19, %v4286_v43 }
 0xa5c   :  { %v1828_v49 = vadd.f32 %v1827_v55, %v1439_v56 }
 0xa5e   :  { %3390 = vtanh.f32 %v1828_v49 }
 0xa68   :  { %v3391_v1 = vpop.eup %3390 }
 0xa69   :  { %v1830_v0 = vsub.f32 %v4308_v30, %v3391_v1 }
 0xa6b   :  { %v1831_v29 = vmul.f32 %v1830_v0, %v1825_v53 }
 0xa6d   :  { %v4355_v42 = vadd.f32 %v3391_v1, %v1831_v29 }
 0xa6f   :  { %v1839_v44 = vpack.c.bf16 %v4355_v42, %v4355_v42 }
 0xa71   :  { %1873 = vmatmul.mubr.bf16.vlgmr.msra.gmra.mrb[56].mxu0 %v1839_v44  ;;  %3090 = vmatmul.mubr.bf16.vlgmr.msra.gmra.mrb[48].mxu1 %v1839_v44 }
 0xa72   :  { %1946 = vmatpush1.bf16.msra.mxu0 %v4115_v61  ;;  %3094 = vmatpush3.bf16.msra.mxu1 %v4137_v27 }
 0xa73   :  { %1947 = vmatprep.subr.bf16.mxu0 %v4119_v38  ;;  %3095 = vmatprep.subr.bf16.mxu1 %v4616_v50 }
 0xa74   :  { %1977 = vmatprep.mubr.bf16.mxu0 %v4617_v41  ;;  %3109 = vmatprep.mubr.msk.bf16.mxu1 %vm3627_vm0, %v4616_v50 }
 0xa76   :  { %1948 = vmatpush1.bf16.msra.mxu0 %v4121_v32  ;;  %3096 = vmatpush3.bf16.msra.mxu1 %v4149_v6 }
 0xa77   :  { %1949 = vmatprep.subr.bf16.mxu0 %v4125_v26  ;;  %3097 = vmatprep.subr.bf16.mxu1 %v4616_v50 }
 0xa7a   :  { %1950 = vmatpush1.bf16.msra.mxu0 %v4127_v36  ;;  %3098 = vmatpush3.bf16.msra.mxu1 %v4157_v8 }
 0xa7b   :  { %1951 = vmatprep.subr.bf16.mxu0 %v4131_v62  ;;  %3099 = vmatprep.subr.bf16.mxu1 %v4616_v50 }
 0xa7e   :  { %1952 = vmatpush1.bf16.msra.mxu0 %v4133_v63  ;;  %3100 = vmatpush3.bf16.msra.mxu1 %v4168_v11 }
 0xa7f   :  { %1953 = vmatprep.subr.bf16.mxu0 %v4139_v3  ;;  %3101 = vmatprep.subr.bf16.mxu1 %v4616_v50 }
 0xa82   :  { %1954 = vmatpush1.bf16.msra.mxu0 %v4142_v4  ;;  %3102 = vmatpush3.bf16.msra.mxu1 %v4177_v13 }
 0xa83   :  { %1955 = vmatprep.subr.bf16.mxu0 %v4147_v5  ;;  %3103 = vmatprep.subr.bf16.mxu1 %v4616_v50 }
 0xa86   :  { %1956 = vmatpush1.bf16.msra.mxu0 %v4153_v7  ;;  %3104 = vmatpush3.bf16.msra.mxu1 %v4182_v14 }
 0xa87   :  { %1957 = vmatprep.subr.bf16.mxu0 %v4159_v24  ;;  %3105 = vmatprep.subr.bf16.mxu1 %v4616_v50 }
 0xa8a   :  { %1958 = vmatpush1.bf16.msra.mxu0 %v4162_v9  ;;  %3106 = vmatpush3.bf16.msra.mxu1 %v4185_v25 }
 0xa8b   :  { %1959 = vmatprep.subr.bf16.mxu0 %v4166_v10  ;;  %3107 = vmatprep.subr.bf16.mxu1 %v4616_v50 }
 0xa8e   :  { %1960 = vmatpush1.bf16.msra.mxu0 %v4173_v12  ;;  %3108 = vmatpush3.bf16.msra.mxu1 %v4189_v15 }
 0xa8f   :  { %2050 = vmatprep.subr.bf16.mxu0 %v4113_v60  ;;  %3113 = vmatprep.subr.bf16.mxu1 %v4616_v50 }
 0xb44   :  { %v1874_v30 = vpop.f32.mrb[56].mxu0  ;;  %v1915_v46 = vpop.f32.mrb[48].mxu1 }
 0xb45   :  { %v1921_v58 = vadd.f32 %v1874_v30, %v1373_v57  ;;  %v1876_v59 = vpop.f32.mrb[57].mxu0  ;;  %v3091_v18 = vpop.f32.mrb[49].mxu1  ;;  %v1931_v16 = vadd.f32 %v4301_v47, %v1915_v46 }
 0xb46   :  { %v1926_v31 = vadd.f32 %v1876_v59, %v1375_v37  ;;  %v1878_v33 = vpop.f32.mrb[58].mxu0  ;;  %v1918_v52 = vpop.f32.mrb[50].mxu1 }
 0xb47   :  { %v1922_v56 = vmul.f32 0.5, %v1921_v58  ;;  %v1879_v55 = vpop.f32.mrb[59].mxu0  ;;  %v3092_v49 = vpop.f32.mrb[51].mxu1 }
 0xb48   :  { %v1927_v34 = vmul.f32 0.5, %v1926_v31 }
 0xb49   :  { %3392 = vtanh.f32 %v1922_v56 }
 0xb4a   :  { %3394 = vtanh.f32 %v1927_v34 }
 0xb53   :  { %v3393_v51 = vpop.eup %3392 }
 0xb54   :  { %v1924_v1 = vmul.f32 0.5, %v3393_v51  ;;  %v3395_v44 = vpop.eup %3394 }
 0xb55   :  { %v1929_v57 = vmul.f32 0.5, %v3395_v44 }
 0xb56   :  { %v1925_v53 = vadd.f32 0.5, %v1924_v1 }
 0xb57   :  { %v1930_v30 = vadd.f32 0.5, %v1929_v57 }
 0xb58   :  { %v1932_v0 = vmul.f32 %v1931_v16, %v1925_v53 }
 0xb5a   :  { %v1933_v29 = vadd.f32 %v1932_v0, %v1444_v17 }
 0xb5c   :  { %3396 = vtanh.f32 %v1933_v29 }
 0xb66   :  { %v3397_v37 = vpop.eup %3396 }
 0xb67   :  { %v1935_v58 = vsub.f32 %v4355_v42, %v3397_v37  ;;  %v1379_v42 = vadd.f32 %v4221_v20, %v4292_v54  ;;  %v1447_v20 = vadd.f32 %v4207_v2, %v4303_v39  ;;  %v1383_v2 = vadd.f32 %v4226_v21, %v4286_v43 }
 0xb69   :  { %v1936_v59 = vmul.f32 %v1935_v58, %v1930_v30 }
 0xb6b   :  { %v4402_v18 = vadd.f32 %v3397_v37, %v1936_v59 }
 0xb6d   :  { %v1944_v31 = vpack.c.bf16 %v4402_v18, %v4402_v18 }
 0xb6f   :  { %1978 = vmatmul.mubr.bf16.vlgmr.msra.gmra.mrb[60].mxu0 %v1944_v31  ;;  %3110 = vmatmul.mubr.bf16.vlgmr.msra.gmra.mrb[52].mxu1 %v1944_v31 }
 0xb70   :  { %2051 = vmatpush1.bf16.msra.mxu0 %v4115_v61  ;;  %3114 = vmatpush3.bf16.msra.mxu1 %v4137_v27 }
 0xb71   :  { %2052 = vmatprep.subr.bf16.mxu0 %v4119_v38  ;;  %3115 = vmatprep.subr.bf16.mxu1 %v4616_v50 }
 0xb72   :  { %2082 = vmatprep.mubr.bf16.mxu0 %v4617_v41  ;;  %3129 = vmatprep.mubr.msk.bf16.mxu1 %vm3627_vm0, %v4616_v50 }
 0xb74   :  { %2053 = vmatpush1.bf16.msra.mxu0 %v4121_v32  ;;  %3116 = vmatpush3.bf16.msra.mxu1 %v4149_v6 }
 0xb75   :  { %2054 = vmatprep.subr.bf16.mxu0 %v4125_v26  ;;  %3117 = vmatprep.subr.bf16.mxu1 %v4616_v50 }
 0xb78   :  { %2055 = vmatpush1.bf16.msra.mxu0 %v4127_v36  ;;  %3118 = vmatpush3.bf16.msra.mxu1 %v4157_v8 }
 0xb79   :  { %2056 = vmatprep.subr.bf16.mxu0 %v4131_v62  ;;  %3119 = vmatprep.subr.bf16.mxu1 %v4616_v50 }
 0xb7c   :  { %2057 = vmatpush1.bf16.msra.mxu0 %v4133_v63  ;;  %3120 = vmatpush3.bf16.msra.mxu1 %v4168_v11 }
 0xb7d   :  { %2058 = vmatprep.subr.bf16.mxu0 %v4139_v3  ;;  %3121 = vmatprep.subr.bf16.mxu1 %v4616_v50 }
 0xb80   :  { %2059 = vmatpush1.bf16.msra.mxu0 %v4142_v4  ;;  %3122 = vmatpush3.bf16.msra.mxu1 %v4177_v13 }
 0xb81   :  { %2060 = vmatprep.subr.bf16.mxu0 %v4147_v5  ;;  %3123 = vmatprep.subr.bf16.mxu1 %v4616_v50 }
 0xb84   :  { %2061 = vmatpush1.bf16.msra.mxu0 %v4153_v7  ;;  %3124 = vmatpush3.bf16.msra.mxu1 %v4182_v14 }
 0xb85   :  { %2062 = vmatprep.subr.bf16.mxu0 %v4159_v24  ;;  %3125 = vmatprep.subr.bf16.mxu1 %v4616_v50 }
 0xb88   :  { %2063 = vmatpush1.bf16.msra.mxu0 %v4162_v9  ;;  %3126 = vmatpush3.bf16.msra.mxu1 %v4185_v25 }
 0xb89   :  { %2064 = vmatprep.subr.bf16.mxu0 %v4166_v10  ;;  %3127 = vmatprep.subr.bf16.mxu1 %v4616_v50 }
 0xb8c   :  { %2065 = vmatpush1.bf16.msra.mxu0 %v4173_v12  ;;  %3128 = vmatpush3.bf16.msra.mxu1 %v4189_v15 }
 0xb8d   :  { %2155 = vmatprep.subr.bf16.mxu0 %v4113_v60  ;;  %3133 = vmatprep.subr.bf16.mxu1 %v4616_v50 }
 0xc42   :  { %v1979_v46 = vpop.f32.mrb[60].mxu0  ;;  %v2020_v33 = vpop.f32.mrb[52].mxu1 }
 0xc43   :  { %v2026_v52 = vadd.f32 %v1979_v46, %v1377_v48  ;;  %v1981_v56 = vpop.f32.mrb[61].mxu0  ;;  %v3111_v55 = vpop.f32.mrb[53].mxu1  ;;  %v2036_v19 = vadd.f32 %v4301_v47, %v2020_v33 }
 0xc44   :  { %v2031_v49 = vadd.f32 %v1981_v56, %v1379_v42  ;;  %v1983_v34 = vpop.f32.mrb[62].mxu0  ;;  %v2023_v51 = vpop.f32.mrb[54].mxu1 }
 0xc45   :  { %v2027_v1 = vmul.f32 0.5, %v2026_v52  ;;  %v1984_v53 = vpop.f32.mrb[63].mxu0  ;;  %v3112_v16 = vpop.f32.mrb[55].mxu1 }
 0xc46   :  { %v2032_v17 = vmul.f32 0.5, %v2031_v49 }
 0xc47   :  { %3398 = vtanh.f32 %v2027_v1 }
 0xc48   :  { %3400 = vtanh.f32 %v2032_v17 }
 0xc51   :  { %v3399_v0 = vpop.eup %3398 }
 0xc52   :  { %v2029_v29 = vmul.f32 0.5, %v3399_v0  ;;  %v3401_v30 = vpop.eup %3400 }
 0xc53   :  { %v2034_v58 = vmul.f32 0.5, %v3401_v30 }
 0xc54   :  { %v2030_v44 = vadd.f32 0.5, %v2029_v29 }
 0xc55   :  { %v2035_v31 = vadd.f32 0.5, %v2034_v58 }
 0xc56   :  { %v2037_v57 = vmul.f32 %v2036_v19, %v2030_v44 }
 0xc58   :  { %v2038_v37 = vadd.f32 %v2037_v57, %v1447_v20 }
 0xc5a   :  { %3402 = vtanh.f32 %v2038_v37 }
 0xc64   :  { %v3403_v59 = vpop.eup %3402 }
 0xc65   :  { %v2040_v48 = vsub.f32 %v4402_v18, %v3403_v59  ;;  %v1385_v18 = vadd.f32 %v4228_v22, %v4292_v54  ;;  %v1452_v22 = vadd.f32 %v4280_v40, %v4303_v39 }
 0xc67   :  { %v2041_v42 = vmul.f32 %v2040_v48, %v2035_v31 }
 0xc69   :  { %v4449_v46 = vadd.f32 %v3403_v59, %v2041_v42 }
 0xc6b   :  { %v2049_v52 = vpack.c.bf16 %v4449_v46, %v4449_v46 }
 0xc6d   :  { %2083 = vmatmul.mubr.bf16.vlgmr.msra.gmra.mrb[64].mxu0 %v2049_v52  ;;  %3130 = vmatmul.mubr.bf16.vlgmr.msra.gmra.mrb[56].mxu1 %v2049_v52 }
 0xc6e   :  { %2156 = vmatpush1.bf16.msra.mxu0 %v4115_v61  ;;  %3134 = vmatpush3.bf16.msra.mxu1 %v4137_v27 }
 0xc6f   :  { %2157 = vmatprep.subr.bf16.mxu0 %v4119_v38  ;;  %3135 = vmatprep.subr.bf16.mxu1 %v4616_v50 }
 0xc70   :  { %2187 = vmatprep.mubr.bf16.mxu0 %v4617_v41  ;;  %3149 = vmatprep.mubr.msk.bf16.mxu1 %vm3627_vm0, %v4616_v50 }
 0xc72   :  { %2158 = vmatpush1.bf16.msra.mxu0 %v4121_v32  ;;  %3136 = vmatpush3.bf16.msra.mxu1 %v4149_v6 }
 0xc73   :  { %2159 = vmatprep.subr.bf16.mxu0 %v4125_v26  ;;  %3137 = vmatprep.subr.bf16.mxu1 %v4616_v50 }
 0xc76   :  { %2160 = vmatpush1.bf16.msra.mxu0 %v4127_v36  ;;  %3138 = vmatpush3.bf16.msra.mxu1 %v4157_v8 }
 0xc77   :  { %2161 = vmatprep.subr.bf16.mxu0 %v4131_v62  ;;  %3139 = vmatprep.subr.bf16.mxu1 %v4616_v50 }
 0xc7a   :  { %2162 = vmatpush1.bf16.msra.mxu0 %v4133_v63  ;;  %3140 = vmatpush3.bf16.msra.mxu1 %v4168_v11 }
 0xc7b   :  { %2163 = vmatprep.subr.bf16.mxu0 %v4139_v3  ;;  %3141 = vmatprep.subr.bf16.mxu1 %v4616_v50 }
 0xc7e   :  { %2164 = vmatpush1.bf16.msra.mxu0 %v4142_v4  ;;  %3142 = vmatpush3.bf16.msra.mxu1 %v4177_v13 }
 0xc7f   :  { %2165 = vmatprep.subr.bf16.mxu0 %v4147_v5  ;;  %3143 = vmatprep.subr.bf16.mxu1 %v4616_v50 }
 0xc82   :  { %2166 = vmatpush1.bf16.msra.mxu0 %v4153_v7  ;;  %3144 = vmatpush3.bf16.msra.mxu1 %v4182_v14 }
 0xc83   :  { %2167 = vmatprep.subr.bf16.mxu0 %v4159_v24  ;;  %3145 = vmatprep.subr.bf16.mxu1 %v4616_v50 }
 0xc86   :  { %2168 = vmatpush1.bf16.msra.mxu0 %v4162_v9  ;;  %3146 = vmatpush3.bf16.msra.mxu1 %v4185_v25 }
 0xc87   :  { %2169 = vmatprep.subr.bf16.mxu0 %v4166_v10  ;;  %3147 = vmatprep.subr.bf16.mxu1 %v4616_v50 }
 0xc8a   :  { %2170 = vmatpush1.bf16.msra.mxu0 %v4173_v12  ;;  %3148 = vmatpush3.bf16.msra.mxu1 %v4189_v15 }
 0xc8b   :  { %2260 = vmatprep.subr.bf16.mxu0 %v4113_v60  ;;  %3153 = vmatprep.subr.bf16.mxu1 %v4616_v50 }
 0xd40   :  { %v2084_v33 = vpop.f32.mrb[64].mxu0  ;;  %v2125_v56 = vpop.f32.mrb[56].mxu1 }
 0xd41   :  { %v2131_v55 = vadd.f32 %v2084_v33, %v1383_v2  ;;  %v2086_v49 = vpop.f32.mrb[65].mxu0  ;;  %v3131_v34 = vpop.f32.mrb[57].mxu1  ;;  %v2141_v21 = vadd.f32 %v4301_v47, %v2125_v56  ;;  %v3451_v33 = vld [vmem:[#allocation10] ss:$12 sps:$4 sm:$0xff]   ;;  %v3453_v56 = vld [vmem:[#allocation10 + $0x1c] ss:$12 sps:$4 sm:$0xff]  }
 0xd42   :  { %v2136_v51 = vadd.f32 %v2086_v49, %v1385_v18  ;;  %v2088_v1 = vpop.f32.mrb[66].mxu0  ;;  %v2128_v53 = vpop.f32.mrb[58].mxu1  ;;  %v3455_v49 = vld [vmem:[#allocation10 + $0x20] ss:$12 sps:$4 sm:$0xff]  }
 0xd43   :  { %v2132_v16 = vmul.f32 0.5, %v2131_v55  ;;  %v2089_v17 = vpop.f32.mrb[67].mxu0  ;;  %v3132_v0 = vpop.f32.mrb[59].mxu1  ;;  %v3454_v55 = vld [vmem:[#allocation10 + $0x18] ss:$12 sps:$4 sm:$0xff]  }
 0xd44   :  { %v2137_v29 = vmul.f32 0.5, %v2136_v51  ;;  %v3456_v34 = vld [vmem:[#allocation10 + $0x34] ss:$12 sps:$4 sm:$0xff]   ;;  %v3457_v51 = vld [vmem:[#allocation10 + $0x30] ss:$12 sps:$4 sm:$0xff]  }
 0xd45   :  { %3404 = vtanh.f32 %v2132_v16  ;;  %v3458_v1 = vld [vmem:[#allocation10 + $0x38] ss:$12 sps:$4 sm:$0xff]   ;;  %v3461_v16 = vld [vmem:[#allocation10 + $0x50] ss:$12 sps:$4 sm:$0xff]   ;;  %v3463_v0 = vld [vmem:[#allocation10 + $0x60] ss:$12 sps:$4 sm:$0xff]  }
 0xd46   :  { %3406 = vtanh.f32 %v2137_v29  ;;  %v3459_v53 = vld [vmem:[#allocation10 + $0x4c] ss:$12 sps:$4 sm:$0xff]   ;;  %v3462_v17 = vld [vmem:[#allocation10 + $0x64] ss:$12 sps:$4 sm:$0xff]   ;;  %v3464_v29 = vld [vmem:[#allocation10 + $0x68] ss:$12 sps:$4 sm:$0xff]  }
 0xd4f   :  { %v3405_v44 = vpop.eup %3404 }
 0xd50   :  { %v2134_v19 = vmul.f32 0.5, %v3405_v44  ;;  %v3407_v30 = vpop.eup %3406  ;;  %v3465_v44 = vld [vmem:[#allocation10 + $0x7c] ss:$12 sps:$4 sm:$0xff]  }
 0xd51   :  { %v2139_v58 = vmul.f32 0.5, %v3407_v30  ;;  %v3472_v30 = vld [vmem:[#allocation10 + $0xa8] ss:$12 sps:$4 sm:$0xff]  }
 0xd52   :  { %v2135_v20 = vadd.f32 0.5, %v2134_v19  ;;  %v3466_v19 = vld [vmem:[#allocation10 + $0x78] ss:$12 sps:$4 sm:$0xff]  }
 0xd53   :  { %v2140_v31 = vadd.f32 0.5, %v2139_v58  ;;  %v3473_v58 = vld [vmem:[#allocation10 + $0xb0] ss:$12 sps:$4 sm:$0xff]  }
 0xd54   :  { %v2142_v57 = vmul.f32 %v2141_v21, %v2135_v20  ;;  %v3467_v20 = vld [vmem:[#allocation10 + $0x80] ss:$12 sps:$4 sm:$0xff]  }
 0xd55   :  { %v3468_v21 = vld [vmem:[#allocation10 + $0x94] ss:$12 sps:$4 sm:$0xff]  }
 0xd56   :  { %v2143_v37 = vadd.f32 %v2142_v57, %v1452_v22  ;;  %v3469_v22 = vld [vmem:[#allocation10 + $0x90] ss:$12 sps:$4 sm:$0xff]   ;;  %v3470_v57 = vld [vmem:[#allocation10 + $0x98] ss:$12 sps:$4 sm:$0xff]  }
 0xd58   :  { %3408 = vtanh.f32 %v2143_v37  ;;  %v3471_v37 = vld [vmem:[#allocation10 + $0xac] ss:$12 sps:$4 sm:$0xff]  }
 0xd62   :  { %v3409_v59 = vpop.eup %3408 }
 0xd63   :  { %v2145_v48 = vsub.f32 %v4449_v46, %v3409_v59 }
 0xd65   :  { %v2146_v42 = vmul.f32 %v2145_v48, %v2140_v31  ;;  %v4618_v31 = vld [vmem:[#allocation19_spill] sm:$0xff] }
 0xd66   :  { %v1395_v48 = vadd.f32 %v4618_v31, %v4292_v54 }
 0xd67   :  { %v4496_v52 = vadd.f32 %v3409_v59, %v2146_v42  ;;  %v1393_v59 = vadd.f32 %v4274_v35, %v4286_v43 }
 0xd69   :  { %v2154_v2 = vpack.c.bf16 %v4496_v52, %v4496_v52 }
 0xd6b   :  { %2188 = vmatmul.mubr.bf16.vlgmr.msra.gmra.mrb[68].mxu0 %v2154_v2  ;;  %3150 = vmatmul.mubr.bf16.vlgmr.msra.gmra.mrb[60].mxu1 %v2154_v2 }
 0xd6c   :  { %2261 = vmatpush1.bf16.msra.mxu0 %v4115_v61  ;;  %3154 = vmatpush3.bf16.msra.mxu1 %v4137_v27  ;;  %v1387_v61 = vadd.f32 %v4230_v23, %v4286_v43 }
 0xd6d   :  { %2262 = vmatprep.subr.bf16.mxu0 %v4119_v38  ;;  %3155 = vmatprep.subr.bf16.mxu1 %v4616_v50  ;;  %v1389_v38 = vadd.f32 %v4232_v28, %v4292_v54 }
 0xd6e   :  { %2292 = vmatprep.mubr.bf16.mxu0 %v4617_v41  ;;  %3169 = vmatprep.mubr.msk.bf16.mxu1 %vm3627_vm0, %v4616_v50 }
 0xd70   :  { %2263 = vmatpush1.bf16.msra.mxu0 %v4121_v32  ;;  %3156 = vmatpush3.bf16.msra.mxu1 %v4149_v6 }
 0xd71   :  { %2264 = vmatprep.subr.bf16.mxu0 %v4125_v26  ;;  %3157 = vmatprep.subr.bf16.mxu1 %v4616_v50 }
 0xd74   :  { %2265 = vmatpush1.bf16.msra.mxu0 %v4127_v36  ;;  %3158 = vmatpush3.bf16.msra.mxu1 %v4157_v8 }
 0xd75   :  { %2266 = vmatprep.subr.bf16.mxu0 %v4131_v62  ;;  %3159 = vmatprep.subr.bf16.mxu1 %v4616_v50 }
 0xd78   :  { %2267 = vmatpush1.bf16.msra.mxu0 %v4133_v63  ;;  %3160 = vmatpush3.bf16.msra.mxu1 %v4168_v11  ;;  %v1455_v11 = vadd.f32 %v4290_v45, %v4303_v39  ;;  %v3452_v45 = vld [vmem:[#allocation10 + $0x8] ss:$12 sps:$4 sm:$0xff]  }
 0xd79   :  { %2268 = vmatprep.subr.bf16.mxu0 %v4139_v3  ;;  %3161 = vmatprep.subr.bf16.mxu1 %v4616_v50 }
 0xd7c   :  { %2269 = vmatpush1.bf16.msra.mxu0 %v4142_v4  ;;  %3162 = vmatpush3.bf16.msra.mxu1 %v4177_v13 }
 0xd7d   :  { %2270 = vmatprep.subr.bf16.mxu0 %v4147_v5  ;;  %3163 = vmatprep.subr.bf16.mxu1 %v4616_v50 }
 0xd80   :  { %2271 = vmatpush1.bf16.msra.mxu0 %v4153_v7  ;;  %3164 = vmatpush3.bf16.msra.mxu1 %v4182_v14 }
 0xd81   :  { %2272 = vmatprep.subr.bf16.mxu0 %v4159_v24  ;;  %3165 = vmatprep.subr.bf16.mxu1 %v4616_v50 }
 0xd84   :  { %2273 = vmatpush1.bf16.msra.mxu0 %v4162_v9  ;;  %3166 = vmatpush3.bf16.msra.mxu1 %v4185_v25 }
 0xd85   :  { %2274 = vmatprep.subr.bf16.mxu0 %v4166_v10  ;;  %3167 = vmatprep.subr.bf16.mxu1 %v4616_v50 }
 0xd88   :  { %2275 = vmatpush1.bf16.msra.mxu0 %v4173_v12  ;;  %3168 = vmatpush3.bf16.msra.mxu1 %v4189_v15 }
 0xd89   :  { %2365 = vmatprep.subr.bf16.mxu0 %v4113_v60  ;;  %3173 = vmatprep.subr.bf16.mxu1 %v4616_v50 }
 0xe3e   :  { %v2189_v32 = vpop.f32.mrb[68].mxu0  ;;  %v2230_v26 = vpop.f32.mrb[60].mxu1 }
 0xe3f   :  { %v2236_v36 = vadd.f32 %v2189_v32, %v1387_v61  ;;  %v2191_v62 = vpop.f32.mrb[69].mxu0  ;;  %v3151_v63 = vpop.f32.mrb[61].mxu1  ;;  %v2246_v10 = vadd.f32 %v4301_v47, %v2230_v26 }
 0xe40   :  { %v2241_v27 = vadd.f32 %v2191_v62, %v1389_v38  ;;  %v2193_v3 = vpop.f32.mrb[70].mxu0  ;;  %v2233_v4 = vpop.f32.mrb[62].mxu1 }
 0xe41   :  { %v2237_v5 = vmul.f32 0.5, %v2236_v36  ;;  %v2194_v6 = vpop.f32.mrb[71].mxu0  ;;  %v3152_v7 = vpop.f32.mrb[63].mxu1 }
 0xe42   :  { %v2242_v60 = vmul.f32 0.5, %v2241_v27  ;;  %v4619_v7 = vld [vmem:[#allocation18_spill] sm:$0xff] }
 0xe43   :  { %3410 = vtanh.f32 %v2237_v5 }
 0xe44   :  { %3412 = vtanh.f32 %v2242_v60  ;;  %v1460_v60 = vadd.f32 %v4619_v7, %v4303_v39 }
 0xe4d   :  { %v3411_v8 = vpop.eup %3410 }
 0xe4e   :  { %v2239_v24 = vmul.f32 0.5, %v3411_v8  ;;  %v3413_v14 = vpop.eup %3412 }
 0xe4f   :  { %v2244_v25 = vmul.f32 0.5, %v3413_v14 }
 0xe50   :  { %v2240_v9 = vadd.f32 0.5, %v2239_v24 }
 0xe51   :  { %v2245_v23 = vadd.f32 0.5, %v2244_v25 }
 0xe52   :  { %v2247_v12 = vmul.f32 %v2246_v10, %v2240_v9 }
 0xe54   :  { %v2248_v13 = vadd.f32 %v2247_v12, %v1455_v11 }
 0xe56   :  { %3414 = vtanh.f32 %v2248_v13 }
 0xe60   :  { %v3415_v15 = vpop.eup %3414 }
 0xe61   :  { %v2250_v28 = vsub.f32 %v4496_v52, %v3415_v15 }
 0xe63   :  { %v2251_v40 = vmul.f32 %v2250_v28, %v2245_v23  ;;  %v3324_v23 = vld [vmem:[#allocation12] sm:$0xff]   ;;  %v3325_v28 = vld [vmem:[#allocation12 + $0x8] sm:$0xff]  }
 0xe65   :  { %v4543_v46 = vadd.f32 %v3415_v15, %v2251_v40  ;;  %v3326_v40 = vld [vmem:[#allocation12 + $0x10] sm:$0xff]  }
 0xe67   :  { %v2259_v18 = vpack.c.bf16 %v4543_v46, %v4543_v46 }
 0xe69   :  { %2293 = vmatmul.mubr.bf16.vlgmr.msra.gmra.mrb[72].mxu0 %v2259_v18  ;;  %3170 = vmatmul.mubr.bf16.vlgmr.msra.gmra.mrb[64].mxu1 %v2259_v18  ;;  %v3328_v18 = vld [vmem:[#allocation12 + $0x20] sm:$0xff]  }
 0xe6a   :  { %2366 = vmatpush1.bf16.msra.mxu0 %v3451_v33  ;;  %3174 = vmatpush3.bf16.msra.mxu1 %v3452_v45  ;;  %v3329_v33 = vld [vmem:[#allocation12 + $0x28] sm:$0xff]   ;;  %v3330_v45 = vld [vmem:[#allocation12 + $0x30] sm:$0xff]  }
 0xe6b   :  { %2367 = vmatprep.subr.bf16.mxu0 %v3453_v56  ;;  %3175 = vmatprep.subr.bf16.mxu1 %v4616_v50  ;;  %v3331_v56 = vld [vmem:[#allocation12 + $0x38] sm:$0xff]  }
 0xe6c   :  { %2397 = vmatprep.mubr.bf16.mxu0 %v4617_v41  ;;  %3189 = vmatprep.mubr.msk.bf16.mxu1 %vm3627_vm0, %v4616_v50  ;;  %v3460_v41 = vld [vmem:[#allocation10 + $0x48] ss:$12 sps:$4 sm:$0xff]  }
 0xe6e   :  { %2368 = vmatpush1.bf16.msra.mxu0 %v3454_v55  ;;  %3176 = vmatpush3.bf16.msra.mxu1 %v3455_v49  ;;  %v4620_v55 = vld [vmem:[#allocation20_spill] sm:$0xff] }
 0xe6f   :  { %2369 = vmatprep.subr.bf16.mxu0 %v3456_v34  ;;  %3177 = vmatprep.subr.bf16.mxu1 %v4616_v50  ;;  %v1397_v49 = vadd.f32 %v4620_v55, %v4286_v43  ;;  %v4621_v34 = vld [vmem:[#allocation22_spill] sm:$0xff] }
 0xe72   :  { %2370 = vmatpush1.bf16.msra.mxu0 %v3457_v51  ;;  %3178 = vmatpush3.bf16.msra.mxu1 %v3458_v1  ;;  %v1399_v51 = vadd.f32 %v4621_v34, %v4292_v54  ;;  %v4622_v54 = vld [vmem:[#allocation21_spill] sm:$0xff] }
 0xe73   :  { %2371 = vmatprep.subr.bf16.mxu0 %v3459_v53  ;;  %3179 = vmatprep.subr.bf16.mxu1 %v4616_v50 }
 0xe76   :  { %2372 = vmatpush1.bf16.msra.mxu0 %v3460_v41  ;;  %3180 = vmatpush3.bf16.msra.mxu1 %v3461_v16 }
 0xe77   :  { %2373 = vmatprep.subr.bf16.mxu0 %v3462_v17  ;;  %3181 = vmatprep.subr.bf16.mxu1 %v4616_v50 }
 0xe7a   :  { %2374 = vmatpush1.bf16.msra.mxu0 %v3463_v0  ;;  %3182 = vmatpush3.bf16.msra.mxu1 %v3464_v29 }
 0xe7b   :  { %2375 = vmatprep.subr.bf16.mxu0 %v3465_v44  ;;  %3183 = vmatprep.subr.bf16.mxu1 %v4616_v50 }
 0xe7e   :  { %2376 = vmatpush1.bf16.msra.mxu0 %v3466_v19  ;;  %3184 = vmatpush3.bf16.msra.mxu1 %v3467_v20 }
 0xe7f   :  { %2377 = vmatprep.subr.bf16.mxu0 %v3468_v21  ;;  %3185 = vmatprep.subr.bf16.mxu1 %v4616_v50 }
 0xe82   :  { %2378 = vmatpush1.bf16.msra.mxu0 %v3469_v22  ;;  %3186 = vmatpush3.bf16.msra.mxu1 %v3470_v57 }
 0xe83   :  { %2379 = vmatprep.subr.bf16.mxu0 %v3471_v37  ;;  %3187 = vmatprep.subr.bf16.mxu1 %v4616_v50 }
 0xe86   :  { %2380 = vmatpush1.bf16.msra.mxu0 %v3472_v30  ;;  %3188 = vmatpush3.bf16.msra.mxu1 %v3473_v58  ;;  %v1463_v30 = vadd.f32 %v4622_v54, %v4303_v39 }
 0xe87   :  { %3193 = vmatprep.subr.bf16.mxu0 %v4616_v50 }
 0xf3c   :  { %v2294_v42 = vpop.f32.mrb[72].mxu0  ;;  %v2335_v52 = vpop.f32.mrb[64].mxu1 }
 0xf3d   :  { %v2341_v2 = vadd.f32 %v2294_v42, %v1393_v59  ;;  %v2296_v61 = vpop.f32.mrb[73].mxu0  ;;  %v3171_v38 = vpop.f32.mrb[65].mxu1  ;;  %v2351_v35 = vadd.f32 %v4301_v47, %v2335_v52 }
 0xf3e   :  { %v2346_v32 = vadd.f32 %v2296_v61, %v1395_v48  ;;  %v2298_v26 = vpop.f32.mrb[74].mxu0  ;;  %v2338_v36 = vpop.f32.mrb[66].mxu1 }
 0xf3f   :  { %v2342_v62 = vmul.f32 0.5, %v2341_v2  ;;  %v2299_v63 = vpop.f32.mrb[75].mxu0  ;;  %v3172_v27 = vpop.f32.mrb[67].mxu1 }
 0xf40   :  { %v2347_v3 = vmul.f32 0.5, %v2346_v32 }
 0xf41   :  { %3416 = vtanh.f32 %v2342_v62 }
 0xf42   :  { %3418 = vtanh.f32 %v2347_v3 }
 0xf4b   :  { %v3417_v4 = vpop.eup %3416 }
 0xf4c   :  { %v2344_v5 = vmul.f32 0.5, %v3417_v4  ;;  %v3419_v9 = vpop.eup %3418 }
 0xf4d   :  { %v2349_v10 = vmul.f32 0.5, %v3419_v9 }
 0xf4e   :  { %v2345_v6 = vadd.f32 0.5, %v2344_v5 }
 0xf4f   :  { %v2350_v12 = vadd.f32 0.5, %v2349_v10 }
 0xf50   :  { %v2352_v8 = vmul.f32 %v2351_v35, %v2345_v6 }
 0xf52   :  { %v2353_v24 = vadd.f32 %v2352_v8, %v1460_v60 }
 0xf54   :  { %3420 = vtanh.f32 %v2353_v24 }
 0xf5e   :  { %v3421_v11 = vpop.eup %3420 }
 0xf5f   :  { %v2355_v13 = vsub.f32 %v4543_v46, %v3421_v11  ;;  %v3327_v46 = vld [vmem:[#allocation12 + $0x18] sm:$0xff]  }
 0xf61   :  { %v2356_v14 = vmul.f32 %v2355_v13, %v2350_v12 }
 0xf63   :  { %v2357_v25 = vadd.f32 %v3421_v11, %v2356_v14 }
 0xf65   :  { %v2364_v15 = vpack.c.bf16 %v2357_v25, %v2357_v25 }
 0xf67   :  { %2398 = vmatmul.mubr.bf16.vlgmr.msra.gmra.mrb[76].mxu0 %v2364_v15  ;;  %3190 = vmatmul.mubr.bf16.vlgmr.msra.gmra.mrb[68].mxu1 %v2364_v15 }
 0xf68   :  { %3209 = vmatprep.mubr.msk.bf16.mxu0 %vm3627_vm0, %v4616_v50  ;;  %3194 = vmatpush3.bf16.msra.mxu0 %v3324_v23 }
 0xf69   :  { %3195 = vmatprep.subr.bf16.mxu0 %v4616_v50 }
 0xf6c   :  { %3196 = vmatpush3.bf16.msra.mxu0 %v3325_v28 }
 0xf6d   :  { %3197 = vmatprep.subr.bf16.mxu0 %v4616_v50 }
 0xf70   :  { %3198 = vmatpush3.bf16.msra.mxu0 %v3326_v40 }
 0xf71   :  { %3199 = vmatprep.subr.bf16.mxu0 %v4616_v50 }
 0xf74   :  { %3200 = vmatpush3.bf16.msra.mxu0 %v3327_v46 }
 0xf75   :  { %3201 = vmatprep.subr.bf16.mxu0 %v4616_v50 }
 0xf78   :  { %3202 = vmatpush3.bf16.msra.mxu0 %v3328_v18 }
 0xf79   :  { %3203 = vmatprep.subr.bf16.mxu0 %v4616_v50 }
 0xf7c   :  { %3204 = vmatpush3.bf16.msra.mxu0 %v3329_v33 }
 0xf7d   :  { %3205 = vmatprep.subr.bf16.mxu0 %v4616_v50 }
 0xf80   :  { %3206 = vmatpush3.bf16.msra.mxu0 %v3330_v45 }
 0xf81   :  { %3207 = vmatprep.subr.bf16.mxu0 %v4616_v50 }
 0xf84   :  { %3208 = vmatpush3.bf16.msra.mxu0 %v3331_v56 }
0x103a   :  { %v2399_v1 = vpop.f32.mrb[76].mxu0  ;;  %v2440_v53 = vpop.f32.mrb[68].mxu1 }
0x103b   :  { %v2446_v41 = vadd.f32 %v2399_v1, %v1397_v49  ;;  %v2401_v16 = vpop.f32.mrb[77].mxu0  ;;  %v3191_v17 = vpop.f32.mrb[69].mxu1  ;;  %v2456_v43 = vadd.f32 %v4301_v47, %v2440_v53  ;;  %v2675_v47 = vld [vmem:[%s4605_s8] ss:$0 sm:$0xff] }
0x103c   :  { %v2451_v0 = vadd.f32 %v2401_v16, %v1399_v51  ;;  %v2403_v29 = vpop.f32.mrb[78].mxu0  ;;  %v2443_v44 = vpop.f32.mrb[70].mxu1 }
0x103d   :  { %v2447_v19 = vmul.f32 0.5, %v2446_v41  ;;  %v2404_v20 = vpop.f32.mrb[79].mxu0  ;;  %v3192_v21 = vpop.f32.mrb[71].mxu1 }
0x103e   :  { %v2452_v50 = vmul.f32 0.5, %v2451_v0 }
0x103f   :  { %3422 = vtanh.f32 %v2447_v19 }
0x1040   :  { %3424 = vtanh.f32 %v2452_v50 }
0x1049   :  { %v3423_v22 = vpop.eup %3422 }
0x104a   :  { %v2449_v57 = vmul.f32 0.5, %v3423_v22  ;;  %v3425_v31 = vpop.eup %3424 }
0x104b   :  { %v2454_v48 = vmul.f32 0.5, %v3425_v31 }
0x104c   :  { %v2450_v37 = vadd.f32 0.5, %v2449_v57 }
0x104d   :  { %v2455_v52 = vadd.f32 0.5, %v2454_v48 }
0x104e   :  { %v2457_v58 = vmul.f32 %v2456_v43, %v2450_v37 }
0x1050   :  { %v2458_v59 = vadd.f32 %v2457_v58, %v1463_v30 }
0x1052   :  { %3426 = vtanh.f32 %v2458_v59 }
0x105c   :  { %v3427_v42 = vpop.eup %3426 }
0x105d   :  { %v2460_v2 = vsub.f32 %v2357_v25, %v3427_v42 }
0x105f   :  { %v2461_v61 = vmul.f32 %v2460_v2, %v2455_v52 }
0x1061   :  { %v2462_v38 = vadd.f32 %v3427_v42, %v2461_v61 }
0x1063   :  { %v2463_v32 = vmax.f32 %v2462_v38, 0.0 }
0x1065   :  { %v2464_v26 = vpack.c.bf16 %v2463_v32, %v2463_v32 }
0x1067   :  { %3210 = vmatmul.mubr.bf16.vlgmr.msra.gmra.mrb[80].mxu0 %v2464_v26 }
0x113a   :  { %v2570_v39 = vpop.f32.mrb[80].mxu0 }
0x113b   :  { %v2571_v36 = vadd.f32 %v2675_v47, %v2570_v39  ;;  %v3211_v62 = vpop.f32.mrb[81].mxu0 }
0x113c   :  { %v2573_v63 = vpop.f32.mrb[82].mxu0 }
0x113d   :  { %2576 = vst [vmem:[#allocation13] sm:$0xff] %v2571_v36  ;;  %v3212_v27 = vpop.f32.mrb[83].mxu0 }
0x113e   :  { %3595 = shalt.err (!%p3592_p2)
}
0x113f   :  { %s3596_s8 = scalar_lea.hbm %s4606_s9, 128 }
0x1140   :  { %p3597_p3 = scmp.ne.s32.totalorder %s4606_s9, %s3596_s8  ;;  %p3600_p4 = scmp.lt.u32.totalorder %s3596_s8, %s4606_s9 }
0x1142   :  { %p3602_p5 = pnand %p3600_p4, %p3597_p3 }
0x1144   :  { %3605 = shalt.err (!%p3602_p5)
}
0x1145   :  { %2586 = dma.vmem_to_hbm [thread:$0]  %s2584_s15, 128, %s4606_s9, [#allocation6]  }
0x1146   :  { %3612 = dma.done.wait [#allocation6], 128  }
0x1147   :  { %3613 = vsyncadd [#allocation6], 4294967168 }
0x1148   :  { %2590 = vsyncpa [#allocation5], 1 }
0x1149   :  { %2591 = vsyncpa [#allocation8], 1 }
0x114a   :  { %2592 = vsyncpa [#allocation11], 1 }
0x114b   :  { %2593 = vsyncpa [#allocation6], 1 }

</bundles_post_ra>
